<compile_context>
chip_gen: v7x
topology: tpu7x:2x2x1
jax: 0.10.0
libtpu: 0.0.40
codegen_flags: <defaults>
</compile_context>

<pallas_src>
import functools

import jax
import jax.numpy as jnp
from jax.experimental import pallas as pl
from jax.experimental.pallas import tpu as pltpu


def _round_up(v, m):
    return -(-v // m) * m


def _correction_net_kernel(x_ref, w1_ref, b1_ref, w2_ref, b2_ref, w3_ref, b3_ref,
                           o_ref, a_pad_ref, patch_ref, *, H, W, NB):
    """Fused 3-layer CorrectionNet forward for a block of NB images.

    x_ref:     (NB, Cin_p, H*W)       input block, NCHW-flat (channels padded to 8)
    wX_ref:    (CoutX, 9*CinX)        im2col weight slab (tap-major, channel-minor)
    bX_ref:    (CoutX, 1)             bias
    o_ref:     (NB, Cout3, H*W)       output block, NCHW-flat
    a_pad_ref: (Cmax, NB*(H+4)*W)     VMEM: per-image row-flattened activation with
                                      2 zero pad rows on top and 2 at the bottom
                                      (1 conv-pad row + 1 slack row per side)
    patch_ref: (9*Cmax, NB*H*W)       VMEM: im2col patch slab
    """
    HW = H * W
    IMG = (H + 4) * W                       # per-image stride in the padded buffer
    f32 = jnp.float32

    # Lane masks fixing the horizontal wrap of the row-flattened shifted slices:
    # a kx=0 tap must contribute 0 at output column x==0, a kx=2 tap at x==W-1.
    col = jax.lax.broadcasted_iota(jnp.int32, (1, HW), 1) % W
    mask_l = (col != 0).astype(f32)         # kx == 0 taps
    mask_r = (col != W - 1).astype(f32)     # kx == 2 taps

    # Zero the padded-activation scratch; the pad rows are never written again,
    # the interior is overwritten by every layer.
    a_pad_ref[...] = jnp.zeros_like(a_pad_ref)

    def conv_layer(get_img, w_ref, b_ref, relu):
        cin = w_ref.shape[1] // 9
        # Write each image's activation into its interior (rows 2 .. H+1 of its block).
        for j in range(NB):
            base = j * IMG
            a_pad_ref[0:cin, base + 2 * W: base + (H + 2) * W] = get_img(j)

        # im2col: 9 shifted (edge-masked) copies per image -> (9*cin, NB*HW) slab.
        t = 0
        for ky in range(3):
            for kx in range(3):
                off = (ky + 1) * W + kx - 1          # static offset into the flat buffer
                for j in range(NB):
                    base = j * IMG
                    slab = a_pad_ref[0:cin, base + off: base + off + HW]
                    if kx == 0:
                        slab = slab * mask_l
                    elif kx == 2:
                        slab = slab * mask_r
                    patch_ref[t * cin:(t + 1) * cin, j * HW:(j + 1) * HW] = slab
                t += 1

        # One MXU contraction for the whole block: (Cout, 9*cin) x (9*cin, NB*HW).
        out = jax.lax.dot_general(
            w_ref[...], patch_ref[0:9 * cin, :],
            dimension_numbers=(((1,), (0,)), ((), ())),
            preferred_element_type=jnp.float32,
        ) + b_ref[...]
        return jnp.maximum(out, 0.0) if relu else out

    a1 = conv_layer(lambda j: x_ref[j], w1_ref, b1_ref, relu=True)              # (16, NB*HW)
    a2 = conv_layer(lambda j: a1[:, j * HW:(j + 1) * HW], w2_ref, b2_ref, True)  # (16, NB*HW)
    a3 = conv_layer(lambda j: a2[:, j * HW:(j + 1) * HW], w3_ref, b3_ref, False)  # (Cout, NB*HW)

    for j in range(NB):
        o_ref[j] = a3[:, j * HW:(j + 1) * HW].astype(o_ref.dtype)


def _prep_weight(w_oihw, cin_pad=None):
    """PyTorch OIHW (Cout, Cin, 3, 3) -> im2col slab (Cout, 9*Cin_pad), tap-major."""
    co, ci = w_oihw.shape[0], w_oihw.shape[1]
    w = jnp.transpose(w_oihw, (0, 2, 3, 1))                     # (Cout, 3, 3, Cin)
    if cin_pad is not None and cin_pad != ci:
        w = jnp.pad(w, ((0, 0), (0, 0), (0, 0), (0, cin_pad - ci)))
        ci = cin_pad
    return w.reshape(co, 9 * ci)


def _pick_batch_block(N, HW, lane_budget=2048):
    """Largest divisor of N with NB*HW <= lane_budget (caps lane width & VMEM)."""
    cap = max(1, lane_budget // HW)
    nb = 1
    for d in range(1, N + 1):
        if N % d == 0 and d <= cap:
            nb = d
    return nb


@jax.jit
def correction_net_forward(x_nchw, params):
    """CorrectionNet forward. Input NCHW, output NCHW. One fused pallas_call."""
    N, Cin, H, W = x_nchw.shape
    HW = H * W
    cin_p = _round_up(Cin, 8)                                    # aligned sublane stores

    x_flat = x_nchw.reshape(N, Cin, HW).astype(jnp.float32)      # free reshape, NCHW-flat
    if cin_p != Cin:
        x_flat = jnp.concatenate(
            [x_flat, jnp.zeros((N, cin_p - Cin, HW), jnp.float32)], axis=1)

    w1 = _prep_weight(params["w1"], cin_p); b1 = params["b1"].reshape(-1, 1)
    C1 = w1.shape[0]
    w2 = _prep_weight(params["w2"]);        b2 = params["b2"].reshape(-1, 1)
    C2 = w2.shape[0]
    w3 = _prep_weight(params["w3"]);        b3 = params["b3"].reshape(-1, 1)
    Cout = w3.shape[0]
    Cmax = max(cin_p, C1, C2)

    NB = _pick_batch_block(N, HW)
    kernel = functools.partial(_correction_net_kernel, H=H, W=W, NB=NB)

    out_flat = pl.pallas_call(
        kernel,
        out_shape=jax.ShapeDtypeStruct((N, Cout, HW), jnp.float32),
        grid=(N // NB,),
        in_specs=[
            pl.BlockSpec((NB, cin_p, HW), lambda n: (n, 0, 0)),
            pl.BlockSpec(w1.shape, lambda n: (0, 0)),     # constant index_map ->
            pl.BlockSpec((C1, 1),  lambda n: (0, 0)),     # weights stay VMEM-resident
            pl.BlockSpec(w2.shape, lambda n: (0, 0)),
            pl.BlockSpec((C2, 1),  lambda n: (0, 0)),
            pl.BlockSpec(w3.shape, lambda n: (0, 0)),
            pl.BlockSpec((Cout, 1), lambda n: (0, 0)),
        ],
        out_specs=pl.BlockSpec((NB, Cout, HW), lambda n: (n, 0, 0)),
        scratch_shapes=[
            pltpu.VMEM((Cmax, NB * (H + 4) * W), jnp.float32),   # padded flat activation
            pltpu.VMEM((9 * Cmax, NB * HW), jnp.float32),        # im2col patch slab
        ],
        compiler_params=pltpu.CompilerParams(
            dimension_semantics=("parallel",)),                  # v7x: blocks across cores
    )(x_flat, w1, b1, w2, b2, w3, b3)

    return out_flat.reshape(N, Cout, H, W)


def init_params(key, in_channels=2, out_channels=1):
    """Deterministic synthetic parameters matching CorrectionNet.__init__ (OIHW)."""
    ks = jax.random.split(key, 6)
    def w(k, cout, cin):
        return 0.1 * jax.random.normal(k, (cout, cin, 3, 3), jnp.float32)   # OIHW
    def bias(k, cout):
        return 0.1 * jax.random.normal(k, (cout,), jnp.float32)
    return {
        "w1": w(ks[0], 16, in_channels),  "b1": bias(ks[1], 16),
        "w2": w(ks[2], 16, 16),           "b2": bias(ks[3], 16),
        "w3": w(ks[4], out_channels, 16), "b3": bias(ks[5], out_channels),
    }


def _reference_forward(x_nchw, params):
    """Pure-JAX reference (lax.conv, OIHW weights) for correctness checking."""
    def conv(x, w_oihw, b, relu):
        y = jax.lax.conv_general_dilated(
            x, w_oihw, window_strides=(1, 1), padding="SAME",
            dimension_numbers=("NCHW", "OIHW", "NCHW"))
        y = y + b[None, :, None, None]
        return jnp.maximum(y, 0.0) if relu else y
    x = conv(x_nchw, params["w1"], params["b1"], True)
    x = conv(x, params["w2"], params["b2"], True)
    x = conv(x, params["w3"], params["b3"], False)
    return x


if __name__ == "__main__":
    key = jax.random.PRNGKey(0)
    k_x, k_p = jax.random.split(key)

    # in_channels=2 (state + dt), out_channels=1, small spatial grid.
    x = jax.random.normal(k_x, (2, 2, 16, 16), jnp.float32)     # NCHW
    params = init_params(k_p, in_channels=2, out_channels=1)

    out = correction_net_forward(x, params)
    out = jax.block_until_ready(out)

    ref = _reference_forward(x, params)
    assert out.shape == (2, 1, 16, 16)
    assert jnp.allclose(out, ref, atol=1e-4, rtol=1e-4)

    print("KERNEL_OK")
</pallas_src>

<mosaic_0001>
module attributes {stable_mosaic.version = 11 : i64} {
  func.func @_correction_net_kernel(%arg0: i32, %arg1: memref<2x8x256xf32, #tpu.memory_space<vmem>>, %arg2: memref<16x72xf32, #tpu.memory_space<vmem>>, %arg3: memref<16x1xf32, #tpu.memory_space<vmem>>, %arg4: memref<16x144xf32, #tpu.memory_space<vmem>>, %arg5: memref<16x1xf32, #tpu.memory_space<vmem>>, %arg6: memref<1x144xf32, #tpu.memory_space<vmem>>, %arg7: memref<1x1xf32, #tpu.memory_space<vmem>>, %arg8: memref<2x1x256xf32, #tpu.memory_space<vmem>>, %arg9: memref<16x640xf32, #tpu.memory_space<vmem>>, %arg10: memref<144x512xf32, #tpu.memory_space<vmem>>) attributes {dimension_semantics = [#tpu.dimension_semantics<parallel>], iteration_bounds = array<i64: 1>, scalar_prefetch = 0 : i64, scratch_operands = 2 : i64, tpu.core_type = #tpu.core_type<tc>, window_params = [{transform_indices = @transform_0, window_bounds = array<i64: 2, 8, 256>}, {pipeline_mode = #tpu.pipeline_mode<synchronous>, transform_indices = @transform_1, window_bounds = array<i64: 16, 72>}, {pipeline_mode = #tpu.pipeline_mode<synchronous>, transform_indices = @transform_2, window_bounds = array<i64: 16, 1>}, {pipeline_mode = #tpu.pipeline_mode<synchronous>, transform_indices = @transform_3, window_bounds = array<i64: 16, 144>}, {pipeline_mode = #tpu.pipeline_mode<synchronous>, transform_indices = @transform_4, window_bounds = array<i64: 16, 1>}, {pipeline_mode = #tpu.pipeline_mode<synchronous>, transform_indices = @transform_5, window_bounds = array<i64: 1, 144>}, {pipeline_mode = #tpu.pipeline_mode<synchronous>, transform_indices = @transform_6, window_bounds = array<i64: 1, 1>}, {transform_indices = @transform_7, window_bounds = array<i64: 2, 1, 256>}]} {
    %0 = tpu.iota {dimensions = array<i32: 1>} : vector<1x256xi32>
    %c16_i32 = arith.constant 16 : i32
    %c0_i32 = arith.constant 0 : i32
    %1 = arith.cmpi eq, %c16_i32, %c0_i32 : i32
    %c1_i32 = arith.constant 1 : i32
    %2 = arith.select %1, %c1_i32, %c16_i32 : i32
    %3 = vector.broadcast %2 : i32 to vector<1x256xi32>
    %4 = arith.remsi %0, %3 : vector<1x256xi32>
    %c0_i32_0 = arith.constant 0 : i32
    %5 = vector.broadcast %c0_i32_0 : i32 to vector<1x256xi32>
    %6 = arith.cmpi ne, %4, %5 : vector<1x256xi32>
    %c0_i32_1 = arith.constant 0 : i32
    %7 = vector.broadcast %c0_i32_1 : i32 to vector<1x256xi32>
    %8 = arith.cmpi slt, %4, %7 : vector<1x256xi32>
    %c0_i32_2 = arith.constant 0 : i32
    %9 = arith.cmpi slt, %2, %c0_i32_2 : i32
    %10 = vector.broadcast %9 : i1 to vector<1x256xi1>
    %11 = vector.broadcast %10 : vector<1x256xi1> to vector<1x256xi1>
    %12 = arith.xori %8, %11 : vector<1x256xi1>
    %13 = arith.andi %12, %6 : vector<1x256xi1>
    %14 = vector.broadcast %2 : i32 to vector<1x256xi32>
    %15 = arith.addi %4, %14 : vector<1x256xi32>
    %16 = arith.select %13, %15, %4 : vector<1x256xi1>, vector<1x256xi32>
    %c0_i32_3 = arith.constant 0 : i32
    %17 = vector.broadcast %c0_i32_3 : i32 to vector<1x256xi32>
    %18 = arith.cmpi ne, %16, %17 : vector<1x256xi32>
    %19 = arith.extui %18 : vector<1x256xi1> to vector<1x256xi32>
    %20 = arith.sitofp %19 : vector<1x256xi32> to vector<1x256xf32>
    %c15_i32 = arith.constant 15 : i32
    %21 = vector.broadcast %c15_i32 : i32 to vector<1x256xi32>
    %22 = arith.cmpi ne, %16, %21 : vector<1x256xi32>
    %23 = arith.extui %22 : vector<1x256xi1> to vector<1x256xi32>
    %24 = arith.sitofp %23 : vector<1x256xi32> to vector<1x256xf32>
    %cst = arith.constant 0.000000e+00 : f32
    %25 = vector.broadcast %cst : f32 to vector<16x640xf32>
    %c0 = arith.constant 0 : index
    %c0_4 = arith.constant 0 : index
    %26 = vector.load %arg9[%c0, %c0_4] : memref<16x640xf32, #tpu.memory_space<vmem>>, vector<16x640xf32>
    tpu.vector_store %arg9[%c0, %c0_4], %25 {strides = array<i32>} : memref<16x640xf32, #tpu.memory_space<vmem>>, vector<16x640xf32>,
    %c0_5 = arith.constant 0 : index
    %c0_6 = arith.constant 0 : index
    %c0_7 = arith.constant 0 : index
    %27 = vector.load %arg1[%c0_5, %c0_6, %c0_7] : memref<2x8x256xf32, #tpu.memory_space<vmem>>, vector<1x8x256xf32>
    %28 = vector.shape_cast %27 : vector<1x8x256xf32> to vector<8x256xf32>
    %c0_8 = arith.constant 0 : index
    %c32 = arith.constant 32 : index
    %29 = vector.load %arg9[%c0_8, %c32] : memref<16x640xf32, #tpu.memory_space<vmem>>, vector<8x256xf32>
    tpu.vector_store %arg9[%c0_8, %c32], %28 {strides = array<i32>} : memref<16x640xf32, #tpu.memory_space<vmem>>, vector<8x256xf32>,
    %c1 = arith.constant 1 : index
    %c0_9 = arith.constant 0 : index
    %c0_10 = arith.constant 0 : index
    %30 = vector.load %arg1[%c1, %c0_9, %c0_10] : memref<2x8x256xf32, #tpu.memory_space<vmem>>, vector<1x8x256xf32>
    %31 = vector.shape_cast %30 : vector<1x8x256xf32> to vector<8x256xf32>
    %c0_11 = arith.constant 0 : index
    %c352 = arith.constant 352 : index
    %32 = vector.load %arg9[%c0_11, %c352] : memref<16x640xf32, #tpu.memory_space<vmem>>, vector<8x256xf32>
    tpu.vector_store %arg9[%c0_11, %c352], %31 {strides = array<i32>} : memref<16x640xf32, #tpu.memory_space<vmem>>, vector<8x256xf32>,
    %c0_12 = arith.constant 0 : index
    %c15 = arith.constant 15 : index
    %33 = vector.load %arg9[%c0_12, %c15] : memref<16x640xf32, #tpu.memory_space<vmem>>, vector<8x256xf32>
    %34 = vector.broadcast %20 : vector<1x256xf32> to vector<8x256xf32>
    %35 = arith.mulf %33, %34 : vector<8x256xf32>
    %c0_13 = arith.constant 0 : index
    %c0_14 = arith.constant 0 : index
    %36 = vector.load %arg10[%c0_13, %c0_14] : memref<144x512xf32, #tpu.memory_space<vmem>>, vector<8x256xf32>
    tpu.vector_store %arg10[%c0_13, %c0_14], %35 {strides = array<i32>} : memref<144x512xf32, #tpu.memory_space<vmem>>, vector<8x256xf32>,
    %c0_15 = arith.constant 0 : index
    %c335 = arith.constant 335 : index
    %37 = vector.load %arg9[%c0_15, %c335] : memref<16x640xf32, #tpu.memory_space<vmem>>, vector<8x256xf32>
    %38 = vector.broadcast %20 : vector<1x256xf32> to vector<8x256xf32>
    %39 = arith.mulf %37, %38 : vector<8x256xf32>
    %c0_16 = arith.constant 0 : index
    %c256 = arith.constant 256 : index
    %40 = vector.load %arg10[%c0_16, %c256] : memref<144x512xf32, #tpu.memory_space<vmem>>, vector<8x256xf32>
    tpu.vector_store %arg10[%c0_16, %c256], %39 {strides = array<i32>} : memref<144x512xf32, #tpu.memory_space<vmem>>, vector<8x256xf32>,
    %c0_17 = arith.constant 0 : index
    %c16 = arith.constant 16 : index
    %41 = vector.load %arg9[%c0_17, %c16] : memref<16x640xf32, #tpu.memory_space<vmem>>, vector<8x256xf32>
    %c8 = arith.constant 8 : index
    %c0_18 = arith.constant 0 : index
    %42 = vector.load %arg10[%c8, %c0_18] : memref<144x512xf32, #tpu.memory_space<vmem>>, vector<8x256xf32>
    tpu.vector_store %arg10[%c8, %c0_18], %41 {strides = array<i32>} : memref<144x512xf32, #tpu.memory_space<vmem>>, vector<8x256xf32>,
    %c0_19 = arith.constant 0 : index
    %c336 = arith.constant 336 : index
    %43 = vector.load %arg9[%c0_19, %c336] : memref<16x640xf32, #tpu.memory_space<vmem>>, vector<8x256xf32>
    %c8_20 = arith.constant 8 : index
    %c256_21 = arith.constant 256 : index
    %44 = vector.load %arg10[%c8_20, %c256_21] : memref<144x512xf32, #tpu.memory_space<vmem>>, vector<8x256xf32>
    tpu.vector_store %arg10[%c8_20, %c256_21], %43 {strides = array<i32>} : memref<144x512xf32, #tpu.memory_space<vmem>>, vector<8x256xf32>,
    %c0_22 = arith.constant 0 : index
    %c17 = arith.constant 17 : index
    %45 = vector.load %arg9[%c0_22, %c17] : memref<16x640xf32, #tpu.memory_space<vmem>>, vector<8x256xf32>
    %46 = vector.broadcast %24 : vector<1x256xf32> to vector<8x256xf32>
    %47 = arith.mulf %45, %46 : vector<8x256xf32>
    %c16_23 = arith.constant 16 : index
    %c0_24 = arith.constant 0 : index
    %48 = vector.load %arg10[%c16_23, %c0_24] : memref<144x512xf32, #tpu.memory_space<vmem>>, vector<8x256xf32>
    tpu.vector_store %arg10[%c16_23, %c0_24], %47 {strides = array<i32>} : memref<144x512xf32, #tpu.memory_space<vmem>>, vector<8x256xf32>,
    %c0_25 = arith.constant 0 : index
    %c337 = arith.constant 337 : index
    %49 = vector.load %arg9[%c0_25, %c337] : memref<16x640xf32, #tpu.memory_space<vmem>>, vector<8x256xf32>
    %50 = vector.broadcast %24 : vector<1x256xf32> to vector<8x256xf32>
    %51 = arith.mulf %49, %50 : vector<8x256xf32>
    %c16_26 = arith.constant 16 : index
    %c256_27 = arith.constant 256 : index
    %52 = vector.load %arg10[%c16_26, %c256_27] : memref<144x512xf32, #tpu.memory_space<vmem>>, vector<8x256xf32>
    tpu.vector_store %arg10[%c16_26, %c256_27], %51 {strides = array<i32>} : memref<144x512xf32, #tpu.memory_space<vmem>>, vector<8x256xf32>,
    %c0_28 = arith.constant 0 : index
    %c31 = arith.constant 31 : index
    %53 = vector.load %arg9[%c0_28, %c31] : memref<16x640xf32, #tpu.memory_space<vmem>>, vector<8x256xf32>
    %54 = vector.broadcast %20 : vector<1x256xf32> to vector<8x256xf32>
    %55 = arith.mulf %53, %54 : vector<8x256xf32>
    %c24 = arith.constant 24 : index
    %c0_29 = arith.constant 0 : index
    %56 = vector.load %arg10[%c24, %c0_29] : memref<144x512xf32, #tpu.memory_space<vmem>>, vector<8x256xf32>
    tpu.vector_store %arg10[%c24, %c0_29], %55 {strides = array<i32>} : memref<144x512xf32, #tpu.memory_space<vmem>>, vector<8x256xf32>,
    %c0_30 = arith.constant 0 : index
    %c351 = arith.constant 351 : index
    %57 = vector.load %arg9[%c0_30, %c351] : memref<16x640xf32, #tpu.memory_space<vmem>>, vector<8x256xf32>
    %58 = vector.broadcast %20 : vector<1x256xf32> to vector<8x256xf32>
    %59 = arith.mulf %57, %58 : vector<8x256xf32>
    %c24_31 = arith.constant 24 : index
    %c256_32 = arith.constant 256 : index
    %60 = vector.load %arg10[%c24_31, %c256_32] : memref<144x512xf32, #tpu.memory_space<vmem>>, vector<8x256xf32>
    tpu.vector_store %arg10[%c24_31, %c256_32], %59 {strides = array<i32>} : memref<144x512xf32, #tpu.memory_space<vmem>>, vector<8x256xf32>,
    %c0_33 = arith.constant 0 : index
    %c32_34 = arith.constant 32 : index
    %61 = vector.load %arg9[%c0_33, %c32_34] : memref<16x640xf32, #tpu.memory_space<vmem>>, vector<8x256xf32>
    %c32_35 = arith.constant 32 : index
    %c0_36 = arith.constant 0 : index
    %62 = vector.load %arg10[%c32_35, %c0_36] : memref<144x512xf32, #tpu.memory_space<vmem>>, vector<8x256xf32>
    tpu.vector_store %arg10[%c32_35, %c0_36], %61 {strides = array<i32>} : memref<144x512xf32, #tpu.memory_space<vmem>>, vector<8x256xf32>,
    %c0_37 = arith.constant 0 : index
    %c352_38 = arith.constant 352 : index
    %63 = vector.load %arg9[%c0_37, %c352_38] : memref<16x640xf32, #tpu.memory_space<vmem>>, vector<8x256xf32>
    %c32_39 = arith.constant 32 : index
    %c256_40 = arith.constant 256 : index
    %64 = vector.load %arg10[%c32_39, %c256_40] : memref<144x512xf32, #tpu.memory_space<vmem>>, vector<8x256xf32>
    tpu.vector_store %arg10[%c32_39, %c256_40], %63 {strides = array<i32>} : memref<144x512xf32, #tpu.memory_space<vmem>>, vector<8x256xf32>,
    %c0_41 = arith.constant 0 : index
    %c33 = arith.constant 33 : index
    %65 = vector.load %arg9[%c0_41, %c33] : memref<16x640xf32, #tpu.memory_space<vmem>>, vector<8x256xf32>
    %66 = vector.broadcast %24 : vector<1x256xf32> to vector<8x256xf32>
    %67 = arith.mulf %65, %66 : vector<8x256xf32>
    %c40 = arith.constant 40 : index
    %c0_42 = arith.constant 0 : index
    %68 = vector.load %arg10[%c40, %c0_42] : memref<144x512xf32, #tpu.memory_space<vmem>>, vector<8x256xf32>
    tpu.vector_store %arg10[%c40, %c0_42], %67 {strides = array<i32>} : memref<144x512xf32, #tpu.memory_space<vmem>>, vector<8x256xf32>,
    %c0_43 = arith.constant 0 : index
    %c353 = arith.constant 353 : index
    %69 = vector.load %arg9[%c0_43, %c353] : memref<16x640xf32, #tpu.memory_space<vmem>>, vector<8x256xf32>
    %70 = vector.broadcast %24 : vector<1x256xf32> to vector<8x256xf32>
    %71 = arith.mulf %69, %70 : vector<8x256xf32>
    %c40_44 = arith.constant 40 : index
    %c256_45 = arith.constant 256 : index
    %72 = vector.load %arg10[%c40_44, %c256_45] : memref<144x512xf32, #tpu.memory_space<vmem>>, vector<8x256xf32>
    tpu.vector_store %arg10[%c40_44, %c256_45], %71 {strides = array<i32>} : memref<144x512xf32, #tpu.memory_space<vmem>>, vector<8x256xf32>,
    %c0_46 = arith.constant 0 : index
    %c47 = arith.constant 47 : index
    %73 = vector.load %arg9[%c0_46, %c47] : memref<16x640xf32, #tpu.memory_space<vmem>>, vector<8x256xf32>
    %74 = vector.broadcast %20 : vector<1x256xf32> to vector<8x256xf32>
    %75 = arith.mulf %73, %74 : vector<8x256xf32>
    %c48 = arith.constant 48 : index
    %c0_47 = arith.constant 0 : index
    %76 = vector.load %arg10[%c48, %c0_47] : memref<144x512xf32, #tpu.memory_space<vmem>>, vector<8x256xf32>
    tpu.vector_store %arg10[%c48, %c0_47], %75 {strides = array<i32>} : memref<144x512xf32, #tpu.memory_space<vmem>>, vector<8x256xf32>,
    %c0_48 = arith.constant 0 : index
    %c367 = arith.constant 367 : index
    %77 = vector.load %arg9[%c0_48, %c367] : memref<16x640xf32, #tpu.memory_space<vmem>>, vector<8x256xf32>
    %78 = vector.broadcast %20 : vector<1x256xf32> to vector<8x256xf32>
    %79 = arith.mulf %77, %78 : vector<8x256xf32>
    %c48_49 = arith.constant 48 : index
    %c256_50 = arith.constant 256 : index
    %80 = vector.load %arg10[%c48_49, %c256_50] : memref<144x512xf32, #tpu.memory_space<vmem>>, vector<8x256xf32>
    tpu.vector_store %arg10[%c48_49, %c256_50], %79 {strides = array<i32>} : memref<144x512xf32, #tpu.memory_space<vmem>>, vector<8x256xf32>,
    %c0_51 = arith.constant 0 : index
    %c48_52 = arith.constant 48 : index
    %81 = vector.load %arg9[%c0_51, %c48_52] : memref<16x640xf32, #tpu.memory_space<vmem>>, vector<8x256xf32>
    %c56 = arith.constant 56 : index
    %c0_53 = arith.constant 0 : index
    %82 = vector.load %arg10[%c56, %c0_53] : memref<144x512xf32, #tpu.memory_space<vmem>>, vector<8x256xf32>
    tpu.vector_store %arg10[%c56, %c0_53], %81 {strides = array<i32>} : memref<144x512xf32, #tpu.memory_space<vmem>>, vector<8x256xf32>,
    %c0_54 = arith.constant 0 : index
    %c368 = arith.constant 368 : index
    %83 = vector.load %arg9[%c0_54, %c368] : memref<16x640xf32, #tpu.memory_space<vmem>>, vector<8x256xf32>
    %c56_55 = arith.constant 56 : index
    %c256_56 = arith.constant 256 : index
    %84 = vector.load %arg10[%c56_55, %c256_56] : memref<144x512xf32, #tpu.memory_space<vmem>>, vector<8x256xf32>
    tpu.vector_store %arg10[%c56_55, %c256_56], %83 {strides = array<i32>} : memref<144x512xf32, #tpu.memory_space<vmem>>, vector<8x256xf32>,
    %c0_57 = arith.constant 0 : index
    %c49 = arith.constant 49 : index
    %85 = vector.load %arg9[%c0_57, %c49] : memref<16x640xf32, #tpu.memory_space<vmem>>, vector<8x256xf32>
    %86 = vector.broadcast %24 : vector<1x256xf32> to vector<8x256xf32>
    %87 = arith.mulf %85, %86 : vector<8x256xf32>
    %c64 = arith.constant 64 : index
    %c0_58 = arith.constant 0 : index
    %88 = vector.load %arg10[%c64, %c0_58] : memref<144x512xf32, #tpu.memory_space<vmem>>, vector<8x256xf32>
    tpu.vector_store %arg10[%c64, %c0_58], %87 {strides = array<i32>} : memref<144x512xf32, #tpu.memory_space<vmem>>, vector<8x256xf32>,
    %c0_59 = arith.constant 0 : index
    %c369 = arith.constant 369 : index
    %89 = vector.load %arg9[%c0_59, %c369] : memref<16x640xf32, #tpu.memory_space<vmem>>, vector<8x256xf32>
    %90 = vector.broadcast %24 : vector<1x256xf32> to vector<8x256xf32>
    %91 = arith.mulf %89, %90 : vector<8x256xf32>
    %c64_60 = arith.constant 64 : index
    %c256_61 = arith.constant 256 : index
    %92 = vector.load %arg10[%c64_60, %c256_61] : memref<144x512xf32, #tpu.memory_space<vmem>>, vector<8x256xf32>
    tpu.vector_store %arg10[%c64_60, %c256_61], %91 {strides = array<i32>} : memref<144x512xf32, #tpu.memory_space<vmem>>, vector<8x256xf32>,
    %c0_62 = arith.constant 0 : index
    %c0_63 = arith.constant 0 : index
    %93 = vector.load %arg2[%c0_62, %c0_63] : memref<16x72xf32, #tpu.memory_space<vmem>>, vector<16x72xf32>
    %c0_64 = arith.constant 0 : index
    %c0_65 = arith.constant 0 : index
    %94 = vector.load %arg10[%c0_64, %c0_65] : memref<144x512xf32, #tpu.memory_space<vmem>>, vector<72x512xf32>
    %cst_66 = arith.constant dense<0.000000e+00> : vector<16x512xf32>
    %95 = tpu.matmul %93, %94, %cst_66 {dimension_numbers = #tpu.dot_dimension_numbers<[1], [0], [0], [1], [0, 0, 1, 1], [], []>} : vector<16x72xf32>, vector<72x512xf32>, vector<16x512xf32> -> vector<16x512xf32>
    %c0_67 = arith.constant 0 : index
    %c0_68 = arith.constant 0 : index
    %96 = vector.load %arg3[%c0_67, %c0_68] : memref<16x1xf32, #tpu.memory_space<vmem>>, vector<16x1xf32>
    %97 = vector.broadcast %96 : vector<16x1xf32> to vector<16x512xf32>
    %98 = arith.addf %95, %97 : vector<16x512xf32>
    %cst_69 = arith.constant 0.000000e+00 : f32
    %99 = vector.broadcast %cst_69 : f32 to vector<16x512xf32>
    %100 = arith.maximumf %98, %99 : vector<16x512xf32>
    %101 = vector.extract_strided_slice %100 {offsets = [0, 0], sizes = [16, 256], strides = [1, 1]} : vector<16x512xf32> to vector<16x256xf32>
    %c0_70 = arith.constant 0 : index
    %c32_71 = arith.constant 32 : index
    %102 = vector.load %arg9[%c0_70, %c32_71] : memref<16x640xf32, #tpu.memory_space<vmem>>, vector<16x256xf32>
    tpu.vector_store %arg9[%c0_70, %c32_71], %101 {strides = array<i32>} : memref<16x640xf32, #tpu.memory_space<vmem>>, vector<16x256xf32>,
    %103 = vector.extract_strided_slice %100 {offsets = [0, 256], sizes = [16, 256], strides = [1, 1]} : vector<16x512xf32> to vector<16x256xf32>
    %c0_72 = arith.constant 0 : index
    %c352_73 = arith.constant 352 : index
    %104 = vector.load %arg9[%c0_72, %c352_73] : memref<16x640xf32, #tpu.memory_space<vmem>>, vector<16x256xf32>
    tpu.vector_store %arg9[%c0_72, %c352_73], %103 {strides = array<i32>} : memref<16x640xf32, #tpu.memory_space<vmem>>, vector<16x256xf32>,
    %c0_74 = arith.constant 0 : index
    %c15_75 = arith.constant 15 : index
    %105 = vector.load %arg9[%c0_74, %c15_75] : memref<16x640xf32, #tpu.memory_space<vmem>>, vector<16x256xf32>
    %106 = vector.broadcast %20 : vector<1x256xf32> to vector<16x256xf32>
    %107 = arith.mulf %105, %106 : vector<16x256xf32>
    %c0_76 = arith.constant 0 : index
    %c0_77 = arith.constant 0 : index
    %108 = vector.load %arg10[%c0_76, %c0_77] : memref<144x512xf32, #tpu.memory_space<vmem>>, vector<16x256xf32>
    tpu.vector_store %arg10[%c0_76, %c0_77], %107 {strides = array<i32>} : memref<144x512xf32, #tpu.memory_space<vmem>>, vector<16x256xf32>,
    %c0_78 = arith.constant 0 : index
    %c335_79 = arith.constant 335 : index
    %109 = vector.load %arg9[%c0_78, %c335_79] : memref<16x640xf32, #tpu.memory_space<vmem>>, vector<16x256xf32>
    %110 = vector.broadcast %20 : vector<1x256xf32> to vector<16x256xf32>
    %111 = arith.mulf %109, %110 : vector<16x256xf32>
    %c0_80 = arith.constant 0 : index
    %c256_81 = arith.constant 256 : index
    %112 = vector.load %arg10[%c0_80, %c256_81] : memref<144x512xf32, #tpu.memory_space<vmem>>, vector<16x256xf32>
    tpu.vector_store %arg10[%c0_80, %c256_81], %111 {strides = array<i32>} : memref<144x512xf32, #tpu.memory_space<vmem>>, vector<16x256xf32>,
    %c0_82 = arith.constant 0 : index
    %c16_83 = arith.constant 16 : index
    %113 = vector.load %arg9[%c0_82, %c16_83] : memref<16x640xf32, #tpu.memory_space<vmem>>, vector<16x256xf32>
    %c16_84 = arith.constant 16 : index
    %c0_85 = arith.constant 0 : index
    %114 = vector.load %arg10[%c16_84, %c0_85] : memref<144x512xf32, #tpu.memory_space<vmem>>, vector<16x256xf32>
    tpu.vector_store %arg10[%c16_84, %c0_85], %113 {strides = array<i32>} : memref<144x512xf32, #tpu.memory_space<vmem>>, vector<16x256xf32>,
    %c0_86 = arith.constant 0 : index
    %c336_87 = arith.constant 336 : index
    %115 = vector.load %arg9[%c0_86, %c336_87] : memref<16x640xf32, #tpu.memory_space<vmem>>, vector<16x256xf32>
    %c16_88 = arith.constant 16 : index
    %c256_89 = arith.constant 256 : index
    %116 = vector.load %arg10[%c16_88, %c256_89] : memref<144x512xf32, #tpu.memory_space<vmem>>, vector<16x256xf32>
    tpu.vector_store %arg10[%c16_88, %c256_89], %115 {strides = array<i32>} : memref<144x512xf32, #tpu.memory_space<vmem>>, vector<16x256xf32>,
    %c0_90 = arith.constant 0 : index
    %c17_91 = arith.constant 17 : index
    %117 = vector.load %arg9[%c0_90, %c17_91] : memref<16x640xf32, #tpu.memory_space<vmem>>, vector<16x256xf32>
    %118 = vector.broadcast %24 : vector<1x256xf32> to vector<16x256xf32>
    %119 = arith.mulf %117, %118 : vector<16x256xf32>
    %c32_92 = arith.constant 32 : index
    %c0_93 = arith.constant 0 : index
    %120 = vector.load %arg10[%c32_92, %c0_93] : memref<144x512xf32, #tpu.memory_space<vmem>>, vector<16x256xf32>
    tpu.vector_store %arg10[%c32_92, %c0_93], %119 {strides = array<i32>} : memref<144x512xf32, #tpu.memory_space<vmem>>, vector<16x256xf32>,
    %c0_94 = arith.constant 0 : index
    %c337_95 = arith.constant 337 : index
    %121 = vector.load %arg9[%c0_94, %c337_95] : memref<16x640xf32, #tpu.memory_space<vmem>>, vector<16x256xf32>
    %122 = vector.broadcast %24 : vector<1x256xf32> to vector<16x256xf32>
    %123 = arith.mulf %121, %122 : vector<16x256xf32>
    %c32_96 = arith.constant 32 : index
    %c256_97 = arith.constant 256 : index
    %124 = vector.load %arg10[%c32_96, %c256_97] : memref<144x512xf32, #tpu.memory_space<vmem>>, vector<16x256xf32>
    tpu.vector_store %arg10[%c32_96, %c256_97], %123 {strides = array<i32>} : memref<144x512xf32, #tpu.memory_space<vmem>>, vector<16x256xf32>,
    %c0_98 = arith.constant 0 : index
    %c31_99 = arith.constant 31 : index
    %125 = vector.load %arg9[%c0_98, %c31_99] : memref<16x640xf32, #tpu.memory_space<vmem>>, vector<16x256xf32>
    %126 = vector.broadcast %20 : vector<1x256xf32> to vector<16x256xf32>
    %127 = arith.mulf %125, %126 : vector<16x256xf32>
    %c48_100 = arith.constant 48 : index
    %c0_101 = arith.constant 0 : index
    %128 = vector.load %arg10[%c48_100, %c0_101] : memref<144x512xf32, #tpu.memory_space<vmem>>, vector<16x256xf32>
    tpu.vector_store %arg10[%c48_100, %c0_101], %127 {strides = array<i32>} : memref<144x512xf32, #tpu.memory_space<vmem>>, vector<16x256xf32>,
    %c0_102 = arith.constant 0 : index
    %c351_103 = arith.constant 351 : index
    %129 = vector.load %arg9[%c0_102, %c351_103] : memref<16x640xf32, #tpu.memory_space<vmem>>, vector<16x256xf32>
    %130 = vector.broadcast %20 : vector<1x256xf32> to vector<16x256xf32>
    %131 = arith.mulf %129, %130 : vector<16x256xf32>
    %c48_104 = arith.constant 48 : index
    %c256_105 = arith.constant 256 : index
    %132 = vector.load %arg10[%c48_104, %c256_105] : memref<144x512xf32, #tpu.memory_space<vmem>>, vector<16x256xf32>
    tpu.vector_store %arg10[%c48_104, %c256_105], %131 {strides = array<i32>} : memref<144x512xf32, #tpu.memory_space<vmem>>, vector<16x256xf32>,
    %c0_106 = arith.constant 0 : index
    %c32_107 = arith.constant 32 : index
    %133 = vector.load %arg9[%c0_106, %c32_107] : memref<16x640xf32, #tpu.memory_space<vmem>>, vector<16x256xf32>
    %c64_108 = arith.constant 64 : index
    %c0_109 = arith.constant 0 : index
    %134 = vector.load %arg10[%c64_108, %c0_109] : memref<144x512xf32, #tpu.memory_space<vmem>>, vector<16x256xf32>
    tpu.vector_store %arg10[%c64_108, %c0_109], %133 {strides = array<i32>} : memref<144x512xf32, #tpu.memory_space<vmem>>, vector<16x256xf32>,
    %c0_110 = arith.constant 0 : index
    %c352_111 = arith.constant 352 : index
    %135 = vector.load %arg9[%c0_110, %c352_111] : memref<16x640xf32, #tpu.memory_space<vmem>>, vector<16x256xf32>
    %c64_112 = arith.constant 64 : index
    %c256_113 = arith.constant 256 : index
    %136 = vector.load %arg10[%c64_112, %c256_113] : memref<144x512xf32, #tpu.memory_space<vmem>>, vector<16x256xf32>
    tpu.vector_store %arg10[%c64_112, %c256_113], %135 {strides = array<i32>} : memref<144x512xf32, #tpu.memory_space<vmem>>, vector<16x256xf32>,
    %c0_114 = arith.constant 0 : index
    %c33_115 = arith.constant 33 : index
    %137 = vector.load %arg9[%c0_114, %c33_115] : memref<16x640xf32, #tpu.memory_space<vmem>>, vector<16x256xf32>
    %138 = vector.broadcast %24 : vector<1x256xf32> to vector<16x256xf32>
    %139 = arith.mulf %137, %138 : vector<16x256xf32>
    %c80 = arith.constant 80 : index
    %c0_116 = arith.constant 0 : index
    %140 = vector.load %arg10[%c80, %c0_116] : memref<144x512xf32, #tpu.memory_space<vmem>>, vector<16x256xf32>
    tpu.vector_store %arg10[%c80, %c0_116], %139 {strides = array<i32>} : memref<144x512xf32, #tpu.memory_space<vmem>>, vector<16x256xf32>,
    %c0_117 = arith.constant 0 : index
    %c353_118 = arith.constant 353 : index
    %141 = vector.load %arg9[%c0_117, %c353_118] : memref<16x640xf32, #tpu.memory_space<vmem>>, vector<16x256xf32>
    %142 = vector.broadcast %24 : vector<1x256xf32> to vector<16x256xf32>
    %143 = arith.mulf %141, %142 : vector<16x256xf32>
    %c80_119 = arith.constant 80 : index
    %c256_120 = arith.constant 256 : index
    %144 = vector.load %arg10[%c80_119, %c256_120] : memref<144x512xf32, #tpu.memory_space<vmem>>, vector<16x256xf32>
    tpu.vector_store %arg10[%c80_119, %c256_120], %143 {strides = array<i32>} : memref<144x512xf32, #tpu.memory_space<vmem>>, vector<16x256xf32>,
    %c0_121 = arith.constant 0 : index
    %c47_122 = arith.constant 47 : index
    %145 = vector.load %arg9[%c0_121, %c47_122] : memref<16x640xf32, #tpu.memory_space<vmem>>, vector<16x256xf32>
    %146 = vector.broadcast %20 : vector<1x256xf32> to vector<16x256xf32>
    %147 = arith.mulf %145, %146 : vector<16x256xf32>
    %c96 = arith.constant 96 : index
    %c0_123 = arith.constant 0 : index
    %148 = vector.load %arg10[%c96, %c0_123] : memref<144x512xf32, #tpu.memory_space<vmem>>, vector<16x256xf32>
    tpu.vector_store %arg10[%c96, %c0_123], %147 {strides = array<i32>} : memref<144x512xf32, #tpu.memory_space<vmem>>, vector<16x256xf32>,
    %c0_124 = arith.constant 0 : index
    %c367_125 = arith.constant 367 : index
    %149 = vector.load %arg9[%c0_124, %c367_125] : memref<16x640xf32, #tpu.memory_space<vmem>>, vector<16x256xf32>
    %150 = vector.broadcast %20 : vector<1x256xf32> to vector<16x256xf32>
    %151 = arith.mulf %149, %150 : vector<16x256xf32>
    %c96_126 = arith.constant 96 : index
    %c256_127 = arith.constant 256 : index
    %152 = vector.load %arg10[%c96_126, %c256_127] : memref<144x512xf32, #tpu.memory_space<vmem>>, vector<16x256xf32>
    tpu.vector_store %arg10[%c96_126, %c256_127], %151 {strides = array<i32>} : memref<144x512xf32, #tpu.memory_space<vmem>>, vector<16x256xf32>,
    %c0_128 = arith.constant 0 : index
    %c48_129 = arith.constant 48 : index
    %153 = vector.load %arg9[%c0_128, %c48_129] : memref<16x640xf32, #tpu.memory_space<vmem>>, vector<16x256xf32>
    %c112 = arith.constant 112 : index
    %c0_130 = arith.constant 0 : index
    %154 = vector.load %arg10[%c112, %c0_130] : memref<144x512xf32, #tpu.memory_space<vmem>>, vector<16x256xf32>
    tpu.vector_store %arg10[%c112, %c0_130], %153 {strides = array<i32>} : memref<144x512xf32, #tpu.memory_space<vmem>>, vector<16x256xf32>,
    %c0_131 = arith.constant 0 : index
    %c368_132 = arith.constant 368 : index
    %155 = vector.load %arg9[%c0_131, %c368_132] : memref<16x640xf32, #tpu.memory_space<vmem>>, vector<16x256xf32>
    %c112_133 = arith.constant 112 : index
    %c256_134 = arith.constant 256 : index
    %156 = vector.load %arg10[%c112_133, %c256_134] : memref<144x512xf32, #tpu.memory_space<vmem>>, vector<16x256xf32>
    tpu.vector_store %arg10[%c112_133, %c256_134], %155 {strides = array<i32>} : memref<144x512xf32, #tpu.memory_space<vmem>>, vector<16x256xf32>,
    %c0_135 = arith.constant 0 : index
    %c49_136 = arith.constant 49 : index
    %157 = vector.load %arg9[%c0_135, %c49_136] : memref<16x640xf32, #tpu.memory_space<vmem>>, vector<16x256xf32>
    %158 = vector.broadcast %24 : vector<1x256xf32> to vector<16x256xf32>
    %159 = arith.mulf %157, %158 : vector<16x256xf32>
    %c128 = arith.constant 128 : index
    %c0_137 = arith.constant 0 : index
    %160 = vector.load %arg10[%c128, %c0_137] : memref<144x512xf32, #tpu.memory_space<vmem>>, vector<16x256xf32>
    tpu.vector_store %arg10[%c128, %c0_137], %159 {strides = array<i32>} : memref<144x512xf32, #tpu.memory_space<vmem>>, vector<16x256xf32>,
    %c0_138 = arith.constant 0 : index
    %c369_139 = arith.constant 369 : index
    %161 = vector.load %arg9[%c0_138, %c369_139] : memref<16x640xf32, #tpu.memory_space<vmem>>, vector<16x256xf32>
    %162 = vector.broadcast %24 : vector<1x256xf32> to vector<16x256xf32>
    %163 = arith.mulf %161, %162 : vector<16x256xf32>
    %c128_140 = arith.constant 128 : index
    %c256_141 = arith.constant 256 : index
    %164 = vector.load %arg10[%c128_140, %c256_141] : memref<144x512xf32, #tpu.memory_space<vmem>>, vector<16x256xf32>
    tpu.vector_store %arg10[%c128_140, %c256_141], %163 {strides = array<i32>} : memref<144x512xf32, #tpu.memory_space<vmem>>, vector<16x256xf32>,
    %c0_142 = arith.constant 0 : index
    %c0_143 = arith.constant 0 : index
    %165 = vector.load %arg4[%c0_142, %c0_143] : memref<16x144xf32, #tpu.memory_space<vmem>>, vector<16x144xf32>
    %c0_144 = arith.constant 0 : index
    %c0_145 = arith.constant 0 : index
    %166 = vector.load %arg10[%c0_144, %c0_145] : memref<144x512xf32, #tpu.memory_space<vmem>>, vector<144x512xf32>
    %cst_146 = arith.constant dense<0.000000e+00> : vector<16x512xf32>
    %167 = tpu.matmul %165, %166, %cst_146 {dimension_numbers = #tpu.dot_dimension_numbers<[1], [0], [0], [1], [0, 0, 1, 1], [], []>} : vector<16x144xf32>, vector<144x512xf32>, vector<16x512xf32> -> vector<16x512xf32>
    %c0_147 = arith.constant 0 : index
    %c0_148 = arith.constant 0 : index
    %168 = vector.load %arg5[%c0_147, %c0_148] : memref<16x1xf32, #tpu.memory_space<vmem>>, vector<16x1xf32>
    %169 = vector.broadcast %168 : vector<16x1xf32> to vector<16x512xf32>
    %170 = arith.addf %167, %169 : vector<16x512xf32>
    %cst_149 = arith.constant 0.000000e+00 : f32
    %171 = vector.broadcast %cst_149 : f32 to vector<16x512xf32>
    %172 = arith.maximumf %170, %171 : vector<16x512xf32>
    %173 = vector.extract_strided_slice %172 {offsets = [0, 0], sizes = [16, 256], strides = [1, 1]} : vector<16x512xf32> to vector<16x256xf32>
    %c0_150 = arith.constant 0 : index
    %c32_151 = arith.constant 32 : index
    %174 = vector.load %arg9[%c0_150, %c32_151] : memref<16x640xf32, #tpu.memory_space<vmem>>, vector<16x256xf32>
    tpu.vector_store %arg9[%c0_150, %c32_151], %173 {strides = array<i32>} : memref<16x640xf32, #tpu.memory_space<vmem>>, vector<16x256xf32>,
    %175 = vector.extract_strided_slice %172 {offsets = [0, 256], sizes = [16, 256], strides = [1, 1]} : vector<16x512xf32> to vector<16x256xf32>
    %c0_152 = arith.constant 0 : index
    %c352_153 = arith.constant 352 : index
    %176 = vector.load %arg9[%c0_152, %c352_153] : memref<16x640xf32, #tpu.memory_space<vmem>>, vector<16x256xf32>
    tpu.vector_store %arg9[%c0_152, %c352_153], %175 {strides = array<i32>} : memref<16x640xf32, #tpu.memory_space<vmem>>, vector<16x256xf32>,
    %c0_154 = arith.constant 0 : index
    %c15_155 = arith.constant 15 : index
    %177 = vector.load %arg9[%c0_154, %c15_155] : memref<16x640xf32, #tpu.memory_space<vmem>>, vector<16x256xf32>
    %178 = vector.broadcast %20 : vector<1x256xf32> to vector<16x256xf32>
    %179 = arith.mulf %177, %178 : vector<16x256xf32>
    %c0_156 = arith.constant 0 : index
    %c0_157 = arith.constant 0 : index
    %180 = vector.load %arg10[%c0_156, %c0_157] : memref<144x512xf32, #tpu.memory_space<vmem>>, vector<16x256xf32>
    tpu.vector_store %arg10[%c0_156, %c0_157], %179 {strides = array<i32>} : memref<144x512xf32, #tpu.memory_space<vmem>>, vector<16x256xf32>,
    %c0_158 = arith.constant 0 : index
    %c335_159 = arith.constant 335 : index
    %181 = vector.load %arg9[%c0_158, %c335_159] : memref<16x640xf32, #tpu.memory_space<vmem>>, vector<16x256xf32>
    %182 = vector.broadcast %20 : vector<1x256xf32> to vector<16x256xf32>
    %183 = arith.mulf %181, %182 : vector<16x256xf32>
    %c0_160 = arith.constant 0 : index
    %c256_161 = arith.constant 256 : index
    %184 = vector.load %arg10[%c0_160, %c256_161] : memref<144x512xf32, #tpu.memory_space<vmem>>, vector<16x256xf32>
    tpu.vector_store %arg10[%c0_160, %c256_161], %183 {strides = array<i32>} : memref<144x512xf32, #tpu.memory_space<vmem>>, vector<16x256xf32>,
    %c0_162 = arith.constant 0 : index
    %c16_163 = arith.constant 16 : index
    %185 = vector.load %arg9[%c0_162, %c16_163] : memref<16x640xf32, #tpu.memory_space<vmem>>, vector<16x256xf32>
    %c16_164 = arith.constant 16 : index
    %c0_165 = arith.constant 0 : index
    %186 = vector.load %arg10[%c16_164, %c0_165] : memref<144x512xf32, #tpu.memory_space<vmem>>, vector<16x256xf32>
    tpu.vector_store %arg10[%c16_164, %c0_165], %185 {strides = array<i32>} : memref<144x512xf32, #tpu.memory_space<vmem>>, vector<16x256xf32>,
    %c0_166 = arith.constant 0 : index
    %c336_167 = arith.constant 336 : index
    %187 = vector.load %arg9[%c0_166, %c336_167] : memref<16x640xf32, #tpu.memory_space<vmem>>, vector<16x256xf32>
    %c16_168 = arith.constant 16 : index
    %c256_169 = arith.constant 256 : index
    %188 = vector.load %arg10[%c16_168, %c256_169] : memref<144x512xf32, #tpu.memory_space<vmem>>, vector<16x256xf32>
    tpu.vector_store %arg10[%c16_168, %c256_169], %187 {strides = array<i32>} : memref<144x512xf32, #tpu.memory_space<vmem>>, vector<16x256xf32>,
    %c0_170 = arith.constant 0 : index
    %c17_171 = arith.constant 17 : index
    %189 = vector.load %arg9[%c0_170, %c17_171] : memref<16x640xf32, #tpu.memory_space<vmem>>, vector<16x256xf32>
    %190 = vector.broadcast %24 : vector<1x256xf32> to vector<16x256xf32>
    %191 = arith.mulf %189, %190 : vector<16x256xf32>
    %c32_172 = arith.constant 32 : index
    %c0_173 = arith.constant 0 : index
    %192 = vector.load %arg10[%c32_172, %c0_173] : memref<144x512xf32, #tpu.memory_space<vmem>>, vector<16x256xf32>
    tpu.vector_store %arg10[%c32_172, %c0_173], %191 {strides = array<i32>} : memref<144x512xf32, #tpu.memory_space<vmem>>, vector<16x256xf32>,
    %c0_174 = arith.constant 0 : index
    %c337_175 = arith.constant 337 : index
    %193 = vector.load %arg9[%c0_174, %c337_175] : memref<16x640xf32, #tpu.memory_space<vmem>>, vector<16x256xf32>
    %194 = vector.broadcast %24 : vector<1x256xf32> to vector<16x256xf32>
    %195 = arith.mulf %193, %194 : vector<16x256xf32>
    %c32_176 = arith.constant 32 : index
    %c256_177 = arith.constant 256 : index
    %196 = vector.load %arg10[%c32_176, %c256_177] : memref<144x512xf32, #tpu.memory_space<vmem>>, vector<16x256xf32>
    tpu.vector_store %arg10[%c32_176, %c256_177], %195 {strides = array<i32>} : memref<144x512xf32, #tpu.memory_space<vmem>>, vector<16x256xf32>,
    %c0_178 = arith.constant 0 : index
    %c31_179 = arith.constant 31 : index
    %197 = vector.load %arg9[%c0_178, %c31_179] : memref<16x640xf32, #tpu.memory_space<vmem>>, vector<16x256xf32>
    %198 = vector.broadcast %20 : vector<1x256xf32> to vector<16x256xf32>
    %199 = arith.mulf %197, %198 : vector<16x256xf32>
    %c48_180 = arith.constant 48 : index
    %c0_181 = arith.constant 0 : index
    %200 = vector.load %arg10[%c48_180, %c0_181] : memref<144x512xf32, #tpu.memory_space<vmem>>, vector<16x256xf32>
    tpu.vector_store %arg10[%c48_180, %c0_181], %199 {strides = array<i32>} : memref<144x512xf32, #tpu.memory_space<vmem>>, vector<16x256xf32>,
    %c0_182 = arith.constant 0 : index
    %c351_183 = arith.constant 351 : index
    %201 = vector.load %arg9[%c0_182, %c351_183] : memref<16x640xf32, #tpu.memory_space<vmem>>, vector<16x256xf32>
    %202 = vector.broadcast %20 : vector<1x256xf32> to vector<16x256xf32>
    %203 = arith.mulf %201, %202 : vector<16x256xf32>
    %c48_184 = arith.constant 48 : index
    %c256_185 = arith.constant 256 : index
    %204 = vector.load %arg10[%c48_184, %c256_185] : memref<144x512xf32, #tpu.memory_space<vmem>>, vector<16x256xf32>
    tpu.vector_store %arg10[%c48_184, %c256_185], %203 {strides = array<i32>} : memref<144x512xf32, #tpu.memory_space<vmem>>, vector<16x256xf32>,
    %c0_186 = arith.constant 0 : index
    %c32_187 = arith.constant 32 : index
    %205 = vector.load %arg9[%c0_186, %c32_187] : memref<16x640xf32, #tpu.memory_space<vmem>>, vector<16x256xf32>
    %c64_188 = arith.constant 64 : index
    %c0_189 = arith.constant 0 : index
    %206 = vector.load %arg10[%c64_188, %c0_189] : memref<144x512xf32, #tpu.memory_space<vmem>>, vector<16x256xf32>
    tpu.vector_store %arg10[%c64_188, %c0_189], %205 {strides = array<i32>} : memref<144x512xf32, #tpu.memory_space<vmem>>, vector<16x256xf32>,
    %c0_190 = arith.constant 0 : index
    %c352_191 = arith.constant 352 : index
    %207 = vector.load %arg9[%c0_190, %c352_191] : memref<16x640xf32, #tpu.memory_space<vmem>>, vector<16x256xf32>
    %c64_192 = arith.constant 64 : index
    %c256_193 = arith.constant 256 : index
    %208 = vector.load %arg10[%c64_192, %c256_193] : memref<144x512xf32, #tpu.memory_space<vmem>>, vector<16x256xf32>
    tpu.vector_store %arg10[%c64_192, %c256_193], %207 {strides = array<i32>} : memref<144x512xf32, #tpu.memory_space<vmem>>, vector<16x256xf32>,
    %c0_194 = arith.constant 0 : index
    %c33_195 = arith.constant 33 : index
    %209 = vector.load %arg9[%c0_194, %c33_195] : memref<16x640xf32, #tpu.memory_space<vmem>>, vector<16x256xf32>
    %210 = vector.broadcast %24 : vector<1x256xf32> to vector<16x256xf32>
    %211 = arith.mulf %209, %210 : vector<16x256xf32>
    %c80_196 = arith.constant 80 : index
    %c0_197 = arith.constant 0 : index
    %212 = vector.load %arg10[%c80_196, %c0_197] : memref<144x512xf32, #tpu.memory_space<vmem>>, vector<16x256xf32>
    tpu.vector_store %arg10[%c80_196, %c0_197], %211 {strides = array<i32>} : memref<144x512xf32, #tpu.memory_space<vmem>>, vector<16x256xf32>,
    %c0_198 = arith.constant 0 : index
    %c353_199 = arith.constant 353 : index
    %213 = vector.load %arg9[%c0_198, %c353_199] : memref<16x640xf32, #tpu.memory_space<vmem>>, vector<16x256xf32>
    %214 = vector.broadcast %24 : vector<1x256xf32> to vector<16x256xf32>
    %215 = arith.mulf %213, %214 : vector<16x256xf32>
    %c80_200 = arith.constant 80 : index
    %c256_201 = arith.constant 256 : index
    %216 = vector.load %arg10[%c80_200, %c256_201] : memref<144x512xf32, #tpu.memory_space<vmem>>, vector<16x256xf32>
    tpu.vector_store %arg10[%c80_200, %c256_201], %215 {strides = array<i32>} : memref<144x512xf32, #tpu.memory_space<vmem>>, vector<16x256xf32>,
    %c0_202 = arith.constant 0 : index
    %c47_203 = arith.constant 47 : index
    %217 = vector.load %arg9[%c0_202, %c47_203] : memref<16x640xf32, #tpu.memory_space<vmem>>, vector<16x256xf32>
    %218 = vector.broadcast %20 : vector<1x256xf32> to vector<16x256xf32>
    %219 = arith.mulf %217, %218 : vector<16x256xf32>
    %c96_204 = arith.constant 96 : index
    %c0_205 = arith.constant 0 : index
    %220 = vector.load %arg10[%c96_204, %c0_205] : memref<144x512xf32, #tpu.memory_space<vmem>>, vector<16x256xf32>
    tpu.vector_store %arg10[%c96_204, %c0_205], %219 {strides = array<i32>} : memref<144x512xf32, #tpu.memory_space<vmem>>, vector<16x256xf32>,
    %c0_206 = arith.constant 0 : index
    %c367_207 = arith.constant 367 : index
    %221 = vector.load %arg9[%c0_206, %c367_207] : memref<16x640xf32, #tpu.memory_space<vmem>>, vector<16x256xf32>
    %222 = vector.broadcast %20 : vector<1x256xf32> to vector<16x256xf32>
    %223 = arith.mulf %221, %222 : vector<16x256xf32>
    %c96_208 = arith.constant 96 : index
    %c256_209 = arith.constant 256 : index
    %224 = vector.load %arg10[%c96_208, %c256_209] : memref<144x512xf32, #tpu.memory_space<vmem>>, vector<16x256xf32>
    tpu.vector_store %arg10[%c96_208, %c256_209], %223 {strides = array<i32>} : memref<144x512xf32, #tpu.memory_space<vmem>>, vector<16x256xf32>,
    %c0_210 = arith.constant 0 : index
    %c48_211 = arith.constant 48 : index
    %225 = vector.load %arg9[%c0_210, %c48_211] : memref<16x640xf32, #tpu.memory_space<vmem>>, vector<16x256xf32>
    %c112_212 = arith.constant 112 : index
    %c0_213 = arith.constant 0 : index
    %226 = vector.load %arg10[%c112_212, %c0_213] : memref<144x512xf32, #tpu.memory_space<vmem>>, vector<16x256xf32>
    tpu.vector_store %arg10[%c112_212, %c0_213], %225 {strides = array<i32>} : memref<144x512xf32, #tpu.memory_space<vmem>>, vector<16x256xf32>,
    %c0_214 = arith.constant 0 : index
    %c368_215 = arith.constant 368 : index
    %227 = vector.load %arg9[%c0_214, %c368_215] : memref<16x640xf32, #tpu.memory_space<vmem>>, vector<16x256xf32>
    %c112_216 = arith.constant 112 : index
    %c256_217 = arith.constant 256 : index
    %228 = vector.load %arg10[%c112_216, %c256_217] : memref<144x512xf32, #tpu.memory_space<vmem>>, vector<16x256xf32>
    tpu.vector_store %arg10[%c112_216, %c256_217], %227 {strides = array<i32>} : memref<144x512xf32, #tpu.memory_space<vmem>>, vector<16x256xf32>,
    %c0_218 = arith.constant 0 : index
    %c49_219 = arith.constant 49 : index
    %229 = vector.load %arg9[%c0_218, %c49_219] : memref<16x640xf32, #tpu.memory_space<vmem>>, vector<16x256xf32>
    %230 = vector.broadcast %24 : vector<1x256xf32> to vector<16x256xf32>
    %231 = arith.mulf %229, %230 : vector<16x256xf32>
    %c128_220 = arith.constant 128 : index
    %c0_221 = arith.constant 0 : index
    %232 = vector.load %arg10[%c128_220, %c0_221] : memref<144x512xf32, #tpu.memory_space<vmem>>, vector<16x256xf32>
    tpu.vector_store %arg10[%c128_220, %c0_221], %231 {strides = array<i32>} : memref<144x512xf32, #tpu.memory_space<vmem>>, vector<16x256xf32>,
    %c0_222 = arith.constant 0 : index
    %c369_223 = arith.constant 369 : index
    %233 = vector.load %arg9[%c0_222, %c369_223] : memref<16x640xf32, #tpu.memory_space<vmem>>, vector<16x256xf32>
    %234 = vector.broadcast %24 : vector<1x256xf32> to vector<16x256xf32>
    %235 = arith.mulf %233, %234 : vector<16x256xf32>
    %c128_224 = arith.constant 128 : index
    %c256_225 = arith.constant 256 : index
    %236 = vector.load %arg10[%c128_224, %c256_225] : memref<144x512xf32, #tpu.memory_space<vmem>>, vector<16x256xf32>
    tpu.vector_store %arg10[%c128_224, %c256_225], %235 {strides = array<i32>} : memref<144x512xf32, #tpu.memory_space<vmem>>, vector<16x256xf32>,
    %c0_226 = arith.constant 0 : index
    %c0_227 = arith.constant 0 : index
    %237 = vector.load %arg6[%c0_226, %c0_227] : memref<1x144xf32, #tpu.memory_space<vmem>>, vector<1x144xf32>
    %c0_228 = arith.constant 0 : index
    %c0_229 = arith.constant 0 : index
    %238 = vector.load %arg10[%c0_228, %c0_229] : memref<144x512xf32, #tpu.memory_space<vmem>>, vector<144x512xf32>
    %cst_230 = arith.constant dense<0.000000e+00> : vector<1x512xf32>
    %239 = tpu.matmul %237, %238, %cst_230 {dimension_numbers = #tpu.dot_dimension_numbers<[1], [0], [0], [1], [0, 0, 1, 1], [], []>} : vector<1x144xf32>, vector<144x512xf32>, vector<1x512xf32> -> vector<1x512xf32>
    %c0_231 = arith.constant 0 : index
    %c0_232 = arith.constant 0 : index
    %240 = vector.load %arg7[%c0_231, %c0_232] : memref<1x1xf32, #tpu.memory_space<vmem>>, vector<1x1xf32>
    %241 = vector.broadcast %240 : vector<1x1xf32> to vector<1x512xf32>
    %242 = arith.addf %239, %241 : vector<1x512xf32>
    %243 = vector.extract_strided_slice %242 {offsets = [0, 0], sizes = [1, 256], strides = [1, 1]} : vector<1x512xf32> to vector<1x256xf32>
    %c0_233 = arith.constant 0 : index
    %c0_234 = arith.constant 0 : index
    %c0_235 = arith.constant 0 : index
    %244 = vector.load %arg8[%c0_233, %c0_234, %c0_235] : memref<2x1x256xf32, #tpu.memory_space<vmem>>, vector<1x1x256xf32>
    %245 = vector.shape_cast %244 : vector<1x1x256xf32> to vector<1x256xf32>
    %246 = vector.shape_cast %243 : vector<1x256xf32> to vector<1x1x256xf32>
    tpu.vector_store %arg8[%c0_233, %c0_234, %c0_235], %246 {strides = array<i32>} : memref<2x1x256xf32, #tpu.memory_space<vmem>>, vector<1x1x256xf32>,
    %247 = vector.extract_strided_slice %242 {offsets = [0, 256], sizes = [1, 256], strides = [1, 1]} : vector<1x512xf32> to vector<1x256xf32>
    %c1_236 = arith.constant 1 : index
    %c0_237 = arith.constant 0 : index
    %c0_238 = arith.constant 0 : index
    %248 = vector.load %arg8[%c1_236, %c0_237, %c0_238] : memref<2x1x256xf32, #tpu.memory_space<vmem>>, vector<1x1x256xf32>
    %249 = vector.shape_cast %248 : vector<1x1x256xf32> to vector<1x256xf32>
    %250 = vector.shape_cast %247 : vector<1x256xf32> to vector<1x1x256xf32>
    tpu.vector_store %arg8[%c1_236, %c0_237, %c0_238], %250 {strides = array<i32>} : memref<2x1x256xf32, #tpu.memory_space<vmem>>, vector<1x1x256xf32>,
    return
  }
  func.func @transform_0(%arg0: i32) -> (i32, i32, i32) {
    %c0_i32 = arith.constant 0 : i32
    %c0_i32_0 = arith.constant 0 : i32
    %c0_i32_1 = arith.constant 0 : i32
    return %arg0, %c0_i32, %c0_i32_0 : i32, i32, i32
  }
  func.func @transform_1(%arg0: i32) -> (i32, i32) {
    %c0_i32 = arith.constant 0 : i32
    %c0_i32_0 = arith.constant 0 : i32
    %c0_i32_1 = arith.constant 0 : i32
    return %c0_i32, %c0_i32_0 : i32, i32
  }
  func.func @transform_2(%arg0: i32) -> (i32, i32) {
    %c0_i32 = arith.constant 0 : i32
    %c0_i32_0 = arith.constant 0 : i32
    %c0_i32_1 = arith.constant 0 : i32
    return %c0_i32, %c0_i32_0 : i32, i32
  }
  func.func @transform_3(%arg0: i32) -> (i32, i32) {
    %c0_i32 = arith.constant 0 : i32
    %c0_i32_0 = arith.constant 0 : i32
    %c0_i32_1 = arith.constant 0 : i32
    return %c0_i32, %c0_i32_0 : i32, i32
  }
  func.func @transform_4(%arg0: i32) -> (i32, i32) {
    %c0_i32 = arith.constant 0 : i32
    %c0_i32_0 = arith.constant 0 : i32
    %c0_i32_1 = arith.constant 0 : i32
    return %c0_i32, %c0_i32_0 : i32, i32
  }
  func.func @transform_5(%arg0: i32) -> (i32, i32) {
    %c0_i32 = arith.constant 0 : i32
    %c0_i32_0 = arith.constant 0 : i32
    %c0_i32_1 = arith.constant 0 : i32
    return %c0_i32, %c0_i32_0 : i32, i32
  }
  func.func @transform_6(%arg0: i32) -> (i32, i32) {
    %c0_i32 = arith.constant 0 : i32
    %c0_i32_0 = arith.constant 0 : i32
    %c0_i32_1 = arith.constant 0 : i32
    return %c0_i32, %c0_i32_0 : i32, i32
  }
  func.func @transform_7(%arg0: i32) -> (i32, i32, i32) {
    %c0_i32 = arith.constant 0 : i32
    %c0_i32_0 = arith.constant 0 : i32
    %c0_i32_1 = arith.constant 0 : i32
    return %arg0, %c0_i32, %c0_i32_0 : i32, i32, i32
  }
}

</mosaic_0001>

<bundles_post_ra>
// kernel: correction_net_forward.1
= control target key start
LH: loop header
LB: loop body
LE: loop exit
PB: predicated region body
PF: predicated region fallthrough
CT: control target
= control target key end

     0   :  { %v5419_v0 = vlaneseq  ;;  %v5421_v3 = vmov 0.0   ;;  %s3788_s28 = smov 96   ;;  %s3789_s29 = smov 32   ;;  %vm5429_vm4 = vcmask 1047808   ;;  %vm103_vm5 = vcmask 785408   ;;  %s5410_s0 = inlined_call_operand.vmem [shape: f32[2,8,256], index: 0, kind: input, shape index: {}]   ;;  %s5411_s2 = inlined_call_operand.vmem [shape: f32[16,1], index: 2, kind: input, shape index: {}]   ;;  %s5412_s1 = inlined_call_operand.vmem [shape: f32[16,72], index: 1, kind: input, shape index: {}]   ;;  %s5413_s4 = inlined_call_operand.vmem [shape: f32[16,1], index: 4, kind: input, shape index: {}]   ;;  %s5414_s3 = inlined_call_operand.vmem [shape: f32[16,144], index: 3, kind: input, shape index: {}]   ;;  %s5415_s6 = inlined_call_operand.<no memory space> [shape: f32[1,1], index: 6, kind: input, shape index: {}]   ;;  %s5416_s5 = inlined_call_operand.vmem [shape: f32[1,144], index: 5, kind: input, shape index: {}]   ;;  %s5417_s7 = inlined_call_operand.vmem [shape: f32[2,1,256], index: 7, kind: output, shape index: {}]  }
   0x1   :  { %v2895_v1 = vld [vmem:[%s5410_s0 + $0x10] sm:$0xff]  ;;  %v77_v2 = vld [vmem:[%s5410_s0] sm:$0xff]  ;;  %67 = vst [vmem:[#allocation2] sm:$0xff] %v5421_v3  ;;  %69 = vst [vmem:[#allocation2 + $0x10] sm:$0xff] %v5421_v3  ;;  %709 = vmatprep.mubr.f32.mxu0 %v5421_v3  ;;  %786 = vmatprep.mubr.f32.mxu1 %v5421_v3  ;;  %s3791_s11 = smov 15   ;;  %s3792_s12 = smov 81  }
   0x2   :  { %71 = vst [vmem:[#allocation2 + $0x20] sm:$0xff] %v5421_v3  ;;  %72 = vst [vmem:[#allocation2 + $0x28] sm:$0xff] %v5421_v3  ;;  %99 = vrot.lane.b32.xlu1 %v2895_v1, %s3788_s28  ;;  %81 = vrot.lane.b32.xlu0 %v77_v2, %s3789_s29  ;;  %v29_v4 = vand.u32 127, %v5419_v0  ;;  %v2896_v5 = vld [vmem:[%s5410_s0 + $0x18] sm:$0xff]  ;;  %v78_v6 = vld [vmem:[%s5410_s0 + $0x8] sm:$0xff]  ;;  %s3790_s0 = smov 79  }
   0x3   :  { %74 = vst [vmem:[#allocation2 + $0x38] sm:$0xff] %v5421_v3  ;;  %76 = vst [vmem:[#allocation2 + $0x48] sm:$0xff] %v5421_v3  ;;  %s3793_s13 = smov 17   ;;  %s3794_s14 = smov 95   ;;  %vm85_vm6 = vcmask 261120   ;;  %vm5418_vm7 = vcmask 1048320  }
   0x4   :  { %v30_v7 = vadd.s32 128, %v29_v4  ;;  %v35_v8 = vand.u32 15, %v29_v4  ;;  %s3795_s15 = smov 31   ;;  %s3796_s16 = smov 97   ;;  %vm5444_vm8 = vcmask 646144   ;;  %vm5442_vm9 = vcmask 662528  }
   0x5   :  { %s3797_s17 = smov 33   ;;  %s3798_s18 = smov 111   ;;  %vm5443_vm10 = vcmask 121856   ;;  %vm5441_vm11 = vcmask 777216   ;;  %vm223_vm12 = vcmask 138240   ;;  %vm5484_vm13 = vcmask 252928  }
   0x6   :  { %101 = vrot.lane.b32.xlu1 %v2896_v5, %s3788_s28  ;;  %83 = vrot.lane.b32.xlu0 %v78_v6, %s3789_s29  ;;  %v42_v9 = vand.u32 15, %v30_v7  ;;  %vm55_vm0 = vcmp.ne.s32.totalorder %v35_v8, 0  ;;  %vm61_vm1 = vcmp.ne.s32.totalorder %v35_v8, 15  ;;  %s3799_s19 = smov 47   ;;  %s3800_s20 = smov 113   ;;  %vm333_vm14 = vcmask 269312  }
   0x7   :  { %v2891_v10 = vsel %vm55_vm0, 1.0, %v5421_v3  ;;  %v2893_v12 = vsel %vm61_vm1, 1.0, %v5421_v3  ;;  %s3801_s21 = smov 49   ;;  %s3802_s22 = smov 112   ;;  %vm302_vm15 = vcmask 793600   ;;  %vm271_vm0 = vcmask 384000  }
   0x8   :  { %vm56_vm2 = vcmp.ne.s32.totalorder %v42_v9, 0  ;;  %vm62_vm3 = vcmp.ne.s32.totalorder %v42_v9, 15  ;;  %s3803_s23 = smov 48   ;;  %s3804_s24 = smov 80   ;;  %vm240_vm1 = vcmask 908288  }
   0x9   :  { %v2892_v11 = vsel %vm56_vm2, 1.0, %v5421_v3  ;;  %v2894_v13 = vsel %vm62_vm3, 1.0, %v5421_v3  ;;  %s3805_s25 = smov 16   ;;  %vm169_vm2 = vcmask 400384   ;;  %vm138_vm3 = vcmask 924672  }
   0xa   :  { %v3110_v14 = vpack.i.bf16 %v2892_v11, %v2891_v10  ;;  %v3120_v15 = vpack.i.bf16 %v2894_v13, %v2893_v12 }
   0xc   :  { %3111 = vrot.lane.b32.xlu1 %v3110_v14, %s3790_s0  ;;  %3106 = vrot.lane.b32.xlu0 %v3110_v14, %s3791_s11 }
  0x10   :  { %3121 = vrot.lane.b32.xlu1 %v3120_v15, %s3792_s12  ;;  %3116 = vrot.lane.b32.xlu0 %v3120_v15, %s3793_s13 }
  0x14   :  { %3131 = vrot.lane.b32.xlu1 %v3110_v14, %s3794_s14  ;;  %3126 = vrot.lane.b32.xlu0 %v3110_v14, %s3795_s15 }
  0x18   :  { %3141 = vrot.lane.b32.xlu1 %v3120_v15, %s3796_s16  ;;  %3136 = vrot.lane.b32.xlu0 %v3120_v15, %s3797_s17 }
  0x1c   :  { %3151 = vrot.lane.b32.xlu1 %v3110_v14, %s3798_s18  ;;  %3146 = vrot.lane.b32.xlu0 %v3110_v14, %s3799_s19 }
  0x20   :  { %3161 = vrot.lane.b32.xlu1 %v3120_v15, %s3800_s20  ;;  %3156 = vrot.lane.b32.xlu0 %v3120_v15, %s3801_s21 }
  0x74   :  { %v100_v16 = vpop.permute.xlu1 %99  ;;  %v82_v17 = vpop.permute.xlu0 %81 }
  0x75   :  { %91 = vst.msk [vmem:[#allocation2] sm:$0xff] %vm5429_vm4, %v82_v17  ;;  %vm5440_vm4 = vcmask 916480  }
  0x78   :  { %v102_v18 = vpop.permute.xlu1 %101  ;;  %v84_v19 = vpop.permute.xlu0 %83 }
  0x79   :  { %111 = vst.msk [vmem:[#allocation2 + $0x20] sm:$0xff] %vm103_vm5, %v102_v18  ;;  %v3898_v22 = vsel %vm103_vm5, %v100_v16, %v102_v18  ;;  %v3912_v28 = vsel %vm85_vm6, %v82_v17, %v84_v19 }
  0x7a   :  { %93 = vst.msk [vmem:[#allocation2 + $0x10] sm:$0xff] %vm85_vm6, %v84_v19 }
  0x7b   :  { %109 = vst.msk [vmem:[#allocation2 + $0x10] sm:$0xff] %vm5418_vm7, %v100_v16  ;;  %vm207_vm7 = vcmask 392192  }
  0x7c   :  { %v3893_v20 = vld [vmem:[#allocation2] sm:$0xff] }
  0x7d   :  { %182 = vrot.lane.b32.xlu0 %v3893_v20, %s3802_s22 }
  0x7e   :  { %v3112_v21 = vpop.permute.xlu1 %3111  ;;  %v3107_v26 = vpop.permute.xlu0 %3106 }
  0x7f   :  { %v3925_v34 = vunpack.i.l.bf16 %v3107_v26  ;;  %v3930_v36 = vunpack.i.h.bf16 %v3112_v21  ;;  %v3932_v37 = vunpack.i.l.bf16 %v3112_v21  ;;  %v3972_v53 = vunpack.i.h.bf16 %v3107_v26 }
  0x80   :  { %v3900_v23 = vld [vmem:[#allocation2 + $0x20] sm:$0xff] }
  0x81   :  { %346 = vrot.lane.b32.xlu0 %v3893_v20, %s3788_s28  ;;  %v3170_v24 = vpack.i.bf16 %v3900_v23, %v3898_v22  ;;  %5488 = vst [vmem:[#allocation5_spill] sm:$0xff] %v3925_v34  ;;  %5489 = vst [vmem:[#allocation6_spill] sm:$0xff] %v3930_v36  ;;  %v126_v40 = vmul.f32 %v3925_v34, %v3893_v20  ;;  %v3948_v43 = vsel %vm5444_vm8, %v3932_v37, %v3930_v36 }
  0x82   :  { %v3122_v25 = vpop.permute.xlu1 %3121  ;;  %v3907_v27 = vld [vmem:[#allocation2 + $0x10] sm:$0xff]  ;;  %v3117_v31 = vpop.permute.xlu0 %3116  ;;  %5490 = vst [vmem:[#allocation7_spill] sm:$0xff] %v3932_v37  ;;  %5493 = vst [vmem:[#allocation10_spill] sm:$0xff] %v3948_v43  ;;  %v158_v47 = vmul.f32 %v3948_v43, %v3898_v22  ;;  %v159_v48 = vmul.f32 %v3930_v36, %v3900_v23  ;;  %v3994_v62 = vsel %vm5443_vm10, %v3925_v34, %v3972_v53 }
  0x83   :  { %3171 = vrot.lane.b32.xlu1 %v3170_v24, %s3803_s23  ;;  %v3165_v30 = vpack.i.bf16 %v3907_v27, %v3912_v28  ;;  %v3936_v39 = vunpack.i.l.bf16 %v3117_v31  ;;  %v3963_v49 = vunpack.i.h.bf16 %v3122_v25  ;;  %v3965_v50 = vunpack.i.l.bf16 %v3122_v25 }
  0x84   :  { %v3200_v55 = vpack.i.bf16 %v159_v48, %v158_v47  ;;  %v3989_v61 = vunpack.i.h.bf16 %v3117_v31  ;;  %v157_v63 = vmul.f32 %v3932_v37, %v3907_v27  ;;  %v127_v6 = vmul.f32 %v3994_v62, %v3912_v28 }
  0x85   :  { %498 = vrot.lane.b32.xlu0 %v3893_v20, %s3804_s24  ;;  %5491 = vst [vmem:[#allocation8_spill] sm:$0xff] %v3936_v39  ;;  %v228_v45 = vmul.f32 %v3936_v39, %v3893_v20  ;;  %5495 = vst [vmem:[#allocation12_spill] sm:$0xff] %v3963_v49  ;;  %v3982_v58 = vsel %vm5442_vm9, %v3965_v50, %v3963_v49  ;;  %v261_v2 = vmul.f32 %v3963_v49, %v3900_v23 }
  0x86   :  { %v3132_v29 = vpop.permute.xlu1 %3131  ;;  %v3127_v35 = vpop.permute.xlu0 %3126  ;;  %5496 = vst [vmem:[#allocation13_spill] sm:$0xff] %v3965_v50  ;;  %5499 = vst [vmem:[#allocation16_spill] sm:$0xff] %v3982_v58  ;;  %v260_v1 = vmul.f32 %v3982_v58, %v3898_v22  ;;  %v128_v7 = vmul.f32 %v3972_v53, %v3907_v27  ;;  %v4020_v9 = vsel %vm223_vm12, %v3936_v39, %v3989_v61 }
  0x87   :  { %201 = vrot.lane.b32.xlu1 %v3907_v27, %s3803_s23  ;;  %v3950_v44 = vunpack.i.l.bf16 %v3127_v35  ;;  %v3975_v56 = vunpack.i.h.bf16 %v3132_v29  ;;  %v3977_v57 = vunpack.i.l.bf16 %v3132_v29  ;;  %5501 = vst [vmem:[#allocation18_spill] sm:$0xff] %v3989_v61  ;;  %v4015_v8 = vunpack.i.h.bf16 %v3127_v35  ;;  %5504 = vst [vmem:[#allocation21_spill] sm:$0xff] %v4020_v9 }
  0x88   :  { %v3210_v10 = vpack.i.bf16 %v261_v2, %v260_v1  ;;  %v3195_v13 = vpack.i.bf16 %v128_v7, %v127_v6  ;;  %v229_v14 = vmul.f32 %v4020_v9, %v3912_v28  ;;  %v230_v15 = vmul.f32 %v3989_v61, %v3907_v27 }
  0x89   :  { %3166 = vrot.lane.b32.xlu0 %v3165_v30, %s3802_s22  ;;  %5494 = vst [vmem:[#allocation11_spill] sm:$0xff] %v3950_v44  ;;  %v290_v52 = vmul.f32 %v3950_v44, %v3893_v20  ;;  %5498 = vst [vmem:[#allocation15_spill] sm:$0xff] %v3975_v56  ;;  %v4006_v4 = vsel %vm5441_vm11, %v3977_v57, %v3975_v56  ;;  %v323_v12 = vmul.f32 %v3975_v56, %v3900_v23 }
  0x8a   :  { %v3919_v32 = vpop.permute.xlu1 %3141  ;;  %v3137_v42 = vpop.permute.xlu0 %3136  ;;  %5502 = vst [vmem:[#allocation19_spill] sm:$0xff] %v4006_v4  ;;  %5503 = vst [vmem:[#allocation20_spill] sm:$0xff] %v4015_v8  ;;  %v322_v11 = vmul.f32 %v4006_v4, %v3898_v22  ;;  %v4037_v17 = vsel %vm5484_vm13, %v3950_v44, %v4015_v8  ;;  %v292_v26 = vmul.f32 %v4015_v8, %v3907_v27 }
  0x8b   :  { %3181 = vrot.lane.b32.xlu1 %v3170_v24, %s3789_s29  ;;  %v3967_v51 = vunpack.i.l.bf16 %v3137_v42  ;;  %v4032_v16 = vunpack.i.h.bf16 %v3137_v42  ;;  %5505 = vst [vmem:[#allocation22_spill] sm:$0xff] %v4037_v17  ;;  %v4041_v19 = vunpack.i.h.bf16 %v3919_v32  ;;  %v4044_v21 = vunpack.i.l.bf16 %v3919_v32 }
  0x8c   :  { %v3220_v18 = vpack.i.bf16 %v323_v12, %v322_v11  ;;  %v291_v25 = vmul.f32 %v4037_v17, %v3912_v28  ;;  %v259_v31 = vmul.f32 %v3965_v50, %v3907_v27  ;;  %v321_v47 = vmul.f32 %v3977_v57, %v3907_v27 }
  0x8d   :  { %3176 = vrot.lane.b32.xlu0 %v3165_v30, %s3788_s28  ;;  %5497 = vst [vmem:[#allocation14_spill] sm:$0xff] %v3967_v51  ;;  %v387_v60 = vmul.f32 %v3967_v51, %v3893_v20  ;;  %v4064_v32 = vsel %vm302_vm15, %v4044_v21, %v4041_v19  ;;  %v389_v42 = vmul.f32 %v4032_v16, %v3907_v27 }
  0x8e   :  { %v3923_v33 = vpop.permute.xlu1 %3151  ;;  %v3147_v54 = vpop.permute.xlu0 %3146  ;;  %v3215_v35 = vpack.i.bf16 %v292_v26, %v291_v25  ;;  %v417_v48 = vmul.f32 %v4064_v32, %v3898_v22  ;;  %v416_v12 = vmul.f32 %v4044_v21, %v3907_v27  ;;  %v3806_v26 = vmov 0  }
  0x8f   :  { %364 = vrot.lane.b32.xlu1 %v3907_v27, %s3789_s29  ;;  %v3984_v59 = vunpack.i.l.bf16 %v3147_v54  ;;  %v4051_v29 = vunpack.i.h.bf16 %v3147_v54  ;;  %v4084_v54 = vunpack.i.h.bf16 %v3923_v33  ;;  %3245 = vset.pattern.permute.xlu0 %v3806_v26 }
  0x90   :  { %3246 = vset.pattern.permute.xlu1 %v3806_v26 }
  0x91   :  { %3186 = vrot.lane.b32.xlu0 %v3165_v30, %s3804_s24  ;;  %5500 = vst [vmem:[#allocation17_spill] sm:$0xff] %v3984_v59  ;;  %v445_v5 = vmul.f32 %v3984_v59, %v3893_v20  ;;  %v4056_v30 = vsel %vm333_vm14, %v3967_v51, %v4032_v16  ;;  %5506 = vst [vmem:[#allocation23_spill] sm:$0xff] %v4084_v54  ;;  %v447_v1 = vmul.f32 %v4051_v29, %v3907_v27 }
  0x92   :  { %v3934_v38 = vpop.permute.xlu1 %3161 }
  0x93   :  { %3191 = vrot.lane.b32.xlu1 %v3170_v24, %s3805_s25  ;;  %v3942_v41 = vunpack.i.h.bf16 %v3934_v38  ;;  %v3205_v24 = vpack.i.bf16 %v230_v15, %v229_v14  ;;  %v476_v14 = vmul.f32 %v4084_v54, %v3900_v23 }
  0x95   :  { %5492 = vst [vmem:[#allocation9_spill] sm:$0xff] %v3942_v41  ;;  %132 = vrot.lane.b32.xlu0 %v126_v40, %s3800_s20  ;;  %v572_v46 = vmul.f32 %v3942_v41, %v3900_v23  ;;  %v388_v40 = vmul.f32 %v4056_v30, %v3912_v28 }
  0x97   :  { %517 = vrot.lane.b32.xlu1 %v3907_v27, %s3805_s25 }
  0x99   :  { %234 = vrot.lane.b32.xlu0 %v228_v45, %s3798_s18  ;;  %v4074_v45 = vsel %vm271_vm0, %v3984_v59, %v4051_v29 }
  0x9b   :  { %580 = vrot.lane.b32.xlu1 %v572_v46, %s3791_s11  ;;  %v3157_v46 = vpop.permute.xlu0 %3156 }
  0x9c   :  { %v4094_v2 = vunpack.i.h.bf16 %v3157_v46 }
  0x9d   :  { %296 = vrot.lane.b32.xlu0 %v290_v52, %s3796_s16  ;;  %v418_v52 = vmul.f32 %v4041_v19, %v3900_v23 }
  0x9e   :  { %v543_v25 = vmul.f32 %v4094_v2, %v3907_v27 }
  0x9f   :  { %3201 = vrot.lane.b32.xlu1 %v3200_v55, %s3801_s21  ;;  %v4087_v55 = vunpack.i.l.bf16 %v3923_v33  ;;  %v3230_v6 = vpack.i.bf16 %v418_v52, %v417_v48 }
  0xa1   :  { %393 = vrot.lane.b32.xlu0 %v387_v60, %s3794_s14  ;;  %5507 = vst [vmem:[#allocation24_spill] sm:$0xff] %v4087_v55  ;;  %v3225_v60 = vpack.i.bf16 %v389_v42, %v388_v40  ;;  %v4102_v33 = vsel %vm240_vm1, %v4087_v55, %v4084_v54  ;;  %v474_v23 = vmul.f32 %v4087_v55, %v3907_v27 }
  0xa3   :  { %163 = vrot.lane.b32.xlu1 %v157_v63, %s3801_s21  ;;  %v446_v63 = vmul.f32 %v4074_v45, %v3912_v28 }
  0xa5   :  { %451 = vrot.lane.b32.xlu0 %v445_v5, %s3792_s12  ;;  %v4096_v5 = vunpack.i.l.bf16 %v3157_v46  ;;  %v3235_v7 = vpack.i.bf16 %v447_v1, %v446_v63 }
  0xa7   :  { %3211 = vrot.lane.b32.xlu1 %v3210_v10, %s3799_s19  ;;  %5508 = vst [vmem:[#allocation25_spill] sm:$0xff] %v4096_v5  ;;  %v4106_v10 = vunpack.i.l.bf16 %v3934_v38  ;;  %v4111_v11 = vsel %vm169_vm2, %v4096_v5, %v4094_v2 }
  0xa8   :  { %5510 = vst [vmem:[#allocation27_spill] sm:$0xff] %v4111_v11  ;;  %v542_v38 = vmul.f32 %v4111_v11, %v3912_v28  ;;  %v541_v28 = vmul.f32 %v4096_v5, %v3893_v20  ;;  %v627_v20 = vld [vmem:[%s5411_s2 + $0x8] sm:$0xff] }
  0xa9   :  { %3196 = vrot.lane.b32.xlu0 %v3195_v13, %s3800_s20  ;;  %5509 = vst [vmem:[#allocation26_spill] sm:$0xff] %v4106_v10  ;;  %v475_v13 = vmul.f32 %v4102_v33, %v3898_v22  ;;  %v4126_v15 = vsel %vm138_vm3, %v4106_v10, %v3942_v41 }
  0xaa   :  { %5511 = vst [vmem:[#allocation28_spill] sm:$0xff] %v4126_v15 }
  0xab   :  { %3221 = vrot.lane.b32.xlu1 %v3220_v18, %s3797_s17  ;;  %v3240_v18 = vpack.i.bf16 %v476_v14, %v475_v13 }
  0xad   :  { %3206 = vrot.lane.b32.xlu0 %v3205_v24, %s3798_s18  ;;  %v571_v24 = vmul.f32 %v4126_v15, %v3898_v22  ;;  %v626_v22 = vld [vmem:[%s5411_s2] sm:$0xff] }
  0xaf   :  { %265 = vrot.lane.b32.xlu1 %v259_v31, %s3799_s19  ;;  %v570_v31 = vmul.f32 %v4106_v10, %v3907_v27 }
  0xb1   :  { %3216 = vrot.lane.b32.xlu0 %v3215_v35, %s3796_s16 }
  0xb3   :  { %327 = vrot.lane.b32.xlu1 %v321_v47, %s3797_s17 }
  0xb5   :  { %3226 = vrot.lane.b32.xlu0 %v3225_v60, %s3794_s14 }
  0xb7   :  { %3231 = vrot.lane.b32.xlu1 %v3230_v6, %s3795_s15 }
  0xb9   :  { %3236 = vrot.lane.b32.xlu0 %v3235_v7, %s3792_s12 }
  0xbb   :  { %422 = vrot.lane.b32.xlu1 %v416_v12, %s3795_s15 }
  0xbd   :  { %549 = vrot.lane.b32.xlu0 %v542_v38, %s3790_s0 }
  0xbf   :  { %3241 = vrot.lane.b32.xlu1 %v3240_v18, %s3793_s13 }
  0xc1   :  { %578 = vrot.lane.b32.xlu0 %v571_v24, %s3791_s11 }
  0xc3   :  { %480 = vrot.lane.b32.xlu1 %v474_v23, %s3793_s13 }
  0xc5   :  { %547 = vrot.lane.b32.xlu0 %v541_v28, %s3790_s0 }
  0xc7   :  { %551 = vrot.lane.b32.xlu1 %v543_v25, %s3790_s0 }
  0xc9   :  { %630 = vperm.xlu0 %3245, %v626_v22  }
  0xcb   :  { %576 = vrot.lane.b32.xlu1 %v570_v31, %s3791_s11 }
  0xcf   :  { %635 = vperm.xlu1 %3246, %v627_v20  }
  0xef   :  { %v183_v35 = vpop.permute.xlu0 %182 }
  0xf3   :  { %v4151_v40 = vpop.permute.xlu0 %346 }
  0xf5   :  { %v3172_v42 = vpop.permute.xlu1 %3171 }
  0xf6   :  { %v3174_v38 = vunpack.i.h.bf16 %v3172_v42  ;;  %v3173_v18 = vunpack.i.l.bf16 %v3172_v42 }
  0xf7   :  { %v4153_v46 = vpop.permute.xlu0 %498 }
  0xf8   :  { %v209_v22 = vsel %vm207_vm7, %v3173_v18, %v3174_v38 }
  0xf9   :  { %v202_v47 = vpop.permute.xlu1 %201 }
  0xfa   :  { %v208_v0 = vsel %vm207_vm7, %v202_v47, %v3173_v18 }
  0xfb   :  { %v3167_v48 = vpop.permute.xlu0 %3166 }
  0xfc   :  { %v3169_v5 = vunpack.i.h.bf16 %v3167_v48  ;;  %v3168_v15 = vunpack.i.l.bf16 %v3167_v48 }
  0xfd   :  { %v4155_v52 = vpop.permute.xlu1 %3181 }
  0xfe   :  { %v189_v47 = vsel %vm5440_vm4, %v183_v35, %v3168_v15 }
  0xff   :  { %v4157_v60 = vpop.permute.xlu0 %3176 }
 0x101   :  { %v4159_v27 = vpop.permute.xlu1 %364 }
 0x103   :  { %v4161_v63 = vpop.permute.xlu0 %3186 }
 0x105   :  { %v4163_v1 = vpop.permute.xlu1 %3191 }
 0x107   :  { %v133_v6 = vpop.permute.xlu0 %132 }
 0x109   :  { %v4165_v7 = vpop.permute.xlu1 %517 }
 0x10b   :  { %v235_v12 = vpop.permute.xlu0 %234 }
 0x10d   :  { %v4167_v13 = vpop.permute.xlu1 %580 }
 0x10f   :  { %v297_v14 = vpop.permute.xlu0 %296 }
 0x111   :  { %v3202_v24 = vpop.permute.xlu1 %3201 }
 0x112   :  { %v3204_v23 = vunpack.i.h.bf16 %v3202_v24  ;;  %v3203_v28 = vunpack.i.l.bf16 %v3202_v24 }
 0x113   :  { %v4169_v25 = vpop.permute.xlu0 %393 }
 0x114   :  { %v171_v26 = vsel %vm169_vm2, %v3203_v28, %v3204_v23 }
 0x115   :  { %v164_v31 = vpop.permute.xlu1 %163  ;;  %v2924_v20 = vpack.c.bf16 %v209_v22, %v171_v26  ;;  %v190_v26 = vsel %vm5440_vm4, %v3168_v15, %v3169_v5  ;;  %vm504_vm4 = vcmask 654336  }
 0x116   :  { %v170_v3 = vsel %vm169_vm2, %v164_v31, %v3203_v28 }
 0x117   :  { %v4175_v10 = vpop.permute.xlu0 %451  ;;  %2925 = vmatprep.subr.bf16.mxu1 %v2924_v20  ;;  %v2926_v42 = vpack.c.bf16 %v208_v0, %v170_v3 }
 0x119   :  { %2927 = vmatpush1.bf16.msra.mxu1 %v2926_v42  ;;  %v3212_v24 = vpop.permute.xlu1 %3211 }
 0x11a   :  { %v3214_v41 = vunpack.i.h.bf16 %v3212_v24  ;;  %v3213_v23 = vunpack.i.l.bf16 %v3212_v24 }
 0x11b   :  { %v3197_v55 = vpop.permute.xlu0 %3196 }
 0x11c   :  { %v3199_v59 = vunpack.i.h.bf16 %v3197_v55  ;;  %v3198_v38 = vunpack.i.l.bf16 %v3197_v55  ;;  %v273_v20 = vsel %vm271_vm0, %v3213_v23, %v3214_v41 }
 0x11d   :  { %v3222_v51 = vpop.permute.xlu1 %3221 }
 0x11e   :  { %v3224_v18 = vunpack.i.h.bf16 %v3222_v51  ;;  %v3223_v28 = vunpack.i.l.bf16 %v3222_v51  ;;  %v140_v22 = vsel %vm138_vm3, %v3198_v38, %v3199_v59  ;;  %v139_v0 = vsel %vm138_vm3, %v133_v6, %v3198_v38 }
 0x11f   :  { %v3207_v3 = vpop.permute.xlu0 %3206  ;;  %v2908_v48 = vpack.c.bf16 %v190_v26, %v140_v22  ;;  %v2910_v31 = vpack.c.bf16 %v189_v47, %v139_v0  ;;  %v3179_v59 = vunpack.i.h.bf16 %v4157_v60  ;;  %v3178_v6 = vunpack.i.l.bf16 %v4157_v60 }
 0x120   :  { %v335_v42 = vsel %vm333_vm14, %v3223_v28, %v3224_v18  ;;  %v3209_v24 = vunpack.i.h.bf16 %v3207_v3  ;;  %v3208_v55 = vunpack.i.l.bf16 %v3207_v3  ;;  %v3184_v60 = vunpack.i.h.bf16 %v4155_v52 }
 0x121   :  { %2909 = vmatprep.subr.bf16.mxu0 %v2908_v48  ;;  %v266_v11 = vpop.permute.xlu1 %265  ;;  %v2928_v5 = vpack.c.bf16 %v335_v42, %v273_v20 }
 0x122   :  { %2911 = vmatpush1.bf16.msra.mxu0 %v2910_v31  ;;  %v272_v38 = vsel %vm271_vm0, %v266_v11, %v3213_v23  ;;  %v242_v41 = vsel %vm240_vm1, %v3208_v55, %v3209_v24  ;;  %v241_v22 = vsel %vm240_vm1, %v235_v12, %v3208_v55  ;;  %v3183_v11 = vunpack.i.l.bf16 %v4155_v52 }
 0x123   :  { %v3217_v15 = vpop.permute.xlu0 %3216  ;;  %2929 = vmatprep.subr.bf16.mxu1 %v2928_v5  ;;  %v3189_v24 = vunpack.i.h.bf16 %v4161_v63  ;;  %v353_v12 = vsel %vm103_vm5, %v3178_v6, %v3179_v59 }
 0x124   :  { %v3219_v51 = vunpack.i.h.bf16 %v3217_v15  ;;  %v3218_v35 = vunpack.i.l.bf16 %v3217_v15 }
 0x125   :  { %v328_v26 = vpop.permute.xlu1 %327 }
 0x126   :  { %v334_v47 = vsel %vm333_vm14, %v328_v26, %v3223_v28  ;;  %v304_v18 = vsel %vm302_vm15, %v3218_v35, %v3219_v51  ;;  %v303_v0 = vsel %vm302_vm15, %v297_v14, %v3218_v35  ;;  %v3188_v28 = vunpack.i.l.bf16 %v4161_v63 }
 0x127   :  { %v2930_v3 = vpack.c.bf16 %v334_v47, %v272_v38  ;;  %v3227_v48 = vpop.permute.xlu0 %3226  ;;  %v2912_v31 = vpack.c.bf16 %v304_v18, %v242_v41  ;;  %v2914_v20 = vpack.c.bf16 %v303_v0, %v241_v22  ;;  %v352_v14 = vsel %vm103_vm5, %v4151_v40, %v3178_v6 }
 0x128   :  { %v3229_v23 = vunpack.i.h.bf16 %v3227_v48  ;;  %v3228_v42 = vunpack.i.l.bf16 %v3227_v48  ;;  %v371_v47 = vsel %vm85_vm6, %v3183_v11, %v3184_v60  ;;  %v370_v40 = vsel %vm85_vm6, %v4159_v27, %v3183_v11 }
 0x129   :  { %2913 = vmatprep.subr.bf16.mxu0 %v2912_v31  ;;  %v3232_v5 = vpop.permute.xlu1 %3231  ;;  %2931 = vmatpush1.bf16.msra.mxu1 %v2930_v3  ;;  %v506_v22 = vsel %vm504_vm4, %v3188_v28, %v3189_v24  ;;  %v505_v48 = vsel %vm504_vm4, %v4153_v46, %v3188_v28  ;;  %v3194_v11 = vunpack.i.h.bf16 %v4163_v1 }
 0x12a   :  { %v3234_v55 = vunpack.i.h.bf16 %v3232_v5  ;;  %v3233_v15 = vunpack.i.l.bf16 %v3232_v5  ;;  %2915 = vmatpush1.bf16.msra.mxu0 %v2914_v20  ;;  %v400_v51 = vsel %vm5441_vm11, %v3228_v42, %v3229_v23  ;;  %v399_v52 = vsel %vm5441_vm11, %v4169_v25, %v3228_v42 }
 0x12b   :  { %v3237_v35 = vpop.permute.xlu0 %3236  ;;  %v2916_v38 = vpack.c.bf16 %v400_v51, %v353_v12  ;;  %v2918_v26 = vpack.c.bf16 %v399_v52, %v352_v14  ;;  %v3193_v23 = vunpack.i.l.bf16 %v4163_v1  ;;  %vm523_vm11 = vcmask 130048  }
 0x12c   :  { %v3239_v63 = vunpack.i.h.bf16 %v3237_v35  ;;  %v3238_v41 = vunpack.i.l.bf16 %v3237_v35  ;;  %v429_v59 = vsel %vm5484_vm13, %v3233_v15, %v3234_v55 }
 0x12d   :  { %2917 = vmatprep.subr.bf16.mxu0 %v2916_v38  ;;  %v423_v6 = vpop.permute.xlu1 %422  ;;  %v2932_v18 = vpack.c.bf16 %v429_v59, %v371_v47  ;;  %v525_v46 = vsel %vm523_vm11, %v3193_v23, %v3194_v11  ;;  %v524_v55 = vsel %vm523_vm11, %v4165_v7, %v3193_v23  ;;  %v5512_v47 = vmov 0.0  }
 0x12e   :  { %v428_v0 = vsel %vm5484_vm13, %v423_v6, %v3233_v15  ;;  %2919 = vmatpush1.bf16.msra.mxu0 %v2918_v26  ;;  %v458_v25 = vsel %vm5442_vm9, %v3238_v41, %v3239_v63  ;;  %v457_v3 = vsel %vm5442_vm9, %v4175_v10, %v3238_v41  ;;  %v588_v26 = vld [vmem:[%s5412_s1] sm:$0xff]  ;;  %vm638_vm9 = vcmask 588800  }
 0x12f   :  { %v2934_v31 = vpack.c.bf16 %v428_v0, %v370_v40  ;;  %v550_v20 = vpop.permute.xlu0 %549  ;;  %2933 = vmatprep.subr.bf16.mxu1 %v2932_v18  ;;  %v2920_v27 = vpack.c.bf16 %v506_v22, %v458_v25  ;;  %v2922_v60 = vpack.c.bf16 %v505_v48, %v457_v3 }
 0x131   :  { %2921 = vmatprep.subr.bf16.mxu0 %v2920_v27  ;;  %v3242_v42 = vpop.permute.xlu1 %3241  ;;  %2935 = vmatpush1.bf16.msra.mxu1 %v2934_v31 }
 0x132   :  { %v3244_v24 = vunpack.i.h.bf16 %v3242_v42  ;;  %v3243_v5 = vunpack.i.l.bf16 %v3242_v42  ;;  %2923 = vmatpush1.bf16.msra.mxu0 %v2922_v60 }
 0x133   :  { %v579_v10 = vpop.permute.xlu0 %578 }
 0x134   :  { %v487_v12 = vsel %vm223_vm12, %v3243_v5, %v3244_v24  ;;  %v583_v35 = vsel %vm5443_vm10, %v579_v10, %v4167_v13  ;;  %v589_v13 = vld [vmem:[%s5412_s1 + $0x8] sm:$0xff] }
 0x135   :  { %v481_v28 = vpop.permute.xlu1 %480  ;;  %v2936_v14 = vpack.c.bf16 %v525_v46, %v487_v12 }
 0x136   :  { %v486_v15 = vsel %vm223_vm12, %v481_v28, %v3243_v5 }
 0x137   :  { %v2938_v1 = vpack.c.bf16 %v524_v55, %v486_v15  ;;  %2937 = vmatprep.subr.bf16.mxu1 %v2936_v14  ;;  %v548_v51 = vpop.permute.xlu0 %547 }
 0x138   :  { %v553_v7 = vsel %vm5444_vm8, %v548_v51, %v550_v20 }
 0x139   :  { %2939 = vmatpush1.bf16.msra.mxu1 %v2938_v1  ;;  %v552_v52 = vpop.permute.xlu1 %551 }
 0x13a   :  { %738 = vmatprep.subr.mxu1 %v583_v35  ;;  %v554_v38 = vsel %vm5444_vm8, %v550_v20, %v552_v52 }
 0x13b   :  { %661 = vmatprep.subr.mxu0 %v554_v38 }
 0x13c   :  { %662 = vmatpush1.msra.mxu0 %v553_v7 }
 0x13d   :  { %v577_v63 = vpop.permute.xlu1 %576  ;;  %2897 = vmatmul.mubr.msk.f32.vlgmr.msra.gmra.mrb[0].mxu0 %vm638_vm9, %v588_v26 }
 0x13e   :  { %v582_v41 = vsel %vm5443_vm10, %v577_v63, %v579_v10  ;;  %715 = vmatprep.mubr.f32.mxu0 %v5512_v47  ;;  %vm5514_vm10 = vcmask 1048320  }
 0x13f   :  { %739 = vmatpush1.msra.mxu1 %v582_v41 }
 0x140   :  { %2899 = vmatmul.mubr.msk.f32.vlgmr.msra.gmra.mrb[0].mxu1 %vm638_vm9, %v588_v26 }
 0x141   :  { %792 = vmatprep.mubr.f32.mxu1 %v5512_v47  ;;  %2898 = vmatmul.mubr.msk.f32.gmra.mrb[2].mxu0 %vm638_vm9, %v589_v13 }
 0x144   :  { %2900 = vmatmul.mubr.msk.f32.gmra.mrb[2].mxu1 %vm638_vm9, %v589_v13  ;;  %vm5513_vm9 = vcmask 1047808  }
 0x145   :  { %vm5515_vm8 = vmmov %vm5513_vm9 }
 0x148   :  { %v631_v59 = vpop.permute.xlu0 %630 }
 0x14e   :  { %v636_v0 = vpop.permute.xlu1 %635 }
 0x210   :  { %v711_v40 = vpop.f32.mrb[0].mxu0 }
 0x211   :  { %v712_v6 = vadd.f32 %v711_v40, %v631_v59  ;;  %v713_v18 = vpop.f32.mrb[1].mxu0 }
 0x212   :  { %v714_v22 = vadd.f32 %v713_v18, %v631_v59 }
 0x213   :  { %v799_v25 = vmax.f32 %v712_v6, 0.0  ;;  %v788_v3 = vpop.f32.mrb[0].mxu1 }
 0x214   :  { %v800_v48 = vmax.f32 %v714_v22, 0.0  ;;  %v789_v31 = vadd.f32 %v788_v3, %v631_v59  ;;  %v790_v20 = vpop.f32.mrb[1].mxu1  ;;  %v717_v27 = vpop.f32.mrb[2].mxu0 }
 0x215   :  { %v791_v60 = vadd.f32 %v790_v20, %v631_v59  ;;  %811 = vrot.lane.b32.xlu1 %v799_v25, %s3789_s29  ;;  %v719_v11 = vpop.f32.mrb[3].mxu0  ;;  %v718_v23 = vadd.f32 %v717_v27, %v636_v0 }
 0x216   :  { %v801_v42 = vmax.f32 %v789_v31, 0.0  ;;  %813 = vrot.lane.b32.xlu0 %v800_v48, %s3789_s29  ;;  %v720_v24 = vadd.f32 %v719_v11, %v636_v0 }
 0x217   :  { %v802_v5 = vmax.f32 %v791_v60, 0.0  ;;  %v794_v10 = vpop.f32.mrb[2].mxu1  ;;  %v803_v46 = vmax.f32 %v718_v23, 0.0 }
 0x218   :  { %v796_v12 = vpop.f32.mrb[3].mxu1  ;;  %v804_v28 = vmax.f32 %v720_v24, 0.0  ;;  %v795_v14 = vadd.f32 %v794_v10, %v636_v0 }
 0x219   :  { %837 = vrot.lane.b32.xlu1 %v801_v42, %s3788_s28  ;;  %v797_v55 = vadd.f32 %v796_v12, %v636_v0 }
 0x21a   :  { %839 = vrot.lane.b32.xlu0 %v802_v5, %s3788_s28  ;;  %v805_v15 = vmax.f32 %v795_v14, 0.0 }
 0x21b   :  { %v806_v1 = vmax.f32 %v797_v55, 0.0 }
 0x21d   :  { %815 = vrot.lane.b32.xlu1 %v803_v46, %s3789_s29 }
 0x21e   :  { %817 = vrot.lane.b32.xlu0 %v804_v28, %s3789_s29 }
 0x221   :  { %841 = vrot.lane.b32.xlu1 %v805_v15, %s3788_s28 }
 0x222   :  { %843 = vrot.lane.b32.xlu0 %v806_v1, %s3788_s28 }
 0x287   :  { %v812_v51 = vpop.permute.xlu1 %811 }
 0x288   :  { %827 = vst.msk [vmem:[#allocation2] sm:$0xff] %vm5513_vm9, %v812_v51  ;;  %v814_v52 = vpop.permute.xlu0 %813  ;;  %vm5516_vm9 = vmmov %vm5514_vm10 }
 0x289   :  { %829 = vst.msk [vmem:[#allocation2 + $0x10] sm:$0xff] %vm85_vm6, %v814_v52  ;;  %v4247_v63 = vsel %vm85_vm6, %v812_v51, %v814_v52 }
 0x28a   :  { %v866_v60 = vmul.f32 %v4247_v63, %v3994_v62  ;;  %v1022_v28 = vmul.f32 %v4247_v63, %v4020_v9 }
 0x28b   :  { %v838_v35 = vpop.permute.xlu1 %837 }
 0x28c   :  { %853 = vst.msk [vmem:[#allocation2 + $0x10] sm:$0xff] %vm5514_vm10, %v838_v35  ;;  %v840_v38 = vpop.permute.xlu0 %839 }
 0x28d   :  { %855 = vst.msk [vmem:[#allocation2 + $0x20] sm:$0xff] %vm103_vm5, %v840_v38  ;;  %v4259_v6 = vsel %vm103_vm5, %v838_v35, %v840_v38  ;;  %v1106_v35 = vmul.f32 %v4247_v63, %v4037_v17 }
 0x28e   :  { %v908_v42 = vmul.f32 %v4259_v6, %v3948_v43  ;;  %v1064_v15 = vmul.f32 %v4259_v6, %v3982_v58 }
 0x28f   :  { %v816_v26 = vpop.permute.xlu1 %815  ;;  %v4302_v10 = vld [vmem:[#allocation2] sm:$0xff] }
 0x290   :  { %830 = vst.msk [vmem:[#allocation2 + $0x28] sm:$0xff] %vm5515_vm8, %v816_v26  ;;  %v818_v7 = vpop.permute.xlu0 %817  ;;  %vm5525_vm8 = vcmask 916480  }
 0x291   :  { %832 = vst.msk [vmem:[#allocation2 + $0x38] sm:$0xff] %vm85_vm6, %v818_v7  ;;  %v4265_v22 = vsel %vm85_vm6, %v816_v26, %v818_v7  ;;  %vm5526_vm10 = vmmov %vm5525_vm8 }
 0x292   :  { %v869_v38 = vmul.f32 %v4265_v22, %v3994_v62 }
 0x293   :  { %v842_v41 = vpop.permute.xlu1 %841  ;;  %v4249_v47 = vld [vmem:[#allocation2 + $0x10] sm:$0xff] }
 0x294   :  { %856 = vst.msk [vmem:[#allocation2 + $0x38] sm:$0xff] %vm5516_vm9, %v842_v41  ;;  %v844_v13 = vpop.permute.xlu0 %843  ;;  %v3247_v59 = vpack.i.bf16 %v4249_v47, %v4247_v63  ;;  %v4255_v40 = vld [vmem:[#allocation2 + $0x20] sm:$0xff]  ;;  %v867_v27 = vmul.f32 %v3972_v53, %v4249_v47  ;;  %v1023_v46 = vmul.f32 %v3989_v61, %v4249_v47  ;;  %v1107_v51 = vmul.f32 %v4015_v8, %v4249_v47  ;;  %vm5528_vm9 = vmmov %vm5525_vm8 }
 0x295   :  { %858 = vst.msk [vmem:[#allocation2 + $0x48] sm:$0xff] %vm103_vm5, %v844_v13  ;;  %v3252_v18 = vpack.i.bf16 %v4255_v40, %v4259_v6  ;;  %v4276_v48 = vsel %vm103_vm5, %v842_v41, %v844_v13  ;;  %v909_v23 = vmul.f32 %v3930_v36, %v4255_v40  ;;  %v1065_v55 = vmul.f32 %v3963_v49, %v4255_v40 }
 0x296   :  { %3248 = vrot.lane.b32.xlu1 %v3247_v59, %s3802_s22  ;;  %v3277_v11 = vpack.i.bf16 %v867_v27, %v866_v60  ;;  %v3292_v14 = vpack.i.bf16 %v1023_v46, %v1022_v28  ;;  %v3302_v26 = vpack.i.bf16 %v1107_v51, %v1106_v35  ;;  %v1149_v41 = vmul.f32 %v3975_v56, %v4255_v40 }
 0x297   :  { %v3282_v24 = vpack.i.bf16 %v909_v23, %v908_v42  ;;  %v4298_v5 = vld [vmem:[#allocation2 + $0x28] sm:$0xff]  ;;  %v3297_v1 = vpack.i.bf16 %v1065_v55, %v1064_v15  ;;  %v907_v27 = vmul.f32 %v3932_v37, %v4249_v47  ;;  %v1262_v42 = vmul.f32 %v4247_v63, %v4056_v30 }
 0x298   :  { %v4306_v12 = vpack.i.bf16 %v4298_v5, %v4302_v10  ;;  %v1304_v15 = vmul.f32 %v4259_v6, %v4064_v32  ;;  %v1347_v35 = vmul.f32 %v4051_v29, %v4249_v47 }
 0x29a   :  { %3253 = vrot.lane.b32.xlu1 %v3252_v18, %s3803_s23 }
 0x29b   :  { %v4267_v0 = vld [vmem:[#allocation2 + $0x38] sm:$0xff] }
 0x29c   :  { %v3347_v25 = vpack.i.bf16 %v4267_v0, %v4265_v22  ;;  %v4271_v3 = vld [vmem:[#allocation2 + $0x48] sm:$0xff]  ;;  %v3357_v20 = vpack.i.bf16 %v4267_v0, %v4249_v47  ;;  %v870_v52 = vmul.f32 %v3972_v53, %v4267_v0  ;;  %v1026_v23 = vmul.f32 %v3989_v61, %v4267_v0 }
 0x29d   :  { %v3352_v31 = vpack.i.bf16 %v4271_v3, %v4276_v48  ;;  %v912_v13 = vmul.f32 %v3930_v36, %v4271_v3  ;;  %v1068_v55 = vmul.f32 %v3963_v49, %v4271_v3 }
 0x29e   :  { %3258 = vrot.lane.b32.xlu1 %v3247_v59, %s3788_s28  ;;  %3348 = vrot.lane.b32.xlu0 %v3347_v25, %s3802_s22  ;;  %v3427_v7 = vpack.i.bf16 %v870_v52, %v869_v38  ;;  %v1066_v38 = vmul.f32 %v3965_v50, %v4267_v0 }
 0x2a2   :  { %3263 = vrot.lane.b32.xlu1 %v3252_v18, %s3789_s29  ;;  %3353 = vrot.lane.b32.xlu0 %v3352_v31, %s3803_s23 }
 0x2a6   :  { %3268 = vrot.lane.b32.xlu1 %v3247_v59, %s3804_s24  ;;  %3358 = vrot.lane.b32.xlu0 %v3357_v20, %s3803_s23  ;;  %v1148_v59 = vmul.f32 %v4259_v6, %v4006_v4 }
 0x2aa   :  { %3273 = vrot.lane.b32.xlu1 %v3252_v18, %s3805_s25  ;;  %3378 = vrot.lane.b32.xlu0 %v3347_v25, %s3788_s28  ;;  %v911_v18 = vmul.f32 %v4276_v48, %v3948_v43 }
 0x2ae   :  { %3278 = vrot.lane.b32.xlu1 %v3277_v11, %s3800_s20  ;;  %3383 = vrot.lane.b32.xlu0 %v3352_v31, %s3789_s29  ;;  %v1263_v11 = vmul.f32 %v4032_v16, %v4249_v47 }
 0x2b0   :  { %v3317_v46 = vpack.i.bf16 %v1263_v11, %v1262_v42  ;;  %v1152_v11 = vmul.f32 %v3975_v56, %v4271_v3  ;;  %v1151_v42 = vmul.f32 %v4276_v48, %v4006_v4 }
 0x2b2   :  { %3283 = vrot.lane.b32.xlu1 %v3282_v24, %s3801_s21  ;;  %3388 = vrot.lane.b32.xlu0 %v3357_v20, %s3789_s29  ;;  %v1025_v24 = vmul.f32 %v4265_v22, %v4020_v9 }
 0x2b4   :  { %v3442_v28 = vpack.i.bf16 %v1026_v23, %v1025_v24  ;;  %v865_v23 = vmul.f32 %v3925_v34, %v4302_v10 }
 0x2b6   :  { %3288 = vrot.lane.b32.xlu1 %v4306_v12, %s3802_s22  ;;  %3408 = vrot.lane.b32.xlu0 %v3347_v25, %s3804_s24  ;;  %v3307_v25 = vpack.i.bf16 %v1149_v41, %v1148_v59  ;;  %v1389_v59 = vmul.f32 %v4084_v54, %v4255_v40 }
 0x2ba   :  { %3293 = vrot.lane.b32.xlu1 %v3292_v14, %s3798_s18  ;;  %3413 = vrot.lane.b32.xlu0 %v3352_v31, %s3805_s25  ;;  %v3432_v31 = vpack.i.bf16 %v912_v13, %v911_v18  ;;  %v1305_v14 = vmul.f32 %v4041_v19, %v4255_v40  ;;  %v1110_v18 = vmul.f32 %v4015_v8, %v4267_v0 }
 0x2bc   :  { %v3322_v51 = vpack.i.bf16 %v1305_v14, %v1304_v15  ;;  %v1147_v14 = vmul.f32 %v3977_v57, %v4249_v47  ;;  %v1024_v15 = vmul.f32 %v3936_v39, %v4298_v5 }
 0x2be   :  { %3298 = vrot.lane.b32.xlu1 %v3297_v1, %s3799_s19  ;;  %3418 = vrot.lane.b32.xlu0 %v3357_v20, %s3805_s25  ;;  %v910_v20 = vmul.f32 %v3932_v37, %v4267_v0  ;;  %v1067_v1 = vmul.f32 %v4276_v48, %v3982_v58 }
 0x2c0   :  { %v3437_v60 = vpack.i.bf16 %v910_v20, %v907_v27  ;;  %v3447_v52 = vpack.i.bf16 %v1068_v55, %v1067_v1  ;;  %v1266_v1 = vmul.f32 %v4032_v16, %v4267_v0 }
 0x2c2   :  { %3303 = vrot.lane.b32.xlu1 %v3302_v26, %s3796_s16  ;;  %3428 = vrot.lane.b32.xlu0 %v3427_v7, %s3800_s20  ;;  %v1346_v26 = vmul.f32 %v4247_v63, %v4074_v45  ;;  %v1063_v7 = vmul.f32 %v3965_v50, %v4249_v47 }
 0x2c4   :  { %v3327_v41 = vpack.i.bf16 %v1347_v35, %v1346_v26  ;;  %v3452_v13 = vpack.i.bf16 %v1066_v38, %v1063_v7  ;;  %v1108_v26 = vmul.f32 %v3950_v44, %v4298_v5  ;;  %v1308_v7 = vmul.f32 %v4041_v19, %v4271_v3 }
 0x2c6   :  { %3308 = vrot.lane.b32.xlu1 %v3307_v25, %s3797_s17  ;;  %3433 = vrot.lane.b32.xlu0 %v3432_v31, %s3801_s21  ;;  %v1388_v25 = vmul.f32 %v4259_v6, %v4102_v33  ;;  %v1109_v31 = vmul.f32 %v4265_v22, %v4037_v17 }
 0x2c8   :  { %v3332_v20 = vpack.i.bf16 %v1389_v59, %v1388_v25  ;;  %v3457_v27 = vpack.i.bf16 %v1110_v18, %v1109_v31  ;;  %v1503_v18 = vmul.f32 %v4094_v2, %v4249_v47  ;;  %v1306_v25 = vmul.f32 %v4044_v21, %v4267_v0  ;;  %v5517_v31 = vld [vmem:[#allocation27_spill] sm:$0xff] }
 0x2ca   :  { %3313 = vrot.lane.b32.xlu1 %v4306_v12, %s3788_s28  ;;  %3438 = vrot.lane.b32.xlu0 %v3437_v60, %s3801_s21  ;;  %v868_v60 = vmul.f32 %v3925_v34, %v4298_v5 }
 0x2cc   :  { %v3337_v24 = vpack.i.bf16 %v868_v60, %v865_v23  ;;  %v5518_v23 = vld [vmem:[#allocation14_spill] sm:$0xff] }
 0x2ce   :  { %3318 = vrot.lane.b32.xlu1 %v3317_v46, %s3794_s14  ;;  %3443 = vrot.lane.b32.xlu0 %v3442_v28, %s3798_s18  ;;  %v3462_v46 = vpack.i.bf16 %v1152_v11, %v1151_v42  ;;  %v1150_v28 = vmul.f32 %v3977_v57, %v4267_v0  ;;  %v1264_v42 = vmul.f32 %v5518_v23, %v4298_v5 }
 0x2d0   :  { %v3467_v55 = vpack.i.bf16 %v1150_v28, %v1147_v14 }
 0x2d2   :  { %3323 = vrot.lane.b32.xlu1 %v3322_v51, %s3795_s15  ;;  %3448 = vrot.lane.b32.xlu0 %v3447_v52, %s3799_s19  ;;  %v1021_v51 = vmul.f32 %v3936_v39, %v4302_v10  ;;  %v1265_v52 = vmul.f32 %v4265_v22, %v4056_v30 }
 0x2d4   :  { %v3362_v35 = vpack.i.bf16 %v1024_v15, %v1021_v51  ;;  %v3472_v38 = vpack.i.bf16 %v1266_v1, %v1265_v52  ;;  %v1392_v1 = vmul.f32 %v4084_v54, %v4271_v3  ;;  %v1391_v52 = vmul.f32 %v4276_v48, %v4102_v33 }
 0x2d6   :  { %3328 = vrot.lane.b32.xlu1 %v3327_v41, %s3792_s12  ;;  %3453 = vrot.lane.b32.xlu0 %v3452_v13, %s3799_s19  ;;  %v1307_v41 = vmul.f32 %v4276_v48, %v4064_v32 }
 0x2d8   :  { %v3477_v59 = vpack.i.bf16 %v1308_v7, %v1307_v41 }
 0x2da   :  { %3333 = vrot.lane.b32.xlu1 %v3332_v20, %s3793_s13  ;;  %3458 = vrot.lane.b32.xlu0 %v3457_v27, %s3796_s16  ;;  %v1502_v20 = vmul.f32 %v4247_v63, %v5517_v31  ;;  %v1303_v27 = vmul.f32 %v4044_v21, %v4249_v47  ;;  %v1349_v63 = vmul.f32 %v4265_v22, %v4074_v45 }
 0x2dc   :  { %v3372_v60 = vpack.i.bf16 %v1503_v18, %v1502_v20  ;;  %v3482_v11 = vpack.i.bf16 %v1306_v25, %v1303_v27  ;;  %v5523_v27 = vld [vmem:[#allocation25_spill] sm:$0xff] }
 0x2de   :  { %3338 = vrot.lane.b32.xlu1 %v3337_v24, %s3800_s20  ;;  %3463 = vrot.lane.b32.xlu0 %v3462_v46, %s3797_s17  ;;  %v1350_v24 = vmul.f32 %v4051_v29, %v4267_v0  ;;  %v1261_v46 = vmul.f32 %v5518_v23, %v4302_v10 }
 0x2e0   :  { %v3392_v28 = vpack.i.bf16 %v1264_v42, %v1261_v46  ;;  %v3487_v14 = vpack.i.bf16 %v1350_v24, %v1349_v63 }
 0x2e2   :  { %3343 = vrot.lane.b32.xlu1 %v4306_v12, %s3804_s24  ;;  %3468 = vrot.lane.b32.xlu0 %v3467_v55, %s3797_s17  ;;  %v1105_v12 = vmul.f32 %v3950_v44, %v4302_v10  ;;  %v5519_v55 = vld [vmem:[#allocation17_spill] sm:$0xff] }
 0x2e3   :  { %v1348_v15 = vmul.f32 %v5519_v55, %v4298_v5  ;;  %v1345_v51 = vmul.f32 %v5519_v55, %v4302_v10 }
 0x2e4   :  { %v3367_v13 = vpack.i.bf16 %v1108_v26, %v1105_v12  ;;  %v5520_v26 = vld [vmem:[#allocation9_spill] sm:$0xff]  ;;  %v5521_v12 = vld [vmem:[#allocation24_spill] sm:$0xff] }
 0x2e5   :  { %v1545_v7 = vmul.f32 %v5520_v26, %v4255_v40  ;;  %v1390_v41 = vmul.f32 %v5521_v12, %v4267_v0  ;;  %v1387_v18 = vmul.f32 %v5521_v12, %v4249_v47  ;;  %v1506_v40 = vmul.f32 %v4094_v2, %v4267_v0 }
 0x2e6   :  { %3363 = vrot.lane.b32.xlu1 %v3362_v35, %s3798_s18  ;;  %3473 = vrot.lane.b32.xlu0 %v3472_v38, %s3794_s14  ;;  %v3397_v35 = vpack.i.bf16 %v1348_v15, %v1345_v51  ;;  %v3492_v38 = vpack.i.bf16 %v1392_v1, %v1391_v52  ;;  %v1548_v46 = vmul.f32 %v5520_v26, %v4271_v3 }
 0x2e7   :  { %v3497_v20 = vpack.i.bf16 %v1390_v41, %v1387_v18 }
 0x2ea   :  { %3368 = vrot.lane.b32.xlu1 %v3367_v13, %s3796_s16  ;;  %3478 = vrot.lane.b32.xlu0 %v3477_v59, %s3795_s15  ;;  %v5522_v13 = vld [vmem:[#allocation28_spill] sm:$0xff] }
 0x2eb   :  { %v1544_v59 = vmul.f32 %v4259_v6, %v5522_v13  ;;  %v1505_v6 = vmul.f32 %v4265_v22, %v5517_v31  ;;  %v1547_v63 = vmul.f32 %v4276_v48, %v5522_v13  ;;  %v1655_v22 = vld [vmem:[%s5413_s4] sm:$0xff]  ;;  %v1656_v48 = vld [vmem:[%s5413_s4 + $0x8] sm:$0xff] }
 0x2ed   :  { %v3402_v25 = vpack.i.bf16 %v1545_v7, %v1544_v59  ;;  %v3502_v24 = vpack.i.bf16 %v1506_v40, %v1505_v6  ;;  %v3507_v3 = vpack.i.bf16 %v1548_v46, %v1547_v63 }
 0x2ee   :  { %3373 = vrot.lane.b32.xlu1 %v3372_v60, %s3790_s0  ;;  %3483 = vrot.lane.b32.xlu0 %v3482_v11, %s3795_s15  ;;  %v1504_v60 = vmul.f32 %v5523_v27, %v4298_v5  ;;  %v1501_v11 = vmul.f32 %v5523_v27, %v4302_v10  ;;  %v1580_v5 = vld [vmem:[%s5414_s3 + $0x8] sm:$0xff]  ;;  %v5524_v10 = vld [vmem:[#allocation26_spill] sm:$0xff] }
 0x2ef   :  { %2901 = vmatprep.mubr.msk.f32.mxu0 %vm523_vm11, %v1580_v5  ;;  %2903 = vmatprep.mubr.msk.f32.mxu1 %vm523_vm11, %v1580_v5 }
 0x2f0   :  { %v3422_v42 = vpack.i.bf16 %v1504_v60, %v1501_v11 }
 0x2f2   :  { %3393 = vrot.lane.b32.xlu1 %v3392_v28, %s3794_s14  ;;  %3488 = vrot.lane.b32.xlu0 %v3487_v14, %s3792_s12  ;;  %v1546_v28 = vmul.f32 %v5524_v10, %v4267_v0  ;;  %v1543_v14 = vmul.f32 %v5524_v10, %v4249_v47 }
 0x2f4   :  { %v3512_v15 = vpack.i.bf16 %v1546_v28, %v1543_v14 }
 0x2f6   :  { %3398 = vrot.lane.b32.xlu1 %v3397_v35, %s3792_s12  ;;  %3493 = vrot.lane.b32.xlu0 %v3492_v38, %s3793_s13 }
 0x2fa   :  { %3403 = vrot.lane.b32.xlu1 %v3402_v25, %s3791_s11  ;;  %3498 = vrot.lane.b32.xlu0 %v3497_v20, %s3793_s13 }
 0x2fe   :  { %3423 = vrot.lane.b32.xlu1 %v3422_v42, %s3790_s0  ;;  %3503 = vrot.lane.b32.xlu0 %v3502_v24, %s3790_s0 }
 0x302   :  { %1659 = vperm.xlu1 %3246, %v1655_v22   ;;  %3508 = vrot.lane.b32.xlu0 %v3507_v3, %s3791_s11 }
 0x306   :  { %3513 = vrot.lane.b32.xlu0 %v3512_v15, %s3791_s11 }
 0x308   :  { %v4498_v1 = vpop.permute.xlu1 %3248 }
 0x30a   :  { %1664 = vperm.xlu0 %3245, %v1656_v48  }
 0x30c   :  { %v3254_v51 = vpop.permute.xlu1 %3253 }
 0x30d   :  { %v3256_v8 = vunpack.i.h.bf16 %v3254_v51  ;;  %v3255_v58 = vunpack.i.l.bf16 %v3254_v51 }
 0x30f   :  { %v1004_v51 = vsel %vm207_vm7, %v3255_v58, %v3256_v8 }
 0x310   :  { %v4500_v52 = vpop.permute.xlu0 %3348  ;;  %v4502_v0 = vpop.permute.xlu1 %3258 }
 0x311   :  { %v3350_v8 = vunpack.i.l.bf16 %v4500_v52 }
 0x314   :  { %v3354_v35 = vpop.permute.xlu0 %3353  ;;  %v4504_v38 = vpop.permute.xlu1 %3263 }
 0x315   :  { %v3356_v4 = vunpack.i.h.bf16 %v3354_v35  ;;  %v3355_v56 = vunpack.i.l.bf16 %v3354_v35 }
 0x318   :  { %v3359_v7 = vpop.permute.xlu0 %3358  ;;  %v4506_v47 = vpop.permute.xlu1 %3268 }
 0x31c   :  { %v4508_v41 = vpop.permute.xlu0 %3378  ;;  %v4510_v59 = vpop.permute.xlu1 %3273 }
 0x320   :  { %v4512_v18 = vpop.permute.xlu0 %3383  ;;  %v4514_v25 = vpop.permute.xlu1 %3278 }
 0x321   :  { %v3281_v5 = vunpack.i.h.bf16 %v4514_v25  ;;  %v5467_v63 = vunpack.i.l.bf16 %v4514_v25  ;;  %v5530_v12 = vunpack.i.l.bf16 %v4514_v25 }
 0x323   :  { %v890_v55 = vsel %vm138_vm3, %v5467_v63, %v3281_v5 }
 0x324   :  { %v4516_v20 = vpop.permute.xlu0 %3388  ;;  %v3284_v60 = vpop.permute.xlu1 %3283 }
 0x325   :  { %v3286_v15 = vunpack.i.h.bf16 %v3284_v60  ;;  %v3285_v48 = vunpack.i.l.bf16 %v3284_v60 }
 0x327   :  { %v932_v17 = vsel %vm169_vm2, %v3285_v48, %v3286_v15 }
 0x328   :  { %v4518_v40 = vpop.permute.xlu0 %3408  ;;  %v4520_v11 = vpop.permute.xlu1 %3288 }
 0x32c   :  { %v4522_v6 = vpop.permute.xlu0 %3413  ;;  %v4524_v42 = vpop.permute.xlu1 %3293 }
 0x330   :  { %v4526_v24 = vpop.permute.xlu0 %3418  ;;  %v4528_v46 = vpop.permute.xlu1 %3298 }
 0x334   :  { %v4532_v22 = vpop.permute.xlu0 %3428  ;;  %v4534_v3 = vpop.permute.xlu1 %3303 }
 0x335   :  { %v3431_v28 = vunpack.i.h.bf16 %v4532_v22  ;;  %v5470_v14 = vunpack.i.l.bf16 %v4532_v22  ;;  %v5529_v10 = vunpack.i.l.bf16 %v4532_v22 }
 0x337   :  { %v892_v23 = vsel %vm138_vm3, %v5470_v14, %v3431_v28  ;;  %v3361_v28 = vunpack.i.h.bf16 %v3359_v7  ;;  %v3360_v14 = vunpack.i.l.bf16 %v3359_v7 }
 0x338   :  { %v3434_v44 = vpop.permute.xlu0 %3433  ;;  %v4544_v39 = vpop.permute.xlu1 %3308  ;;  %v2940_v34 = vpack.c.bf16 %v892_v23, %v890_v55 }
 0x339   :  { %v3436_v50 = vunpack.i.h.bf16 %v3434_v44  ;;  %v3435_v37 = vunpack.i.l.bf16 %v3434_v44  ;;  %v1006_v44 = vsel %vm207_vm7, %v3355_v56, %v3356_v4  ;;  %v1005_v7 = vsel %vm207_vm7, %v3361_v28, %v3355_v56 }
 0x33a   :  { %2941 = vmatprep.subr.bf16.mxu0 %v2940_v34  ;;  %v2980_v15 = vpack.c.bf16 %v1006_v44, %v1004_v51  ;;  %v3300_v4 = vunpack.i.l.bf16 %v4528_v46 }
 0x33b   :  { %v934_v60 = vsel %vm169_vm2, %v3435_v37, %v3436_v50 }
 0x33c   :  { %v3439_v5 = vpop.permute.xlu0 %3438  ;;  %v4548_v63 = vpop.permute.xlu1 %3313  ;;  %v2976_v49 = vpack.c.bf16 %v934_v60, %v932_v17  ;;  %v1003_v17 = vsel %vm207_vm7, %v3360_v14, %v3255_v58  ;;  %v3251_v14 = vunpack.i.h.bf16 %v4498_v1 }
 0x33d   :  { %v3441_v9 = vunpack.i.h.bf16 %v3439_v5  ;;  %v3440_v61 = vunpack.i.l.bf16 %v3439_v5  ;;  %v3351_v5 = vunpack.i.h.bf16 %v4500_v52  ;;  %v3266_v52 = vunpack.i.h.bf16 %v4504_v38 }
 0x33e   :  { %2977 = vmatprep.subr.bf16.mxu1 %v2976_v49  ;;  %v3301_v49 = vunpack.i.h.bf16 %v4528_v46  ;;  %v3250_v46 = vunpack.i.l.bf16 %v4498_v1 }
 0x33f   :  { %v931_v23 = vsel %vm169_vm2, %v3440_v61, %v3285_v48  ;;  %v933_v34 = vsel %vm169_vm2, %v3441_v9, %v3435_v37  ;;  %v2982_v9 = vpack.c.bf16 %v1005_v7, %v1003_v17  ;;  %v3265_v7 = vunpack.i.l.bf16 %v4504_v38 }
 0x340   :  { %v2978_v55 = vpack.c.bf16 %v933_v34, %v931_v23  ;;  %v4553_v35 = vpop.permute.xlu0 %3443  ;;  %v4555_v50 = vpop.permute.xlu1 %3318  ;;  %v1088_v56 = vsel %vm271_vm0, %v3300_v4, %v3301_v49  ;;  %v3261_v34 = vunpack.i.h.bf16 %v4502_v0  ;;  %v5527_v38 = vunpack.i.l.bf16 %v4502_v0 }
 0x342   :  { %2979 = vmatpush1.bf16.msra.mxu1 %v2978_v55 }
 0x343   :  { %2981 = vmatprep.subr.bf16.mxu1 %v2980_v15  ;;  %v970_v15 = vsel %vm5525_vm8, %v3350_v8, %v3351_v5  ;;  %v4589_v5 = vsel %vm103_vm5, %v5527_v38, %v3261_v34  ;;  %v3445_v34 = vunpack.i.l.bf16 %v4553_v35 }
 0x344   :  { %v3449_v61 = vpop.permute.xlu0 %3448  ;;  %v4562_v37 = vpop.permute.xlu1 %3323 }
 0x345   :  { %v3451_v48 = vunpack.i.h.bf16 %v3449_v61  ;;  %v3450_v60 = vunpack.i.l.bf16 %v3449_v61  ;;  %v3386_v61 = vunpack.i.h.bf16 %v4512_v18 }
 0x346   :  { %2983 = vmatpush1.bf16.msra.mxu1 %v2982_v9  ;;  %v3385_v9 = vunpack.i.l.bf16 %v4512_v18  ;;  %v4595_v18 = vsel %vm85_vm6, %v3265_v7, %v3266_v52 }
 0x347   :  { %v1090_v58 = vsel %vm271_vm0, %v3450_v60, %v3451_v48 }
 0x348   :  { %v3454_v28 = vpop.permute.xlu0 %3453  ;;  %v4570_v44 = vpop.permute.xlu1 %3328  ;;  %v2984_v23 = vpack.c.bf16 %v1090_v58, %v1088_v56 }
 0x349   :  { %v3456_v51 = vunpack.i.h.bf16 %v3454_v28  ;;  %v3455_v17 = vunpack.i.l.bf16 %v3454_v28  ;;  %v968_v28 = vsel %vm5526_vm10, %v3250_v46, %v3251_v14  ;;  %v3381_v14 = vunpack.i.h.bf16 %v4508_v41 }
 0x34a   :  { %2985 = vmatprep.subr.bf16.mxu1 %v2984_v23  ;;  %v2944_v55 = vpack.c.bf16 %v970_v15, %v968_v28  ;;  %v3290_v23 = vunpack.i.l.bf16 %v4520_v11  ;;  %v3310_v15 = vunpack.i.l.bf16 %v4544_v39  ;;  %vm5534_vm10 = vcmask 777216  }
 0x34b   :  { %v1087_v49 = vsel %vm271_vm0, %v3455_v17, %v3300_v4  ;;  %v1089_v1 = vsel %vm271_vm0, %v3456_v51, %v3450_v60  ;;  %v3291_v60 = vunpack.i.h.bf16 %v4520_v11  ;;  %v3311_v17 = vunpack.i.h.bf16 %v4544_v39 }
 0x34c   :  { %v2986_v48 = vpack.c.bf16 %v1089_v1, %v1087_v49  ;;  %v4581_v56 = vpop.permute.xlu0 %3458  ;;  %v4583_v58 = vpop.permute.xlu1 %3333  ;;  %v3391_v49 = vunpack.i.h.bf16 %v4516_v20  ;;  %v3390_v1 = vunpack.i.l.bf16 %v4516_v20  ;;  %v967_v36 = vsel %vm5525_vm8, %v3290_v23, %v3250_v46 }
 0x34d   :  { %v969_v43 = vsel %vm5528_vm9, %v3291_v60, %v3350_v8  ;;  %v3446_v39 = vunpack.i.h.bf16 %v4553_v35  ;;  %v3296_v8 = vunpack.i.h.bf16 %v4524_v42  ;;  %v3295_v46 = vunpack.i.l.bf16 %v4524_v42  ;;  %vm5535_vm9 = vmmov %vm5534_vm10 }
 0x34e   :  { %2987 = vmatpush1.bf16.msra.mxu1 %v2986_v48  ;;  %v1246_v48 = vsel %vm85_vm6, %v3385_v9, %v3386_v61  ;;  %v3461_v22 = vunpack.i.h.bf16 %v4581_v56  ;;  %v5531_v42 = vunpack.i.l.bf16 %v4508_v41  ;;  %vm5538_vm8 = vcmask 662528  }
 0x350   :  { %v3464_v28 = vpop.permute.xlu0 %3463  ;;  %v3339_v11 = vpop.permute.xlu1 %3338 }
 0x351   :  { %v3466_v52 = vunpack.i.h.bf16 %v3464_v28  ;;  %v3465_v38 = vunpack.i.l.bf16 %v3464_v28  ;;  %v3341_v4 = vunpack.i.h.bf16 %v3339_v11  ;;  %v3340_v51 = vunpack.i.l.bf16 %v3339_v11 }
 0x352   :  { %v1172_v28 = vsel %vm333_vm14, %v3310_v15, %v3311_v17  ;;  %v1048_v17 = vsel %vm240_vm1, %v3445_v34, %v3446_v39  ;;  %v1046_v39 = vsel %vm240_vm1, %v3295_v46, %v3296_v8 }
 0x353   :  { %v891_v20 = vsel %vm138_vm3, %v3341_v4, %v5529_v10  ;;  %v889_v61 = vsel %vm138_vm3, %v3340_v51, %v5530_v12  ;;  %v1174_v11 = vsel %vm333_vm14, %v3465_v38, %v3466_v52  ;;  %v3460_v10 = vunpack.i.l.bf16 %v4581_v56 }
 0x354   :  { %v2942_v60 = vpack.c.bf16 %v891_v20, %v889_v61  ;;  %v3469_v23 = vpop.permute.xlu0 %3468  ;;  %v4619_v26 = vpop.permute.xlu1 %3343  ;;  %v2988_v35 = vpack.c.bf16 %v1174_v11, %v1172_v28  ;;  %v3306_v12 = vunpack.i.h.bf16 %v4534_v3  ;;  %v3305_v51 = vunpack.i.l.bf16 %v4534_v3 }
 0x355   :  { %v3471_v25 = vunpack.i.h.bf16 %v3469_v23  ;;  %v3470_v4 = vunpack.i.l.bf16 %v3469_v23  ;;  %v4629_v52 = vsel %vm103_vm5, %v5531_v42, %v3381_v14  ;;  %v1243_v20 = vsel %vm85_vm6, %v3390_v1, %v3265_v7 }
 0x356   :  { %2943 = vmatpush1.bf16.msra.mxu0 %v2942_v60  ;;  %2989 = vmatprep.subr.bf16.mxu1 %v2988_v35  ;;  %v1245_v61 = vsel %vm85_vm6, %v3391_v49, %v3385_v9  ;;  %v2946_v23 = vpack.c.bf16 %v969_v43, %v967_v36  ;;  %v2992_v35 = vpack.c.bf16 %v1246_v48, %v4595_v18  ;;  %v3316_v9 = vunpack.i.h.bf16 %v4548_v63 }
 0x357   :  { %v1171_v56 = vsel %vm333_vm14, %v3470_v4, %v3310_v15  ;;  %v1173_v28 = vsel %vm333_vm14, %v3471_v25, %v3465_v38  ;;  %2945 = vmatprep.subr.bf16.mxu0 %v2944_v55  ;;  %v2948_v54 = vpack.c.bf16 %v1048_v17, %v1046_v39  ;;  %v1132_v7 = vsel %vm302_vm15, %v3460_v10, %v3461_v22 }
 0x358   :  { %v2990_v11 = vpack.c.bf16 %v1173_v28, %v1171_v56  ;;  %v4635_v3 = vpop.permute.xlu0 %3473  ;;  %v3364_v60 = vpop.permute.xlu1 %3363  ;;  %v3315_v15 = vunpack.i.l.bf16 %v4548_v63  ;;  %v2994_v55 = vpack.c.bf16 %v1245_v61, %v1243_v20  ;;  %v1130_v49 = vsel %vm302_vm15, %v3305_v51, %v3306_v12 }
 0x359   :  { %v3366_v14 = vunpack.i.h.bf16 %v3364_v60  ;;  %v3365_v42 = vunpack.i.l.bf16 %v3364_v60  ;;  %v3326_v36 = vunpack.i.h.bf16 %v4562_v37  ;;  %v3325_v43 = vunpack.i.l.bf16 %v4562_v37 }
 0x35a   :  { %2947 = vmatpush1.bf16.msra.mxu0 %v2946_v23  ;;  %2991 = vmatpush1.bf16.msra.mxu1 %v2990_v11  ;;  %v3476_v48 = vunpack.i.h.bf16 %v4635_v3  ;;  %v3475_v38 = vunpack.i.l.bf16 %v4635_v3  ;;  %v2952_v25 = vpack.c.bf16 %v1132_v7, %v1130_v49  ;;  %v3411_v37 = vunpack.i.h.bf16 %v4518_v40 }
 0x35b   :  { %v1047_v18 = vsel %vm240_vm1, %v3366_v14, %v3445_v34  ;;  %v1045_v1 = vsel %vm240_vm1, %v3365_v42, %v3295_v46  ;;  %2949 = vmatprep.subr.bf16.mxu0 %v2948_v54  ;;  %2993 = vmatprep.subr.bf16.mxu1 %v2992_v35  ;;  %v3321_v34 = vunpack.i.h.bf16 %v4555_v50  ;;  %v3320_v46 = vunpack.i.l.bf16 %v4555_v50 }
 0x35c   :  { %v2950_v63 = vpack.c.bf16 %v1047_v18, %v1045_v1  ;;  %v3479_v8 = vpop.permute.xlu0 %3478  ;;  %v3369_v22 = vpop.permute.xlu1 %3368  ;;  %v2956_v54 = vpack.c.bf16 %v4629_v52, %v4589_v5  ;;  %v1328_v28 = vsel %vm5484_vm13, %v3325_v43, %v3326_v36  ;;  %v3410_v3 = vunpack.i.l.bf16 %v4518_v40 }
 0x35d   :  { %v3481_v4 = vunpack.i.h.bf16 %v3479_v8  ;;  %v3480_v12 = vunpack.i.l.bf16 %v3479_v8  ;;  %v3371_v17 = vunpack.i.h.bf16 %v3369_v22  ;;  %v3370_v20 = vunpack.i.l.bf16 %v3369_v22 }
 0x35e   :  { %2951 = vmatpush1.bf16.msra.mxu0 %v2950_v63  ;;  %2995 = vmatpush1.bf16.msra.mxu1 %v2994_v55  ;;  %v5532_v60 = vunpack.i.l.bf16 %v4508_v41  ;;  %v1288_v42 = vsel %vm5534_vm10, %v3475_v38, %v3476_v48  ;;  %v3331_v7 = vunpack.i.h.bf16 %v4570_v44  ;;  %v3330_v55 = vunpack.i.l.bf16 %v4570_v44  ;;  %vm5539_vm10 = vmmov %vm5535_vm9 }
 0x35f   :  { %v1131_v61 = vsel %vm302_vm15, %v3371_v17, %v3460_v10  ;;  %v1129_v56 = vsel %vm302_vm15, %v3370_v20, %v3305_v51  ;;  %2953 = vmatprep.subr.bf16.mxu0 %v2952_v25  ;;  %v1330_v11 = vsel %vm5484_vm13, %v3480_v12, %v3481_v4  ;;  %v5533_v10 = vunpack.i.l.bf16 %v4502_v0 }
 0x360   :  { %v1209_v50 = vsel %vm103_vm5, %v3316_v9, %v5532_v60  ;;  %v2954_v23 = vpack.c.bf16 %v1131_v61, %v1129_v56  ;;  %v3484_v39 = vpop.permute.xlu0 %3483  ;;  %v4662_v35 = vpop.permute.xlu1 %3373  ;;  %v2996_v5 = vpack.c.bf16 %v1330_v11, %v1328_v28  ;;  %v1286_v49 = vsel %vm5535_vm9, %v3320_v46, %v3321_v34 }
 0x361   :  { %v1207_v51 = vsel %vm103_vm5, %v3315_v15, %v5533_v10  ;;  %v3486_v52 = vunpack.i.h.bf16 %v3484_v39  ;;  %v3485_v14 = vunpack.i.l.bf16 %v3484_v39  ;;  %v5536_v0 = vunpack.i.h.bf16 %v4506_v47 }
 0x362   :  { %2955 = vmatpush1.bf16.msra.mxu0 %v2954_v23  ;;  %2997 = vmatprep.subr.bf16.mxu1 %v2996_v5  ;;  %v5537_v15 = vunpack.i.l.bf16 %v4506_v47  ;;  %v2958_v18 = vpack.c.bf16 %v1209_v50, %v1207_v51  ;;  %v2960_v44 = vpack.c.bf16 %v1288_v42, %v1286_v49  ;;  %v3415_v17 = vunpack.i.l.bf16 %v4522_v6 }
 0x363   :  { %v1327_v41 = vsel %vm5484_vm13, %v3485_v14, %v3325_v43  ;;  %v1329_v9 = vsel %vm5484_vm13, %v3486_v52, %v3480_v12  ;;  %2957 = vmatprep.subr.bf16.mxu0 %v2956_v54  ;;  %v1450_v43 = vsel %vm504_vm4, %v3410_v3, %v3411_v37  ;;  %v3416_v12 = vunpack.i.h.bf16 %v4522_v6  ;;  %vm5540_vm13 = vmmov %vm5538_vm8 }
 0x364   :  { %v1448_v36 = vsel %vm504_vm4, %v5537_v15, %v5536_v0  ;;  %v2998_v1 = vpack.c.bf16 %v1329_v9, %v1327_v41  ;;  %v3489_v48 = vpop.permute.xlu0 %3488  ;;  %v3394_v63 = vpop.permute.xlu1 %3393  ;;  %v3336_v20 = vunpack.i.h.bf16 %v4583_v58  ;;  %v1370_v34 = vsel %vm5538_vm8, %v3330_v55, %v3331_v7 }
 0x365   :  { %v3491_v8 = vunpack.i.h.bf16 %v3489_v48  ;;  %v3490_v22 = vunpack.i.l.bf16 %v3489_v48  ;;  %v3396_v25 = vunpack.i.h.bf16 %v3394_v63  ;;  %v3395_v4 = vunpack.i.l.bf16 %v3394_v63 }
 0x366   :  { %2959 = vmatpush1.bf16.msra.mxu0 %v2958_v18  ;;  %2999 = vmatpush1.bf16.msra.mxu1 %v2998_v1  ;;  %v3335_v54 = vunpack.i.l.bf16 %v4583_v58  ;;  %v3346_v28 = vunpack.i.h.bf16 %v4619_v26  ;;  %v3345_v11 = vunpack.i.l.bf16 %v4619_v26  ;;  %v3276_v58 = vunpack.i.h.bf16 %v4510_v59 }
 0x367   :  { %v1287_v61 = vsel %vm5539_vm10, %v3396_v25, %v3475_v38  ;;  %v1285_v37 = vsel %vm5535_vm9, %v3395_v4, %v3320_v46  ;;  %2961 = vmatprep.subr.bf16.mxu0 %v2960_v44  ;;  %v1372_v56 = vsel %vm5540_vm13, %v3490_v22, %v3491_v8  ;;  %v3275_v38 = vunpack.i.l.bf16 %v4510_v59  ;;  %vm5541_vm13 = vmmov %vm5538_vm8 }
 0x368   :  { %v2962_v6 = vpack.c.bf16 %v1287_v61, %v1285_v37  ;;  %v3494_v60 = vpop.permute.xlu0 %3493  ;;  %v3399_v50 = vpop.permute.xlu1 %3398  ;;  %v2964_v23 = vpack.c.bf16 %v1372_v56, %v1370_v34  ;;  %v2968_v46 = vpack.c.bf16 %v1450_v43, %v1448_v36  ;;  %v1486_v52 = vsel %vm523_vm11, %v3415_v17, %v3416_v12 }
 0x369   :  { %v3496_v39 = vunpack.i.h.bf16 %v3494_v60  ;;  %v3495_v5 = vunpack.i.l.bf16 %v3494_v60  ;;  %v3401_v10 = vunpack.i.h.bf16 %v3399_v50  ;;  %v3400_v51 = vunpack.i.l.bf16 %v3399_v50 }
 0x36a   :  { %2963 = vmatpush1.bf16.msra.mxu0 %v2962_v6  ;;  %v1412_v42 = vsel %vm223_vm12, %v3335_v54, %v3336_v20  ;;  %v3421_v41 = vunpack.i.h.bf16 %v4526_v24  ;;  %v3420_v9 = vunpack.i.l.bf16 %v4526_v24  ;;  %v1449_v36 = vsel %vm504_vm4, %v3346_v28, %v3410_v3 }
 0x36b   :  { %v1371_v14 = vsel %vm5541_vm13, %v3401_v10, %v3490_v22  ;;  %v1369_v26 = vsel %vm5538_vm8, %v3400_v51, %v3330_v55  ;;  %2965 = vmatprep.subr.bf16.mxu0 %v2964_v23  ;;  %v1414_v7 = vsel %vm223_vm12, %v3495_v5, %v3496_v39  ;;  %v5542_v18 = vunpack.i.l.bf16 %v4506_v47  ;;  %v1579_v10 = vld [vmem:[%s5414_s3] sm:$0xff] }
 0x36c   :  { %v2966_v49 = vpack.c.bf16 %v1371_v14, %v1369_v26  ;;  %v3499_v0 = vpop.permute.xlu0 %3498  ;;  %v3404_v59 = vpop.permute.xlu1 %3403  ;;  %v3000_v15 = vpack.c.bf16 %v1414_v7, %v1412_v42  ;;  %v3376_v63 = vunpack.i.h.bf16 %v4662_v35  ;;  %v3375_v44 = vunpack.i.l.bf16 %v4662_v35 }
 0x36d   :  { %v1447_v55 = vsel %vm504_vm4, %v3345_v11, %v5542_v18  ;;  %v3501_v1 = vunpack.i.h.bf16 %v3499_v0  ;;  %v3500_v48 = vunpack.i.l.bf16 %v3499_v0  ;;  %v1484_v24 = vsel %vm523_vm11, %v3275_v38, %v3276_v58 }
 0x36e   :  { %2967 = vmatpush1.bf16.msra.mxu0 %v2966_v49  ;;  %3001 = vmatprep.subr.bf16.mxu1 %v3000_v15  ;;  %v3004_v3 = vpack.c.bf16 %v1486_v52, %v1484_v24  ;;  %v1483_v47 = vsel %vm523_vm11, %v3420_v9, %v3275_v38  ;;  %v1485_v8 = vsel %vm523_vm11, %v3421_v41, %v3415_v17  ;;  %v3406_v37 = vunpack.i.h.bf16 %v3404_v59  ;;  %v1582_v52 = vld [vmem:[%s5414_s3 + $0x18] sm:$0xff]  ;;  %v1581_v41 = vld [vmem:[%s5414_s3 + $0x10] sm:$0xff] }
 0x36f   :  { %v1411_v43 = vsel %vm223_vm12, %v3500_v48, %v3335_v54  ;;  %v1413_v40 = vsel %vm223_vm12, %v3501_v1, %v3495_v5  ;;  %2969 = vmatprep.subr.bf16.mxu0 %v2968_v46  ;;  %v2970_v22 = vpack.c.bf16 %v1449_v36, %v1447_v55  ;;  %vm5543_vm10 = vcmask 646144  }
 0x370   :  { %v3002_v25 = vpack.c.bf16 %v1413_v40, %v1411_v43  ;;  %v3504_v4 = vpop.permute.xlu0 %3503  ;;  %v3424_v12 = vpop.permute.xlu1 %3423  ;;  %v1526_v54 = vsel %vm5543_vm10, %v3375_v44, %v3376_v63  ;;  %v3405_v56 = vunpack.i.l.bf16 %v3404_v59  ;;  %vm5544_vm9 = vmmov %vm5543_vm10  ;;  %v3006_v23 = vpack.c.bf16 %v1485_v8, %v1483_v47 }
 0x371   :  { %v3506_v20 = vunpack.i.h.bf16 %v3504_v4  ;;  %v3505_v35 = vunpack.i.l.bf16 %v3504_v4  ;;  %v3426_v34 = vunpack.i.h.bf16 %v3424_v12  ;;  %v3425_v61 = vunpack.i.l.bf16 %v3424_v12  ;;  %vm5545_vm13 = vmmov %vm5544_vm9 }
 0x372   :  { %2971 = vmatpush1.bf16.msra.mxu0 %v2970_v22  ;;  %3003 = vmatpush1.bf16.msra.mxu1 %v3002_v25  ;;  %vm5546_vm8 = vmmov %vm5544_vm9  ;;  %vm5547_vm10 = vcmask 121856  }
 0x373   :  { %v1527_v28 = vsel %vm5544_vm9, %v3426_v34, %v3505_v35  ;;  %v1525_v11 = vsel %vm5545_vm13, %v3425_v61, %v3375_v44  ;;  %3005 = vmatprep.subr.bf16.mxu1 %v3004_v3  ;;  %v1528_v17 = vsel %vm5546_vm8, %v3505_v35, %v3506_v20  ;;  %v1568_v51 = vsel %vm5547_vm10, %v3405_v56, %v3406_v37  ;;  %vm5548_vm9 = vmmov %vm5547_vm10 }
 0x374   :  { %v2974_v6 = vpack.c.bf16 %v1527_v28, %v1525_v11  ;;  %v3509_v60 = vpop.permute.xlu0 %3508  ;;  %v2972_v50 = vpack.c.bf16 %v1528_v17, %v1526_v54  ;;  %vm5549_vm13 = vmmov %vm5548_vm9  ;;  %v12_v54 = vstv %s5415_s6  ;;  %vm5551_vm10 = vcmask 1047808  }
 0x375   :  { %v3511_v39 = vunpack.i.h.bf16 %v3509_v60  ;;  %v3510_v5 = vunpack.i.l.bf16 %v3509_v60  ;;  %vm5550_vm8 = vmmov %vm5548_vm9  ;;  %13 = vst [vmem:[#allocation4] sm:$0x1] %v12_v54 }
 0x376   :  { %2973 = vmatprep.subr.bf16.mxu0 %v2972_v50  ;;  %3007 = vmatpush1.bf16.msra.mxu1 %v3006_v23 }
 0x377   :  { %2975 = vmatpush1.bf16.msra.mxu0 %v2974_v6  ;;  %v1570_v58 = vsel %vm5548_vm9, %v3510_v5, %v3511_v39  ;;  %vm5552_vm9 = vcmask 1048320  }
 0x378   :  { %v3514_v38 = vpop.permute.xlu0 %3513  ;;  %v3008_v46 = vpack.c.bf16 %v1570_v58, %v1568_v51 }
 0x379   :  { %v3516_v14 = vunpack.i.h.bf16 %v3514_v38  ;;  %v3515_v26 = vunpack.i.l.bf16 %v3514_v38 }
 0x37a   :  { %1738 = vmatmul.mubr.f32.vlgmr.msra.gmra.mrb[4].mxu0 %v1579_v10  ;;  %3009 = vmatprep.subr.bf16.mxu1 %v3008_v46 }
 0x37b   :  { %v1567_v42 = vsel %vm5549_vm13, %v3515_v26, %v3405_v56  ;;  %v1569_v7 = vsel %vm5550_vm8, %v3516_v14, %v3510_v5  ;;  %2902 = vmatprep.mubr.msk.f32.mxu0 %vm523_vm11, %v1582_v52  ;;  %vm5553_vm13 = vmmov %vm5551_vm10 }
 0x37c   :  { %v3010_v9 = vpack.c.bf16 %v1569_v7, %v1567_v42  ;;  %vm5554_vm8 = vmmov %vm5552_vm9 }
 0x37e   :  { %1744 = vmatmul.mubr.f32.gmra.mrb[6].mxu0 %v1581_v41  ;;  %3011 = vmatpush1.bf16.msra.mxu1 %v3010_v9 }
 0x381   :  { %1815 = vmatmul.mubr.f32.vlgmr.msra.gmra.mrb[4].mxu1 %v1579_v10  ;;  %v1660_v49 = vpop.permute.xlu1 %1659 }
 0x382   :  { %2904 = vmatprep.mubr.msk.f32.mxu1 %vm523_vm11, %v1582_v52 }
 0x385   :  { %1821 = vmatmul.mubr.f32.gmra.mrb[6].mxu1 %v1581_v41 }
 0x389   :  { %v1665_v43 = vpop.permute.xlu0 %1664 }
 0x44d   :  { %v1739_v0 = vpop.f32.mrb[4].mxu0 }
 0x44e   :  { %v1740_v59 = vadd.f32 %v1739_v0, %v1660_v49  ;;  %v1741_v15 = vpop.f32.mrb[5].mxu0 }
 0x44f   :  { %v1742_v36 = vadd.f32 %v1741_v15, %v1660_v49 }
 0x450   :  { %v1827_v18 = vmax.f32 %v1740_v59, 0.0 }
 0x451   :  { %v1828_v55 = vmax.f32 %v1742_v36, 0.0  ;;  %v1745_v1 = vpop.f32.mrb[6].mxu0 }
 0x452   :  { %v1747_v48 = vpop.f32.mrb[7].mxu0  ;;  %1839 = vrot.lane.b32.xlu1 %v1827_v18, %s3789_s29  ;;  %v1746_v3 = vadd.f32 %v1745_v1, %v1665_v43 }
 0x453   :  { %1841 = vrot.lane.b32.xlu0 %v1828_v55, %s3789_s29  ;;  %v1748_v8 = vadd.f32 %v1747_v48, %v1665_v43  ;;  %v5568_v55 = vld [vmem:[#allocation20_spill] sm:$0xff] }
 0x454   :  { %v1816_v63 = vpop.f32.mrb[4].mxu1  ;;  %v1831_v12 = vmax.f32 %v1746_v3, 0.0 }
 0x455   :  { %v1817_v44 = vadd.f32 %v1816_v63, %v1660_v49  ;;  %v1818_v24 = vpop.f32.mrb[5].mxu1  ;;  %v1832_v35 = vmax.f32 %v1748_v8, 0.0 }
 0x456   :  { %v1819_v40 = vadd.f32 %v1818_v24, %v1660_v49 }
 0x457   :  { %v1829_v47 = vmax.f32 %v1817_v44, 0.0 }
 0x458   :  { %v1830_v22 = vmax.f32 %v1819_v40, 0.0  ;;  %v1822_v25 = vpop.f32.mrb[6].mxu1 }
 0x459   :  { %v1824_v4 = vpop.f32.mrb[7].mxu1  ;;  %1865 = vrot.lane.b32.xlu1 %v1829_v47, %s3788_s28  ;;  %v1823_v20 = vadd.f32 %v1822_v25, %v1665_v43  ;;  %v5567_v25 = vld [vmem:[#allocation16_spill] sm:$0xff] }
 0x45a   :  { %1867 = vrot.lane.b32.xlu0 %v1830_v22, %s3788_s28  ;;  %v1825_v34 = vadd.f32 %v1824_v4, %v1665_v43 }
 0x45b   :  { %v1833_v61 = vmax.f32 %v1823_v20, 0.0 }
 0x45c   :  { %v1834_v37 = vmax.f32 %v1825_v34, 0.0  ;;  %v5555_v34 = vld [vmem:[#allocation23_spill] sm:$0xff] }
 0x45d   :  { %1843 = vrot.lane.b32.xlu1 %v1831_v12, %s3789_s29 }
 0x45e   :  { %1845 = vrot.lane.b32.xlu0 %v1832_v35, %s3789_s29 }
 0x461   :  { %1869 = vrot.lane.b32.xlu1 %v1833_v61, %s3788_s28 }
 0x462   :  { %1871 = vrot.lane.b32.xlu0 %v1834_v37, %s3788_s28  ;;  %v5556_v37 = vld [vmem:[#allocation9_spill] sm:$0xff] }
 0x4c4   :  { %v1840_v56 = vpop.permute.xlu1 %1839 }
 0x4c5   :  { %1855 = vst.msk [vmem:[#allocation2] sm:$0xff] %vm5551_vm10, %v1840_v56  ;;  %v1842_v28 = vpop.permute.xlu0 %1841  ;;  %vm5596_vm10 = vcmask 916480  }
 0x4c6   :  { %v4745_v11 = vsel %vm85_vm6, %v1840_v56, %v1842_v28  ;;  %1857 = vst.msk [vmem:[#allocation2 + $0x10] sm:$0xff] %vm85_vm6, %v1842_v28  ;;  %v5557_v56 = vld [vmem:[#allocation24_spill] sm:$0xff] }
 0x4c7   :  { %v1894_v49 = vmul.f32 %v4745_v11, %v3994_v62  ;;  %v4815_v36 = vmul.f32 %v4745_v11, %v5517_v31 }
 0x4cb   :  { %v1866_v17 = vpop.permute.xlu1 %1865 }
 0x4cc   :  { %1881 = vst.msk [vmem:[#allocation2 + $0x10] sm:$0xff] %vm5552_vm9, %v1866_v17  ;;  %v1868_v6 = vpop.permute.xlu0 %1867  ;;  %v4809_v15 = vld [vmem:[#allocation2] sm:$0xff]  ;;  %vm5597_vm9 = vmmov %vm5596_vm10 }
 0x4cd   :  { %v4750_v60 = vsel %vm103_vm5, %v1866_v17, %v1868_v6  ;;  %1883 = vst.msk [vmem:[#allocation2 + $0x20] sm:$0xff] %vm103_vm5, %v1868_v6 }
 0x4ce   :  { %v4857_v22 = vmul.f32 %v4750_v60, %v5522_v13  ;;  %v2092_v8 = vmul.f32 %v4750_v60, %v5567_v25 }
 0x4cf   :  { %v1844_v50 = vpop.permute.xlu1 %1843 }
 0x4d0   :  { %1858 = vst.msk [vmem:[#allocation2 + $0x28] sm:$0xff] %vm5553_vm13, %v1844_v50  ;;  %v1846_v23 = vpop.permute.xlu0 %1845  ;;  %vm5598_vm13 = vmmov %vm5597_vm9 }
 0x4d1   :  { %v4755_v39 = vsel %vm85_vm6, %v1844_v50, %v1846_v23  ;;  %1860 = vst.msk [vmem:[#allocation2 + $0x38] sm:$0xff] %vm85_vm6, %v1846_v23 }
 0x4d2   :  { %v4800_v0 = vmul.f32 %v4755_v39, %v4056_v30  ;;  %v4819_v18 = vmul.f32 %v4755_v39, %v4074_v45  ;;  %v4871_v12 = vmul.f32 %v4755_v39, %v5517_v31 }
 0x4d3   :  { %v1870_v5 = vpop.permute.xlu1 %1869  ;;  %v4758_v10 = vld [vmem:[#allocation2 + $0x10] sm:$0xff] }
 0x4d4   :  { %1884 = vst.msk [vmem:[#allocation2 + $0x38] sm:$0xff] %vm5554_vm8, %v1870_v5  ;;  %v1872_v51 = vpop.permute.xlu0 %1871  ;;  %v3517_v58 = vpack.i.bf16 %v4758_v10, %v4745_v11  ;;  %v4767_v46 = vld [vmem:[#allocation2 + $0x20] sm:$0xff]  ;;  %v4790_v41 = vmul.f32 %v3977_v57, %v4758_v10  ;;  %v4833_v63 = vmul.f32 %v4094_v2, %v4758_v10  ;;  %v4839_v24 = vmul.f32 %v4044_v21, %v4758_v10  ;;  %vm5599_vm8 = vmmov %vm5597_vm9 }
 0x4d5   :  { %v4764_v38 = vsel %vm103_vm5, %v1870_v5, %v1872_v51  ;;  %1886 = vst.msk [vmem:[#allocation2 + $0x48] sm:$0xff] %vm103_vm5, %v1872_v51  ;;  %v3522_v52 = vpack.i.bf16 %v4767_v46, %v4750_v60  ;;  %v1895_v20 = vmul.f32 %v3972_v53, %v4758_v10  ;;  %v4885_v54 = vmul.f32 %v5556_v37, %v4767_v46 }
 0x4d6   :  { %3518 = vrot.lane.b32.xlu1 %v3517_v58, %s3802_s22  ;;  %v4825_v1 = vmul.f32 %v4764_v38, %v4064_v32  ;;  %v4877_v35 = vmul.f32 %v4764_v38, %v4102_v33  ;;  %v4889_v28 = vmul.f32 %v5557_v56, %v4758_v10  ;;  %v4909_v5 = vmul.f32 %v4764_v38, %v5522_v13  ;;  %v5563_v13 = vld [vmem:[#allocation10_spill] sm:$0xff] }
 0x4d7   :  { %v4849_v3 = vld [vmem:[#allocation2 + $0x28] sm:$0xff]  ;;  %v3547_v23 = vpack.i.bf16 %v1895_v20, %v1894_v49  ;;  %v5564_v20 = vld [vmem:[#allocation18_spill] sm:$0xff] }
 0x4d8   :  { %v4897_v17 = vmul.f32 %v5523_v27, %v4849_v3  ;;  %5558 = vst [vmem:[#allocation27_spill] sm:$0xff] %v4909_v5  ;;  %v4947_v49 = vpack.i.bf16 %v4849_v3, %v4809_v15 }
 0x4da   :  { %3523 = vrot.lane.b32.xlu1 %v3522_v52, %s3803_s23 }
 0x4db   :  { %v4773_v14 = vld [vmem:[#allocation2 + $0x38] sm:$0xff] }
 0x4dc   :  { %v4777_v26 = vpack.i.bf16 %v4773_v14, %v4755_v39  ;;  %v4779_v42 = vld [vmem:[#allocation2 + $0x48] sm:$0xff]  ;;  %v4794_v9 = vmul.f32 %v3977_v57, %v4773_v14  ;;  %v4804_v59 = vmul.f32 %v4032_v16, %v4773_v14  ;;  %v3627_v44 = vpack.i.bf16 %v4773_v14, %v4758_v10 }
 0x4dd   :  { %v4786_v7 = vpack.i.bf16 %v4779_v42, %v4764_v38  ;;  %v4829_v48 = vmul.f32 %v4041_v19, %v4779_v42  ;;  %v4843_v43 = vmul.f32 %v4044_v21, %v4773_v14  ;;  %v4847_v40 = vmul.f32 %v4051_v29, %v4773_v14 }
 0x4de   :  { %3528 = vrot.lane.b32.xlu1 %v3517_v58, %s3788_s28  ;;  %3618 = vrot.lane.b32.xlu0 %v4777_v26, %s3802_s22  ;;  %v4861_v21 = vmul.f32 %v5523_v27, %v4809_v15  ;;  %v4881_v61 = vmul.f32 %v5555_v34, %v4779_v42  ;;  %v4893_v31 = vmul.f32 %v5557_v56, %v4773_v14 }
 0x4df   :  { %v4901_v6 = vmul.f32 %v4094_v2, %v4773_v14  ;;  %v4913_v51 = vmul.f32 %v5556_v37, %v4779_v42  ;;  %v5559_v37 = vld [vmem:[#allocation26_spill] sm:$0xff]  ;;  %v2135_v57 = vmul.f32 %v5568_v55, %v4758_v10 }
 0x4e0   :  { %v4928_v56 = vmul.f32 %v5559_v37, %v4758_v10  ;;  %v5562_v2 = vld [vmem:[#allocation6_spill] sm:$0xff] }
 0x4e1   :  { %v1937_v50 = vmul.f32 %v5562_v2, %v4767_v46 }
 0x4e2   :  { %3533 = vrot.lane.b32.xlu1 %v3522_v52, %s3789_s29  ;;  %3623 = vrot.lane.b32.xlu0 %v4786_v7, %s3803_s23  ;;  %5560 = vst [vmem:[#allocation28_spill] sm:$0xff] %v4928_v56 }
 0x4e6   :  { %3538 = vrot.lane.b32.xlu1 %v3517_v58, %s3804_s24  ;;  %3628 = vrot.lane.b32.xlu0 %v3627_v44, %s3803_s23  ;;  %v1936_v58 = vmul.f32 %v4750_v60, %v5563_v13 }
 0x4e8   :  { %v3552_v4 = vpack.i.bf16 %v1937_v50, %v1936_v58 }
 0x4ea   :  { %3543 = vrot.lane.b32.xlu1 %v3522_v52, %s3805_s25  ;;  %3648 = vrot.lane.b32.xlu0 %v4777_v26, %s3788_s28  ;;  %v4932_v52 = vmul.f32 %v5559_v37, %v4773_v14  ;;  %v2051_v37 = vmul.f32 %v5564_v20, %v4758_v10 }
 0x4ec   :  { %5561 = vst [vmem:[#allocation25_spill] sm:$0xff] %v4932_v52  ;;  %v1940_v52 = vmul.f32 %v5562_v2, %v4779_v42 }
 0x4ee   :  { %3548 = vrot.lane.b32.xlu1 %v3547_v23, %s3800_s20  ;;  %3653 = vrot.lane.b32.xlu0 %v4786_v7, %s3789_s29  ;;  %v5565_v23 = vld [vmem:[#allocation21_spill] sm:$0xff] }
 0x4ef   :  { %v2050_v50 = vmul.f32 %v4745_v11, %v5565_v23 }
 0x4f1   :  { %v3562_v58 = vpack.i.bf16 %v2051_v37, %v2050_v50  ;;  %v5569_v37 = vld [vmem:[#allocation22_spill] sm:$0xff] }
 0x4f2   :  { %3553 = vrot.lane.b32.xlu1 %v3552_v4, %s3801_s21  ;;  %3658 = vrot.lane.b32.xlu0 %v3627_v44, %s3789_s29  ;;  %v5566_v4 = vld [vmem:[#allocation12_spill] sm:$0xff]  ;;  %v2134_v50 = vmul.f32 %v4745_v11, %v5569_v37 }
 0x4f3   :  { %v2093_v27 = vmul.f32 %v5566_v4, %v4767_v46 }
 0x4f5   :  { %v3567_v47 = vpack.i.bf16 %v2093_v27, %v2092_v8  ;;  %v5570_v8 = vld [vmem:[#allocation15_spill] sm:$0xff] }
 0x4f6   :  { %3558 = vrot.lane.b32.xlu1 %v4947_v49, %s3802_s22  ;;  %3678 = vrot.lane.b32.xlu0 %v4777_v26, %s3804_s24  ;;  %v1898_v26 = vmul.f32 %v3972_v53, %v4773_v14  ;;  %v2177_v27 = vmul.f32 %v5570_v8, %v4767_v46  ;;  %v5571_v53 = vld [vmem:[#allocation19_spill] sm:$0xff] }
 0x4fa   :  { %3563 = vrot.lane.b32.xlu1 %v3562_v58, %s3798_s18  ;;  %3683 = vrot.lane.b32.xlu0 %v4786_v7, %s3805_s25  ;;  %v1897_v7 = vmul.f32 %v4755_v39, %v3994_v62  ;;  %v3572_v58 = vpack.i.bf16 %v2135_v57, %v2134_v50  ;;  %v5572_v57 = vld [vmem:[#allocation7_spill] sm:$0xff] }
 0x4fb   :  { %v1935_v2 = vmul.f32 %v5572_v57, %v4758_v10 }
 0x4fc   :  { %v3697_v56 = vpack.i.bf16 %v1898_v26, %v1897_v7  ;;  %v1938_v26 = vmul.f32 %v5572_v57, %v4773_v14  ;;  %v2054_v7 = vmul.f32 %v5564_v20, %v4773_v14  ;;  %v2332_v20 = vmul.f32 %v4750_v60, %v4064_v32 }
 0x4fe   :  { %3568 = vrot.lane.b32.xlu1 %v3567_v47, %s3799_s19  ;;  %3688 = vrot.lane.b32.xlu0 %v3627_v44, %s3805_s25  ;;  %v2176_v44 = vmul.f32 %v4750_v60, %v5571_v53  ;;  %v1939_v47 = vmul.f32 %v4764_v38, %v5563_v13  ;;  %v3707_v50 = vpack.i.bf16 %v1938_v26, %v1935_v2 }
 0x4ff   :  { %v2053_v13 = vmul.f32 %v4755_v39, %v5565_v23  ;;  %v2417_v26 = vmul.f32 %v5555_v34, %v4767_v46  ;;  %v2416_v2 = vmul.f32 %v4750_v60, %v4102_v33  ;;  %v2179_v33 = vmul.f32 %v4764_v38, %v5571_v53 }
 0x500   :  { %v3577_v5 = vpack.i.bf16 %v2177_v27, %v2176_v44  ;;  %v3702_v62 = vpack.i.bf16 %v1940_v52, %v1939_v47  ;;  %v2333_v27 = vmul.f32 %v4041_v19, %v4767_v46  ;;  %v2375_v47 = vmul.f32 %v4051_v29, %v4758_v10  ;;  %v5573_v19 = vld [vmem:[#allocation13_spill] sm:$0xff] }
 0x501   :  { %v2091_v32 = vmul.f32 %v5573_v19, %v4758_v10  ;;  %v2138_v29 = vmul.f32 %v5568_v55, %v4773_v14  ;;  %v2180_v46 = vmul.f32 %v5570_v8, %v4779_v42  ;;  %v5575_v55 = vld [vmem:[#allocation8_spill] sm:$0xff]  ;;  %v5577_v8 = vld [vmem:[#allocation11_spill] sm:$0xff] }
 0x502   :  { %3573 = vrot.lane.b32.xlu1 %v3572_v58, %s3796_s16  ;;  %3698 = vrot.lane.b32.xlu0 %v3697_v56, %s3800_s20  ;;  %v2291_v56 = vmul.f32 %v4032_v16, %v4758_v10  ;;  %v3712_v58 = vpack.i.bf16 %v2054_v7, %v2053_v13  ;;  %v2096_v16 = vmul.f32 %v5566_v4, %v4779_v42 }
 0x503   :  { %v3592_v44 = vpack.i.bf16 %v2333_v27, %v2332_v20  ;;  %v2374_v4 = vmul.f32 %v4745_v11, %v4074_v45  ;;  %v2137_v45 = vmul.f32 %v4755_v39, %v5569_v37  ;;  %v3732_v39 = vpack.i.bf16 %v2180_v46, %v2179_v33 }
 0x504   :  { %v2052_v34 = vmul.f32 %v5575_v55, %v4849_v3  ;;  %v5576_v42 = vpack.i.bf16 %v4794_v9, %v4790_v41  ;;  %v2136_v53 = vmul.f32 %v5577_v8, %v4849_v3  ;;  %v5578_v7 = vpack.i.bf16 %v4804_v59, %v4800_v0  ;;  %v5580_v9 = vld [vmem:[#allocation14_spill] sm:$0xff] }
 0x505   :  { %v3597_v57 = vpack.i.bf16 %v2375_v47, %v2374_v4  ;;  %v3727_v10 = vpack.i.bf16 %v2138_v29, %v2137_v45  ;;  %v5579_v41 = vpack.i.bf16 %v4829_v48, %v4825_v1  ;;  %v2292_v13 = vmul.f32 %v5580_v9, %v4849_v3  ;;  %v5583_v1 = vld [vmem:[#allocation17_spill] sm:$0xff] }
 0x506   :  { %3578 = vrot.lane.b32.xlu1 %v3577_v5, %s3797_s17  ;;  %3703 = vrot.lane.b32.xlu0 %v3702_v62, %s3801_s21  ;;  %v2290_v5 = vmul.f32 %v4745_v11, %v4056_v30  ;;  %v2095_v30 = vmul.f32 %v4764_v38, %v5567_v25  ;;  %v2094_v62 = vmul.f32 %v5573_v19, %v4773_v14 }
 0x507   :  { %v3602_v11 = vpack.i.bf16 %v2417_v26, %v2416_v2  ;;  %v2049_v38 = vmul.f32 %v5575_v55, %v4809_v15  ;;  %v5582_v0 = vpack.i.bf16 %v4843_v43, %v4839_v24  ;;  %v2289_v59 = vmul.f32 %v5580_v9, %v4809_v15 }
 0x508   :  { %v3587_v52 = vpack.i.bf16 %v2291_v56, %v2290_v5  ;;  %v3717_v23 = vpack.i.bf16 %v2096_v16, %v2095_v30  ;;  %v3722_v25 = vpack.i.bf16 %v2094_v62, %v2091_v32  ;;  %v2376_v48 = vmul.f32 %v5583_v1, %v4849_v3 }
 0x509   :  { %v3632_v37 = vpack.i.bf16 %v2052_v34, %v2049_v38  ;;  %v5584_v27 = vpack.i.bf16 %v4847_v40, %v4819_v18  ;;  %v5585_v24 = vpack.i.bf16 %v4881_v61, %v4877_v35  ;;  %v5586_v43 = vpack.i.bf16 %v4885_v54, %v4857_v22  ;;  %v2680_v54 = vld [vmem:[#allocation4] sm:$0x1] }
 0x50a   :  { %3583 = vrot.lane.b32.xlu1 %v4947_v49, %s3788_s28  ;;  %3708 = vrot.lane.b32.xlu0 %v3707_v50, %s3801_s21  ;;  %v5574_v50 = vld [vmem:[#allocation5_spill] sm:$0xff]  ;;  %v5587_v18 = vpack.i.bf16 %v4893_v31, %v4889_v28  ;;  %v5588_v40 = vlaneseq  ;;  %v5589_v35 = vpack.i.bf16 %v4897_v17, %v4861_v21  ;;  %v5590_v22 = vpack.i.bf16 %v4901_v6, %v4871_v12  ;;  %v5591_v31 = vld [vmem:[#allocation27_spill] sm:$0xff]  ;;  %v5594_v17 = vld [vmem:[#allocation28_spill] sm:$0xff] }
 0x50b   :  { %v1896_v56 = vmul.f32 %v5574_v50, %v4849_v3  ;;  %v1893_v14 = vmul.f32 %v5574_v50, %v4809_v15  ;;  %v5107_v3 = vld [vmem:[%s5416_s5] sm:$0x3]  ;;  %v5592_v16 = vpack.i.bf16 %v4913_v51, %v5591_v31  ;;  %v5593_v21 = vld [vmem:[#allocation25_spill] sm:$0xff] }
 0x50c   :  { %v5595_v12 = vpack.i.bf16 %v5593_v21, %v5594_v17 }
 0x50d   :  { %v3607_v60 = vpack.i.bf16 %v1896_v56, %v1893_v14 }
 0x50e   :  { %3588 = vrot.lane.b32.xlu1 %v3587_v52, %s3794_s14  ;;  %3713 = vrot.lane.b32.xlu0 %v3712_v58, %s3798_s18  ;;  %v5581_v52 = vpack.i.bf16 %v4833_v63, %v4815_v36  ;;  %v3662_v58 = vpack.i.bf16 %v2292_v13, %v2289_v59  ;;  %v2373_v36 = vmul.f32 %v5583_v1, %v4809_v15 }
 0x510   :  { %v3667_v63 = vpack.i.bf16 %v2376_v48, %v2373_v36 }
 0x512   :  { %3593 = vrot.lane.b32.xlu1 %v3592_v44, %s3795_s15  ;;  %3718 = vrot.lane.b32.xlu0 %v3717_v23, %s3799_s19 }
 0x516   :  { %3598 = vrot.lane.b32.xlu1 %v3597_v57, %s3792_s12  ;;  %3723 = vrot.lane.b32.xlu0 %v3722_v25, %s3799_s19 }
 0x51a   :  { %3603 = vrot.lane.b32.xlu1 %v3602_v11, %s3793_s13  ;;  %3728 = vrot.lane.b32.xlu0 %v3727_v10, %s3796_s16 }
 0x51e   :  { %3608 = vrot.lane.b32.xlu1 %v3607_v60, %s3800_s20  ;;  %3733 = vrot.lane.b32.xlu0 %v3732_v39, %s3797_s17 }
 0x522   :  { %3613 = vrot.lane.b32.xlu1 %v4947_v49, %s3804_s24  ;;  %3738 = vrot.lane.b32.xlu0 %v5576_v42, %s3797_s17  ;;  %v2133_v49 = vmul.f32 %v5577_v8, %v4809_v15  ;;  %v5102_v15 = vshrl.u32 %v5588_v40, 7 }
 0x524   :  { %v3637_v5 = vpack.i.bf16 %v2136_v53, %v2133_v49  ;;  %v2697_v61 = vsub.s32 1, %v5102_v15 }
 0x526   :  { %3633 = vrot.lane.b32.xlu1 %v3632_v37, %s3798_s18  ;;  %3743 = vrot.lane.b32.xlu0 %v5578_v7, %s3794_s14  ;;  %v2698_v28 = vrot.slane %v5107_v3, %v2697_v61 }
 0x528   :  { %2905 = vmatprep.mubr.msk.f32.mxu0 %vm523_vm11, %v2698_v28  ;;  %2906 = vmatprep.mubr.msk.f32.mxu1 %vm523_vm11, %v2698_v28 }
 0x52a   :  { %3638 = vrot.lane.b32.xlu1 %v3637_v5, %s3796_s16  ;;  %3748 = vrot.lane.b32.xlu0 %v5579_v41, %s3795_s15 }
 0x52e   :  { %3643 = vrot.lane.b32.xlu1 %v5581_v52, %s3790_s0  ;;  %3753 = vrot.lane.b32.xlu0 %v5582_v0, %s3795_s15 }
 0x532   :  { %3663 = vrot.lane.b32.xlu1 %v3662_v58, %s3794_s14  ;;  %3758 = vrot.lane.b32.xlu0 %v5584_v27, %s3792_s12 }
 0x536   :  { %3668 = vrot.lane.b32.xlu1 %v3667_v63, %s3792_s12  ;;  %3763 = vrot.lane.b32.xlu0 %v5585_v24, %s3793_s13 }
 0x53a   :  { %3673 = vrot.lane.b32.xlu1 %v5586_v43, %s3791_s11  ;;  %3768 = vrot.lane.b32.xlu0 %v5587_v18, %s3793_s13 }
 0x53e   :  { %3693 = vrot.lane.b32.xlu1 %v5589_v35, %s3790_s0  ;;  %3773 = vrot.lane.b32.xlu0 %v5590_v22, %s3790_s0 }
 0x542   :  { %2683 = vperm.xlu1 %3246, %v2680_v54   ;;  %3778 = vrot.lane.b32.xlu0 %v5592_v16, %s3791_s11 }
 0x546   :  { %3783 = vrot.lane.b32.xlu0 %v5595_v12, %s3791_s11 }
 0x548   :  { %v3519_v6 = vpop.permute.xlu1 %3518 }
 0x549   :  { %v3521_v30 = vunpack.i.h.bf16 %v3519_v6  ;;  %v3520_v44 = vunpack.i.l.bf16 %v3519_v6 }
 0x54b   :  { %v5134_v62 = vsel %vm5596_vm10, %v3520_v44, %v3521_v30 }
 0x54c   :  { %v5129_v20 = vpop.permute.xlu1 %3523 }
 0x550   :  { %v3619_v23 = vpop.permute.xlu0 %3618  ;;  %v5131_v47 = vpop.permute.xlu1 %3528 }
 0x551   :  { %v3621_v19 = vunpack.i.h.bf16 %v3619_v23  ;;  %v3620_v51 = vunpack.i.l.bf16 %v3619_v23  ;;  %v3531_v2 = vunpack.i.h.bf16 %v5131_v47  ;;  %v3530_v45 = vunpack.i.l.bf16 %v5131_v47 }
 0x553   :  { %v5137_v4 = vsel %vm5597_vm9, %v3620_v51, %v3621_v19  ;;  %v5158_v46 = vsel %vm103_vm5, %v3530_v45, %v3531_v2  ;;  %vm5612_vm9 = vcmask 646144  }
 0x554   :  { %v5139_v32 = vpop.permute.xlu0 %3623  ;;  %v5141_v57 = vpop.permute.xlu1 %3533  ;;  %v3016_v25 = vpack.c.bf16 %v5137_v4, %v5134_v62 }
 0x558   :  { %v5145_v26 = vpop.permute.xlu0 %3628  ;;  %v5147_v29 = vpop.permute.xlu1 %3538 }
 0x559   :  { %v3541_v42 = vunpack.i.h.bf16 %v5147_v29  ;;  %v3540_v38 = vunpack.i.l.bf16 %v5147_v29 }
 0x55b   :  { %v5184_v9 = vsel %vm504_vm4, %v3540_v38, %v3541_v42 }
 0x55c   :  { %v5151_v11 = vpop.permute.xlu0 %3648  ;;  %v3544_v10 = vpop.permute.xlu1 %3543 }
 0x55d   :  { %v3651_v50 = vunpack.i.h.bf16 %v5151_v11  ;;  %v3650_v56 = vunpack.i.l.bf16 %v5151_v11  ;;  %v3546_v41 = vunpack.i.h.bf16 %v3544_v10  ;;  %v3545_v13 = vunpack.i.l.bf16 %v3544_v10 }
 0x55f   :  { %v5163_v14 = vsel %vm103_vm5, %v3650_v56, %v3651_v50  ;;  %v5204_v24 = vsel %vm523_vm11, %v3545_v13, %v3546_v41 }
 0x560   :  { %v5165_v33 = vpop.permute.xlu0 %3653  ;;  %v5167_v60 = vpop.permute.xlu1 %3548  ;;  %v3028_v39 = vpack.c.bf16 %v5163_v14, %v5158_v46 }
 0x561   :  { %v3551_v28 = vunpack.i.h.bf16 %v5167_v60  ;;  %v3550_v31 = vunpack.i.l.bf16 %v5167_v60 }
 0x564   :  { %v5171_v55 = vpop.permute.xlu0 %3658  ;;  %v5173_v34 = vpop.permute.xlu1 %3553 }
 0x565   :  { %v3556_v23 = vunpack.i.h.bf16 %v5173_v34  ;;  %v3555_v19 = vunpack.i.l.bf16 %v5173_v34  ;;  %v3526_v34 = vunpack.i.h.bf16 %v5129_v20 }
 0x567   :  { %v1960_v41 = vsel %vm169_vm2, %v3555_v19, %v3556_v23 }
 0x568   :  { %v5177_v37 = vpop.permute.xlu0 %3678  ;;  %v3559_v8 = vpop.permute.xlu1 %3558 }
 0x569   :  { %v3681_v53 = vunpack.i.h.bf16 %v5177_v37  ;;  %v3680_v7 = vunpack.i.l.bf16 %v5177_v37  ;;  %v3561_v49 = vunpack.i.h.bf16 %v3559_v8  ;;  %v3560_v5 = vunpack.i.l.bf16 %v3559_v8 }
 0x56b   :  { %v5187_v52 = vsel %vm5598_vm13, %v3561_v49, %v3620_v51  ;;  %v5190_v0 = vsel %vm5599_vm8, %v3560_v5, %v3520_v44  ;;  %v5195_v59 = vsel %vm504_vm4, %v3680_v7, %v3681_v53  ;;  %v1918_v51 = vsel %vm138_vm3, %v3550_v31, %v3551_v28  ;;  %vm5614_vm13 = vmmov %vm5612_vm9 }
 0x56c   :  { %v3018_v58 = vpack.c.bf16 %v5187_v52, %v5190_v0  ;;  %v3684_v1 = vpop.permute.xlu0 %3683  ;;  %v5199_v48 = vpop.permute.xlu1 %3563  ;;  %v3040_v27 = vpack.c.bf16 %v5195_v59, %v5184_v9  ;;  %v3626_v49 = vunpack.i.h.bf16 %v5139_v32  ;;  %v3625_v5 = vunpack.i.l.bf16 %v5139_v32  ;;  %vm5615_vm8 = vmmov %vm5612_vm9 }
 0x56d   :  { %v3686_v36 = vunpack.i.h.bf16 %v3684_v1  ;;  %v3685_v63 = vunpack.i.l.bf16 %v3684_v1  ;;  %v3525_v1 = vunpack.i.l.bf16 %v5129_v20 }
 0x56f   :  { %v5207_v43 = vsel %vm523_vm11, %v3685_v63, %v3686_v36  ;;  %v3631_v36 = vunpack.i.h.bf16 %v5145_v26 }
 0x570   :  { %v3689_v18 = vpop.permute.xlu0 %3688  ;;  %v5209_v35 = vpop.permute.xlu1 %3568  ;;  %v3076_v22 = vpack.c.bf16 %v5207_v43, %v5204_v24 }
 0x571   :  { %v3691_v61 = vunpack.i.h.bf16 %v3689_v18  ;;  %v3690_v54 = vunpack.i.l.bf16 %v3689_v18  ;;  %v3571_v47 = vunpack.i.h.bf16 %v5209_v35 }
 0x573   :  { %v5216_v16 = vsel %vm523_vm11, %v3690_v54, %v3545_v13  ;;  %v5219_v21 = vsel %vm523_vm11, %v3691_v61, %v3685_v63  ;;  %v3630_v63 = vunpack.i.l.bf16 %v5145_v26 }
 0x574   :  { %v5223_v12 = vpop.permute.xlu0 %3698  ;;  %v5225_v6 = vpop.permute.xlu1 %3573 }
 0x575   :  { %v3701_v30 = vunpack.i.h.bf16 %v5223_v12  ;;  %v3700_v44 = vunpack.i.l.bf16 %v5223_v12  ;;  %v2031_v11 = vsel %vm207_vm7, %v3630_v63, %v3525_v1 }
 0x577   :  { %v1920_v2 = vsel %vm138_vm3, %v3700_v44, %v3701_v30 }
 0x578   :  { %v3704_v10 = vpop.permute.xlu0 %3703  ;;  %v5237_v50 = vpop.permute.xlu1 %3578  ;;  %v3012_v42 = vpack.c.bf16 %v1920_v2, %v1918_v51  ;;  %v2034_v2 = vsel %vm207_vm7, %v3625_v5, %v3626_v49 }
 0x579   :  { %v3706_v8 = vunpack.i.h.bf16 %v3704_v10  ;;  %v3705_v53 = vunpack.i.l.bf16 %v3704_v10 }
 0x57a   :  { %3013 = vmatprep.subr.bf16.mxu0 %v3012_v42 }
 0x57b   :  { %v1962_v13 = vsel %vm169_vm2, %v3705_v53, %v3706_v8 }
 0x57c   :  { %v3709_v18 = vpop.permute.xlu0 %3708  ;;  %v3584_v61 = vpop.permute.xlu1 %3583  ;;  %v3048_v54 = vpack.c.bf16 %v1962_v13, %v1960_v41 }
 0x57d   :  { %v3711_v28 = vunpack.i.h.bf16 %v3709_v18  ;;  %v3710_v30 = vunpack.i.l.bf16 %v3709_v18  ;;  %v3586_v51 = vunpack.i.h.bf16 %v3584_v61  ;;  %v3585_v32 = vunpack.i.l.bf16 %v3584_v61 }
 0x57e   :  { %3049 = vmatprep.subr.bf16.mxu1 %v3048_v54 }
 0x57f   :  { %v1959_v23 = vsel %vm169_vm2, %v3710_v30, %v3555_v19  ;;  %v1961_v10 = vsel %vm169_vm2, %v3711_v28, %v3705_v53  ;;  %v5253_v20 = vsel %vm103_vm5, %v3586_v51, %v3650_v56  ;;  %v5258_v26 = vsel %vm103_vm5, %v3585_v32, %v3530_v45 }
 0x580   :  { %v3050_v42 = vpack.c.bf16 %v1961_v10, %v1959_v23  ;;  %v3030_v8 = vpack.c.bf16 %v5253_v20, %v5258_v26  ;;  %v5262_v41 = vpop.permute.xlu0 %3713  ;;  %v5264_v49 = vpop.permute.xlu1 %3588  ;;  %v2032_v19 = vsel %vm207_vm7, %v3525_v1, %v3526_v34  ;;  %v2033_v56 = vsel %vm207_vm7, %v3631_v36, %v3625_v5 }
 0x581   :  { %v3052_v53 = vpack.c.bf16 %v2034_v2, %v2032_v19  ;;  %v3570_v45 = vunpack.i.l.bf16 %v5209_v35  ;;  %v3054_v13 = vpack.c.bf16 %v2033_v56, %v2031_v11  ;;  %v3536_v35 = vunpack.i.h.bf16 %v5141_v57 }
 0x582   :  { %3051 = vmatpush1.bf16.msra.mxu1 %v3050_v42  ;;  %v3535_v32 = vunpack.i.l.bf16 %v5141_v57  ;;  %v3656_v10 = vunpack.i.h.bf16 %v5165_v33  ;;  %v3655_v42 = vunpack.i.l.bf16 %v5165_v33  ;;  %v3660_v19 = vunpack.i.l.bf16 %v5171_v55 }
 0x583   :  { %3053 = vmatprep.subr.bf16.mxu1 %v3052_v53  ;;  %v2116_v34 = vsel %vm271_vm0, %v3570_v45, %v3571_v47  ;;  %v3581_v47 = vunpack.i.h.bf16 %v5237_v50  ;;  %v3580_v57 = vunpack.i.l.bf16 %v5237_v50  ;;  %v3716_v50 = vunpack.i.h.bf16 %v5262_v41 }
 0x584   :  { %v3719_v18 = vpop.permute.xlu0 %3718  ;;  %v5271_v61 = vpop.permute.xlu1 %3593  ;;  %v2272_v33 = vsel %vm85_vm6, %v3535_v32, %v3536_v35 }
 0x585   :  { %v3721_v54 = vunpack.i.h.bf16 %v3719_v18  ;;  %v3720_v28 = vunpack.i.l.bf16 %v3719_v18  ;;  %v3596_v4 = vunpack.i.h.bf16 %v5271_v61 }
 0x586   :  { %3055 = vmatpush1.bf16.msra.mxu1 %v3054_v13  ;;  %v5292_v13 = vsel %vm85_vm6, %v3660_v19, %v3535_v32  ;;  %v2200_v32 = vsel %vm333_vm14, %v3580_v57, %v3581_v47  ;;  %v3575_v47 = vunpack.i.l.bf16 %v5225_v6 }
 0x587   :  { %v2118_v1 = vsel %vm271_vm0, %v3720_v28, %v3721_v54 }
 0x588   :  { %v3724_v63 = vpop.permute.xlu0 %3723  ;;  %v5275_v5 = vpop.permute.xlu1 %3598  ;;  %v3056_v36 = vpack.c.bf16 %v2118_v1, %v2116_v34 }
 0x589   :  { %v3726_v30 = vunpack.i.h.bf16 %v3724_v63  ;;  %v3725_v51 = vunpack.i.l.bf16 %v3724_v63 }
 0x58a   :  { %3057 = vmatprep.subr.bf16.mxu1 %v3056_v36 }
 0x58b   :  { %v2115_v2 = vsel %vm271_vm0, %v3725_v51, %v3570_v45  ;;  %v2117_v23 = vsel %vm271_vm0, %v3726_v30, %v3720_v28  ;;  %v3661_v45 = vunpack.i.h.bf16 %v5171_v55  ;;  %v2274_v28 = vsel %vm85_vm6, %v3655_v42, %v3656_v10 }
 0x58c   :  { %v3058_v11 = vpack.c.bf16 %v2117_v23, %v2115_v2  ;;  %v5284_v56 = vpop.permute.xlu0 %3728  ;;  %v5286_v53 = vpop.permute.xlu1 %3603  ;;  %v3566_v30 = vunpack.i.h.bf16 %v5199_v48  ;;  %v3565_v51 = vunpack.i.l.bf16 %v5199_v48  ;;  %v3715_v55 = vunpack.i.l.bf16 %v5262_v41 }
 0x58d   :  { %v3731_v10 = vunpack.i.h.bf16 %v5284_v56  ;;  %v3730_v48 = vunpack.i.l.bf16 %v5284_v56  ;;  %v2273_v60 = vsel %vm85_vm6, %v3661_v45, %v3655_v42  ;;  %vm5602_vm6 = vcmask 777216  }
 0x58e   :  { %3059 = vmatpush1.bf16.msra.mxu1 %v3058_v11  ;;  %v2074_v37 = vsel %vm240_vm1, %v3565_v51, %v3566_v30  ;;  %v3605_v14 = vunpack.i.l.bf16 %v5286_v53  ;;  %vm5607_vm0 = vmmov %vm5602_vm6 }
 0x590   :  { %v3734_v18 = vpop.permute.xlu0 %3733  ;;  %v3609_v54 = vpop.permute.xlu1 %3608 }
 0x591   :  { %v3736_v34 = vunpack.i.h.bf16 %v3734_v18  ;;  %v3735_v1 = vunpack.i.l.bf16 %v3734_v18  ;;  %v3611_v63 = vunpack.i.h.bf16 %v3609_v54  ;;  %v3610_v36 = vunpack.i.l.bf16 %v3609_v54 }
 0x593   :  { %v1919_v2 = vsel %vm138_vm3, %v3611_v63, %v3700_v44  ;;  %v1917_v35 = vsel %vm138_vm3, %v3610_v36, %v3550_v31  ;;  %v2202_v23 = vsel %vm333_vm14, %v3735_v1, %v3736_v34  ;;  %v3576_v31 = vunpack.i.h.bf16 %v5225_v6 }
 0x594   :  { %v3014_v19 = vpack.c.bf16 %v1919_v2, %v1917_v35  ;;  %v3739_v11 = vpop.permute.xlu0 %3738  ;;  %v3614_v18 = vpop.permute.xlu1 %3613  ;;  %v3060_v41 = vpack.c.bf16 %v2202_v23, %v2200_v32  ;;  %v2076_v34 = vsel %vm240_vm1, %v3715_v55, %v3716_v50  ;;  %v3066_v2 = vpack.c.bf16 %v2273_v60, %v5292_v13 }
 0x595   :  { %v3741_v54 = vunpack.i.h.bf16 %v3739_v11  ;;  %v3740_v12 = vunpack.i.l.bf16 %v3739_v11  ;;  %v3616_v17 = vunpack.i.h.bf16 %v3614_v18  ;;  %v3615_v44 = vunpack.i.l.bf16 %v3614_v18 }
 0x596   :  { %3015 = vmatpush1.bf16.msra.mxu0 %v3014_v19  ;;  %3061 = vmatprep.subr.bf16.mxu1 %v3060_v41  ;;  %v3020_v29 = vpack.c.bf16 %v2076_v34, %v2074_v37  ;;  %v2158_v62 = vsel %vm302_vm15, %v3575_v47, %v3576_v31 }
 0x597   :  { %v2199_v56 = vsel %vm333_vm14, %v3740_v12, %v3580_v57  ;;  %v2201_v63 = vsel %vm333_vm14, %v3741_v54, %v3735_v1  ;;  %v5319_v36 = vsel %vm504_vm4, %v3616_v17, %v3680_v7  ;;  %v5324_v42 = vsel %vm504_vm4, %v3615_v44, %v3540_v38  ;;  %3017 = vmatprep.subr.bf16.mxu0 %v3016_v25  ;;  %vm5605_vm14 = vmmov %vm5602_vm6 }
 0x598   :  { %v3062_v6 = vpack.c.bf16 %v2201_v63, %v2199_v56  ;;  %v3042_v57 = vpack.c.bf16 %v5319_v36, %v5324_v42  ;;  %v5331_v45 = vpop.permute.xlu0 %3743  ;;  %v3634_v1 = vpop.permute.xlu1 %3633  ;;  %v3064_v7 = vpack.c.bf16 %v2274_v28, %v2272_v33  ;;  %v2160_v38 = vsel %vm302_vm15, %v3730_v48, %v3731_v10 }
 0x599   :  { %v3636_v17 = vunpack.i.h.bf16 %v3634_v1  ;;  %v3635_v50 = vunpack.i.l.bf16 %v3634_v1  ;;  %v3595_v25 = vunpack.i.l.bf16 %v5271_v61  ;;  %v3746_v30 = vunpack.i.h.bf16 %v5331_v45 }
 0x59a   :  { %3019 = vmatpush1.bf16.msra.mxu0 %v3018_v58  ;;  %3063 = vmatpush1.bf16.msra.mxu1 %v3062_v6  ;;  %v3745_v13 = vunpack.i.l.bf16 %v5331_v45  ;;  %v3024_v58 = vpack.c.bf16 %v2160_v38, %v2158_v62  ;;  %v3591_v61 = vunpack.i.h.bf16 %v5264_v49  ;;  %vm5600_vm4 = vcmask 252928  }
 0x59b   :  { %v2075_v33 = vsel %vm240_vm1, %v3636_v17, %v3715_v55  ;;  %v2073_v28 = vsel %vm240_vm1, %v3635_v50, %v3565_v51  ;;  %3021 = vmatprep.subr.bf16.mxu0 %v3020_v29  ;;  %3065 = vmatprep.subr.bf16.mxu1 %v3064_v7  ;;  %v3590_v55 = vunpack.i.l.bf16 %v5264_v49  ;;  %v2356_v18 = vsel %vm5600_vm4, %v3595_v25, %v3596_v4  ;;  %vm5601_vm5 = vmmov %vm5600_vm4 }
 0x59c   :  { %v3022_v35 = vpack.c.bf16 %v2075_v33, %v2073_v28  ;;  %v3749_v52 = vpop.permute.xlu0 %3748  ;;  %v3639_v0 = vpop.permute.xlu1 %3638  ;;  %v2316_v49 = vsel %vm5602_vm6, %v3745_v13, %v3746_v30  ;;  %v3601_v56 = vunpack.i.h.bf16 %v5275_v5  ;;  %vm5603_vm7 = vmmov %vm5600_vm4  ;;  %v3606_v38 = vunpack.i.h.bf16 %v5286_v53 }
 0x59d   :  { %v3751_v32 = vunpack.i.h.bf16 %v3749_v52  ;;  %v3750_v23 = vunpack.i.l.bf16 %v3749_v52  ;;  %v3641_v10 = vunpack.i.h.bf16 %v3639_v0  ;;  %v3640_v19 = vunpack.i.l.bf16 %v3639_v0  ;;  %vm5604_vm11 = vmmov %vm5600_vm4 }
 0x59e   :  { %3023 = vmatpush1.bf16.msra.mxu0 %v3022_v35  ;;  %3067 = vmatpush1.bf16.msra.mxu1 %v3066_v2  ;;  %v2314_v6 = vsel %vm5605_vm14, %v3590_v55, %v3591_v61  ;;  %vm5608_vm1 = vmmov %vm5607_vm0  ;;  %vm5617_vm4 = vcmask 121856  }
 0x59f   :  { %v2159_v51 = vsel %vm302_vm15, %v3641_v10, %v3730_v48  ;;  %v2157_v11 = vsel %vm302_vm15, %v3640_v19, %v3575_v47  ;;  %3025 = vmatprep.subr.bf16.mxu0 %v3024_v58  ;;  %v2358_v41 = vsel %vm5601_vm5, %v3750_v23, %v3751_v32  ;;  %v3600_v48 = vunpack.i.l.bf16 %v5275_v5  ;;  %vm5618_vm5 = vmmov %vm5617_vm4 }
 0x5a0   :  { %v3026_v54 = vpack.c.bf16 %v2159_v51, %v2157_v11  ;;  %v3754_v12 = vpop.permute.xlu0 %3753  ;;  %v5352_v44 = vpop.permute.xlu1 %3643  ;;  %v3068_v60 = vpack.c.bf16 %v2358_v41, %v2356_v18  ;;  %v3032_v7 = vpack.c.bf16 %v2316_v49, %v2314_v6  ;;  %vm5606_vm15 = vcmask 662528   ;;  %vm5619_vm6 = vmmov %vm5617_vm4 }
 0x5a1   :  { %v3756_v31 = vunpack.i.h.bf16 %v3754_v12  ;;  %v3755_v34 = vunpack.i.l.bf16 %v3754_v12  ;;  %v2398_v46 = vsel %vm5606_vm15, %v3600_v48, %v3601_v56  ;;  %vm5609_vm2 = vmmov %vm5606_vm15  ;;  %v3646_v61 = vunpack.i.h.bf16 %v5352_v44 }
 0x5a2   :  { %3027 = vmatpush1.bf16.msra.mxu0 %v3026_v54  ;;  %3069 = vmatprep.subr.bf16.mxu1 %v3068_v60  ;;  %vm5610_vm3 = vmmov %vm5609_vm2  ;;  %v2688_v56 = vsub.s32 0, %v5102_v15  ;;  %v5616_v6 = vpack.c.bf16 %v5219_v21, %v5216_v16  ;;  %v3807_v16 = vmov 1966171168  }
 0x5a3   :  { %v2355_v47 = vsel %vm5603_vm7, %v3755_v34, %v3595_v25  ;;  %v2357_v63 = vsel %vm5604_vm11, %v3756_v31, %v3750_v23  ;;  %3029 = vmatprep.subr.bf16.mxu0 %v3028_v39  ;;  %vm5611_vm10 = vmmov %vm5609_vm2  ;;  %vm2864_vm11 = vcmp.lt.s32.totalorder %v5588_v40, 256 }
 0x5a4   :  { %v3070_v45 = vpack.c.bf16 %v2357_v63, %v2355_v47  ;;  %v3759_v1 = vpop.permute.xlu0 %3758  ;;  %v3664_v37 = vpop.permute.xlu1 %3663  ;;  %vm5620_vm7 = vmmov %vm5617_vm4 }
 0x5a5   :  { %v3761_v17 = vunpack.i.h.bf16 %v3759_v1  ;;  %v3760_v50 = vunpack.i.l.bf16 %v3759_v1  ;;  %v3666_v29 = vunpack.i.h.bf16 %v3664_v37  ;;  %v3665_v5 = vunpack.i.l.bf16 %v3664_v37 }
 0x5a6   :  { %3031 = vmatpush1.bf16.msra.mxu0 %v3030_v8  ;;  %3071 = vmatpush1.bf16.msra.mxu1 %v3070_v45  ;;  %v2694_v45 = vrot.slane %v5107_v3, %v2688_v56  ;;  %v2848_v3 = vunpack.c.l.s4 %v3807_v16 }
 0x5a7   :  { %v2315_v39 = vsel %vm5607_vm0, %v3666_v29, %v3745_v13  ;;  %v2313_v2 = vsel %vm5608_vm1, %v3665_v5, %v3590_v55  ;;  %3033 = vmatprep.subr.bf16.mxu0 %v3032_v7  ;;  %v2400_v62 = vsel %vm5609_vm2, %v3760_v50, %v3761_v17  ;;  %v2440_v13 = vsel %vm223_vm12, %v3605_v14, %v3606_v38 }
 0x5a8   :  { %v3034_v4 = vpack.c.bf16 %v2315_v39, %v2313_v2  ;;  %v3764_v25 = vpop.permute.xlu0 %3763  ;;  %v3669_v33 = vpop.permute.xlu1 %3668  ;;  %v3036_v28 = vpack.c.bf16 %v2400_v62, %v2398_v46  ;;  %v3645_v55 = vunpack.i.l.bf16 %v5352_v44  ;;  %v2849_v5 = vunpack.c.0.s8 %v2848_v3 }
 0x5a9   :  { %v3766_v30 = vunpack.i.h.bf16 %v3764_v25  ;;  %v3765_v35 = vunpack.i.l.bf16 %v3764_v25  ;;  %v3671_v20 = vunpack.i.h.bf16 %v3669_v33  ;;  %v3670_v26 = vunpack.i.l.bf16 %v3669_v33 }
 0x5aa   :  { %3035 = vmatpush1.bf16.msra.mxu0 %v3034_v4  ;;  %v2554_v44 = vsel %vm5612_vm9, %v3645_v55, %v3646_v61  ;;  %v2852_v62 = vsub.s32 %v2849_v5, %v5102_v15 }
 0x5ab   :  { %v2399_v8 = vsel %vm5610_vm3, %v3671_v20, %v3760_v50  ;;  %v2397_v53 = vsel %vm5611_vm10, %v3670_v26, %v3600_v48  ;;  %3037 = vmatprep.subr.bf16.mxu0 %v3036_v28  ;;  %v2442_v52 = vsel %vm223_vm12, %v3765_v35, %v3766_v30 }
 0x5ac   :  { %v3038_v0 = vpack.c.bf16 %v2399_v8, %v2397_v53  ;;  %v3769_v58 = vpop.permute.xlu0 %3768  ;;  %v3674_v32 = vpop.permute.xlu1 %3673  ;;  %v3072_v23 = vpack.c.bf16 %v2442_v52, %v2440_v13 }
 0x5ad   :  { %v3771_v10 = vunpack.i.h.bf16 %v3769_v58  ;;  %v3770_v19 = vunpack.i.l.bf16 %v3769_v58  ;;  %v3676_v49 = vunpack.i.h.bf16 %v3674_v32  ;;  %v3675_v48 = vunpack.i.l.bf16 %v3674_v32 }
 0x5ae   :  { %3039 = vmatpush1.bf16.msra.mxu0 %v3038_v0  ;;  %3073 = vmatprep.subr.bf16.mxu1 %v3072_v23 }
 0x5af   :  { %v2439_v51 = vsel %vm223_vm12, %v3770_v19, %v3605_v14  ;;  %v2441_v11 = vsel %vm223_vm12, %v3771_v10, %v3765_v35  ;;  %3041 = vmatprep.subr.bf16.mxu0 %v3040_v27  ;;  %vm5613_vm12 = vmmov %vm5612_vm9  ;;  %v2596_v1 = vsel %vm5617_vm4, %v3675_v48, %v3676_v49 }
 0x5b0   :  { %v3074_v18 = vpack.c.bf16 %v2441_v11, %v2439_v51  ;;  %v3774_v41 = vpop.permute.xlu0 %3773  ;;  %v3694_v54 = vpop.permute.xlu1 %3693 }
 0x5b1   :  { %v3776_v12 = vunpack.i.h.bf16 %v3774_v41  ;;  %v3775_v60 = vunpack.i.l.bf16 %v3774_v41  ;;  %v3696_v31 = vunpack.i.h.bf16 %v3694_v54  ;;  %v3695_v34 = vunpack.i.l.bf16 %v3694_v54 }
 0x5b2   :  { %3043 = vmatpush1.bf16.msra.mxu0 %v3042_v57  ;;  %3075 = vmatpush1.bf16.msra.mxu1 %v3074_v18 }
 0x5b3   :  { %v2555_v9 = vsel %vm5613_vm12, %v3696_v31, %v3775_v60  ;;  %v2553_v59 = vsel %vm5614_vm13, %v3695_v34, %v3645_v55  ;;  %3077 = vmatprep.subr.bf16.mxu1 %v3076_v22  ;;  %v2556_v27 = vsel %vm5615_vm8, %v3775_v60, %v3776_v12 }
 0x5b4   :  { %v3046_v47 = vpack.c.bf16 %v2555_v9, %v2553_v59  ;;  %v3779_v63 = vpop.permute.xlu0 %3778  ;;  %v3044_v36 = vpack.c.bf16 %v2556_v27, %v2554_v44 }
 0x5b5   :  { %v3781_v42 = vunpack.i.h.bf16 %v3779_v63  ;;  %v3780_v57 = vunpack.i.l.bf16 %v3779_v63 }
 0x5b6   :  { %3045 = vmatprep.subr.bf16.mxu0 %v3044_v36  ;;  %3079 = vmatpush1.bf16.msra.mxu1 %v5616_v6 }
 0x5b7   :  { %3047 = vmatpush1.bf16.msra.mxu0 %v3046_v47  ;;  %v2598_v24 = vsel %vm5618_vm5, %v3780_v57, %v3781_v42 }
 0x5b8   :  { %v3784_v43 = vpop.permute.xlu0 %3783  ;;  %v3080_v22 = vpack.c.bf16 %v2598_v24, %v2596_v1 }
 0x5b9   :  { %v3786_v37 = vunpack.i.h.bf16 %v3784_v43  ;;  %v3785_v7 = vunpack.i.l.bf16 %v3784_v43 }
 0x5ba   :  { %2767 = vmatmul.mubr.f32.vlgmr.msra.gmra.mrb[8].mxu0 %v2694_v45  ;;  %3081 = vmatprep.subr.bf16.mxu1 %v3080_v22 }
 0x5bb   :  { %v2595_v17 = vsel %vm5619_vm6, %v3785_v7, %v3675_v48  ;;  %v2597_v50 = vsel %vm5620_vm7, %v3786_v37, %v3780_v57 }
 0x5bc   :  { %v3082_v29 = vpack.c.bf16 %v2597_v50, %v2595_v17 }
 0x5be   :  { %3083 = vmatpush1.bf16.msra.mxu1 %v3082_v29 }
 0x5c1   :  { %2838 = vmatmul.mubr.f32.vlgmr.msra.gmra.mrb[8].mxu1 %v2694_v45  ;;  %v2684_v21 = vpop.permute.xlu1 %2683 }
 0x5c2   :  { %v2689_v38 = vrot.slane %v2684_v21, %v2688_v56 }
 0x68d   :  { %v2768_v46 = vpop.f32.mrb[8].mxu0 }
 0x68e   :  { %v2769_v14 = vadd.f32 %v2768_v46, %v2689_v38  ;;  %v2770_v39 = vpop.f32.mrb[9].mxu0 }
 0x68f   :  { %v2771_v2 = vadd.f32 %v2770_v39, %v2689_v38 }
 0x691   :  { %v2846_v4 = vcombine.low %v2769_v14, %v2771_v2 }
 0x693   :  { %v2853_v25 = vrot.slane %v2846_v4, %v2852_v62 }
 0x694   :  { %v2839_v33 = vpop.f32.mrb[8].mxu1 }
 0x695   :  { %v2860_v28 = vrot.slane %v2853_v25, %v2852_v62  ;;  %v2840_v30 = vadd.f32 %v2839_v33, %v2689_v38  ;;  %v2841_v35 = vpop.f32.mrb[9].mxu1 }
 0x696   :  { %v2842_v20 = vadd.f32 %v2841_v35, %v2689_v38 }
 0x697   :  { %2866 = vst.msk [vmem:[%s5417_s7] sm:$0x3] %vm2864_vm11, %v2860_v28 }
 0x698   :  { %v2869_v26 = vcombine.low %v2840_v30, %v2842_v20 }
 0x69a   :  { %v2876_v8 = vrot.slane %v2869_v26, %v2852_v62 }
 0x69c   :  { %v2883_v53 = vrot.slane %v2876_v8, %v2852_v62 }
 0x69e   :  { %2907 = vst.msk [vmem:[%s5417_s7 + $0x2] sm:$0x3] %vm2864_vm11, %v2883_v53 }

</bundles_post_ra>
